<compile_context>
chip_gen: v5e
topology: v5e:2x2
jax: 0.10.0
libtpu: 0.0.40
codegen_flags: <defaults>
</compile_context>

<pallas_src>
import jax
import jax.numpy as jnp
from jax.experimental import pallas as pl
from jax.experimental.pallas import tpu as pltpu

MODEL_CONFIG = {
    "hidden_dim": 32,
    "dropout_rate": 0.0,   # dropout is identity at inference
    "batch_norm": False,
    "layer_norm": True,
    "residual": True,
}

LN_EPS = 1e-5
OUT_LANES = 128            # lane-dense output slab width

# measured fraction-of-HBM-roofline per square tile width (Pallas, v6e)
_TILE_EFF = {128: 0.29, 256: 0.63, 512: 0.85, 1024: 0.86}


def _round_up(x, m):
    return ((x + m - 1) // m) * m


def pick_block(n, override=None):
    """Square adj tile: balance DMA efficiency vs padding waste; prefer gm>=2
    (v7x megacore). Returns (block, n_pad)."""
    if override is not None:
        return override, _round_up(n, override)
    best = None
    for b, eff in _TILE_EFF.items():
        n_pad = _round_up(n, b)
        gm = n_pad // b
        traffic_mult = (n_pad * n_pad) / float(n * n)   # padded adj bytes / useful
        score = eff / traffic_mult
        if gm == 1:
            score *= 0.5                                # one idle TC on v7x
        if best is None or score > best[0] or (score == best[0] and b > best[1]):
            best = (score, b, n_pad)
    return best[1], best[2]


def _vmem_budget(bm, bk, h):
    need = (2 * bm * bk * 2             # adj tiles, double-buffered (bf16)
            + 2 * bk * h * 4            # xw1 / h1 column tiles (f32)
            + 2 * bk * h * 4            # second h1 stream slack
            + 2 * bm * h * 4            # layer-1 resident output tiles
            + 2 * bm * h * 4            # layer-2 residual row tiles
            + 2 * bm * OUT_LANES * 4    # lane-dense output tiles
            + bm * h * 4                # layer-2 accumulator scratch
            + (2 << 20))                # params + headroom
    return int(min(max(need, 16 << 20), 48 << 20))


def _layer_norm(h, gamma, beta):
    mu = jnp.mean(h, axis=-1, keepdims=True)
    var = jnp.mean((h - mu) * (h - mu), axis=-1, keepdims=True)
    return (h - mu) * jax.lax.rsqrt(var + LN_EPS) * gamma + beta


# ------------- layer 1: h1 = relu(LN1(adj @ xw1 + b1)), xw1 = x @ W1 -------------
def gcn_layer1_kernel(adj_ref, xw1_ref, b1_ref, g1_ref, be1_ref, h1_ref):
    k = pl.program_id(1)

    @pl.when(k == 0)
    def _():
        h1_ref[...] = jnp.zeros_like(h1_ref)

    # bf16 x bf16 on the MXU, f32 accumulation directly into the resident
    # output block (output index map constant along k).
    h1_ref[...] += jnp.dot(adj_ref[...], xw1_ref[...].astype(jnp.bfloat16),
                           preferred_element_type=jnp.float32)

    @pl.when(k == pl.num_programs(1) - 1)
    def _():
        h = h1_ref[...] + b1_ref[...]
        h = _layer_norm(h, g1_ref[...], be1_ref[...])     # f32 elementwise
        h1_ref[...] = jnp.maximum(h, 0.0)                 # relu; dropout(0)=id


# -------- layer 2 + residual + final linear, lane-dense (bm, 128) output --------
def gcn_layer2_kernel(adj_ref, h1c_ref, h1r_ref,
                      w2_ref, b2_ref, g2_ref, be2_ref, wf_ref, bf_ref,
                      out_ref, acc_ref):
    k = pl.program_id(1)

    @pl.when(k == 0)
    def _():
        acc_ref[...] = jnp.zeros_like(acc_ref)

    acc_ref[...] += jnp.dot(adj_ref[...], h1c_ref[...].astype(jnp.bfloat16),
                            preferred_element_type=jnp.float32)

    @pl.when(k == pl.num_programs(1) - 1)
    def _():
        h = jnp.dot(acc_ref[...], w2_ref[...],
                    preferred_element_type=jnp.float32) + b2_ref[...]
        h = _layer_norm(h, g2_ref[...], be2_ref[...])
        h = jnp.maximum(h, 0.0) + h1r_ref[...]             # residual (f32)
        # fused final linear; Wf padded to 128 lanes -> unmasked vst
        out_ref[...] = (jnp.dot(h, wf_ref[...],
                                preferred_element_type=jnp.float32)
                        + bf_ref[...])


# --------------------------- host-side preparation ---------------------------
def prepare_graph(adj_hat, *, block=None):
    """One-time per-graph prep (hoisted out of the jitted forward): pick the
    tile size and pad + bf16-cast the O(N^2) adjacency."""
    n = adj_hat.shape[0]
    b, n_pad = pick_block(n, block)
    adj_b = jnp.zeros((n_pad, n_pad), jnp.bfloat16)
    adj_b = adj_b.at[:n, :n].set(adj_hat.astype(jnp.bfloat16))
    return adj_b, b


def prepare_features(x, n_pad):
    n, f = x.shape
    return jnp.zeros((n_pad, f), jnp.float32).at[:n, :].set(x.astype(jnp.float32))


# --------------------------------- forward ----------------------------------
def gnn_forward(adj_b, x_p, params, *, num_nodes, block):
    n_pad = adj_b.shape[0]
    bm = bk = block
    gm, gk = n_pad // bm, n_pad // bk
    h = params["w1"].shape[1]

    # tiny O(N*H) param-dependent prep (stays inside the jitted forward)
    xw1 = jnp.dot(x_p, params["w1"], precision=jax.lax.Precision.HIGHEST)
    wf_pad = jnp.zeros((h, OUT_LANES), jnp.float32).at[:, 0:1].set(params["wf"])
    bf_pad = jnp.zeros((1, OUT_LANES), jnp.float32).at[:, 0:1].set(params["bf"])

    cparams = pltpu.CompilerParams(
        dimension_semantics=("parallel", "arbitrary"),   # rows -> TCs, K last
        vmem_limit_bytes=_vmem_budget(bm, bk, h))

    const = lambda i, k: (0, 0)
    adj_spec = pl.BlockSpec((bm, bk), lambda i, k: (i, k))

    # ---------------- layer 1 ----------------
    h1 = pl.pallas_call(
        gcn_layer1_kernel,
        out_shape=jax.ShapeDtypeStruct((n_pad, h), jnp.float32),
        grid_spec=pltpu.PrefetchScalarGridSpec(
            num_scalar_prefetch=0,
            grid=(gm, gk),
            in_specs=[
                adj_spec,                                          # adj tile
                pl.BlockSpec((bk, h), lambda i, k: (k, 0)),        # xw1 col tile
                pl.BlockSpec((1, h), const),                       # b1
                pl.BlockSpec((1, h), const),                       # gamma1
                pl.BlockSpec((1, h), const),                       # beta1
            ],
            out_specs=pl.BlockSpec((bm, h), lambda i, k: (i, 0))), # resident acc
        compiler_params=cparams,
    )(adj_b, xw1, params["b1"], params["g1"], params["be1"])

    # -------- layer 2 + residual + final linear --------
    out_slab = pl.pallas_call(
        gcn_layer2_kernel,
        out_shape=jax.ShapeDtypeStruct((n_pad, OUT_LANES), jnp.float32),
        grid_spec=pltpu.PrefetchScalarGridSpec(
            num_scalar_prefetch=0,
            grid=(gm, gk),
            in_specs=[
                adj_spec,                                          # adj tile
                pl.BlockSpec((bk, h), lambda i, k: (k, 0)),        # h1 col (MXU)
                pl.BlockSpec((bm, h), lambda i, k: (i, 0)),        # h1 row (resid)
                pl.BlockSpec((h, h), const),                       # W2
                pl.BlockSpec((1, h), const),                       # b2
                pl.BlockSpec((1, h), const),                       # gamma2
                pl.BlockSpec((1, h), const),                       # beta2
                pl.BlockSpec((h, OUT_LANES), const),               # Wf (padded)
                pl.BlockSpec((1, OUT_LANES), const),               # bf (padded)
            ],
            out_specs=pl.BlockSpec((bm, OUT_LANES), lambda i, k: (i, 0)),
            scratch_shapes=[pltpu.VMEM((bm, h), jnp.float32)]),
        compiler_params=cparams,
    )(adj_b, h1, h1,
      params["w2"], params["b2"], params["g2"], params["be2"], wf_pad, bf_pad)

    return out_slab[:num_nodes, 0:1]


# --------------------------------- utilities --------------------------------
def build_normalized_adjacency(edge_index, num_nodes):
    """Dense GCN-normalized adjacency: D^{-1/2} (A + I) D^{-1/2}."""
    src, dst = edge_index[0], edge_index[1]
    a = jnp.zeros((num_nodes, num_nodes), jnp.float32)
    a = a.at[dst, src].add(1.0)                 # message flows src -> dst
    a = a + jnp.eye(num_nodes, dtype=jnp.float32)
    deg = jnp.sum(a, axis=1)
    dinv = jax.lax.rsqrt(jnp.maximum(deg, 1e-12))
    return dinv[:, None] * a * dinv[None, :]


def init_params(key, node_feature_dim, hidden_dim):
    ks = jax.random.split(key, 3)

    def glorot(k, shape):
        fan_in, fan_out = shape[0], shape[1]
        lim = (6.0 / (fan_in + fan_out)) ** 0.5
        return jax.random.uniform(k, shape, jnp.float32, -lim, lim)

    return {
        "w1": glorot(ks[0], (node_feature_dim, hidden_dim)),
        "b1": jnp.zeros((1, hidden_dim), jnp.float32),
        "g1": jnp.ones((1, hidden_dim), jnp.float32),
        "be1": jnp.zeros((1, hidden_dim), jnp.float32),
        "w2": glorot(ks[1], (hidden_dim, hidden_dim)),
        "b2": jnp.zeros((1, hidden_dim), jnp.float32),
        "g2": jnp.ones((1, hidden_dim), jnp.float32),
        "be2": jnp.zeros((1, hidden_dim), jnp.float32),
        "wf": glorot(ks[2], (hidden_dim, 1)),
        "bf": jnp.zeros((1, 1), jnp.float32),
    }


def _reference_forward(adj_hat, x, params):
    """Pure-JAX reference mirroring the kernel's bf16 MXU operands / f32 accum."""
    hp = jax.lax.Precision.HIGHEST

    def ln(hh, g, b):
        mu = hh.mean(-1, keepdims=True)
        var = ((hh - mu) ** 2).mean(-1, keepdims=True)
        return (hh - mu) * jax.lax.rsqrt(var + LN_EPS) * g + b

    adj_b = adj_hat.astype(jnp.bfloat16)
    xw1 = jnp.dot(x, params["w1"], precision=hp)
    agg1 = jnp.dot(adj_b, xw1.astype(jnp.bfloat16),
                   preferred_element_type=jnp.float32)
    h1 = jnp.maximum(ln(agg1 + params["b1"], params["g1"], params["be1"]), 0.0)
    agg2 = jnp.dot(adj_b, h1.astype(jnp.bfloat16),
                   preferred_element_type=jnp.float32)
    h2 = jnp.maximum(ln(jnp.dot(agg2, params["w2"], precision=hp) + params["b2"],
                        params["g2"], params["be2"]), 0.0)
    h2 = h2 + h1
    return jnp.dot(h2, params["wf"], precision=hp) + params["bf"]


if __name__ == "__main__":
    key = jax.random.PRNGKey(0)
    N = 300                      # nodes (not a tile multiple: exercises padding)
    F = 8                        # node_feature_dim
    H = MODEL_CONFIG["hidden_dim"]

    k_x, k_p = jax.random.split(key)
    x = jax.random.normal(k_x, (N, F), jnp.float32)

    # deterministic undirected ring graph (both edge directions listed)
    src = jnp.arange(N, dtype=jnp.int32)
    dst = (src + 1) % N
    edge_index = jnp.stack([jnp.concatenate([src, dst]),
                            jnp.concatenate([dst, src])], axis=0)

    adj_hat = build_normalized_adjacency(edge_index, N)
    params = init_params(k_p, F, H)

    # per-graph O(N^2) prep hoisted out of the jitted forward (reused per call)
    adj_b, block = prepare_graph(adj_hat)
    x_p = prepare_features(x, adj_b.shape[0])

    fwd = jax.jit(gnn_forward, static_argnames=("num_nodes", "block"))
    out = jax.block_until_ready(fwd(adj_b, x_p, params, num_nodes=N, block=block))
    assert out.shape == (N, 1), out.shape

    ref_out = _reference_forward(adj_hat, x, params)
    max_err = float(jnp.max(jnp.abs(out - ref_out)))
    assert jnp.allclose(out, ref_out, atol=1e-2, rtol=1e-2), max_err

    print("KERNEL_OK")
</pallas_src>

<mosaic_0001>
module attributes {stable_mosaic.version = 11 : i64} {
  func.func @gcn_layer2_kernel(%arg0: i32, %arg1: i32, %arg2: memref<256x256xbf16, #tpu.memory_space<vmem>>, %arg3: memref<256x32xf32, #tpu.memory_space<vmem>>, %arg4: memref<256x32xf32, #tpu.memory_space<vmem>>, %arg5: memref<32x32xf32, #tpu.memory_space<vmem>>, %arg6: memref<1x32xf32, #tpu.memory_space<vmem>>, %arg7: memref<1x32xf32, #tpu.memory_space<vmem>>, %arg8: memref<1x32xf32, #tpu.memory_space<vmem>>, %arg9: memref<32x128xf32, #tpu.memory_space<vmem>>, %arg10: memref<1x128xf32, #tpu.memory_space<vmem>>, %arg11: memref<256x128xf32, #tpu.memory_space<vmem>>, %arg12: memref<256x32xf32, #tpu.memory_space<vmem>>) attributes {dimension_semantics = [#tpu.dimension_semantics<parallel>, #tpu.dimension_semantics<arbitrary>], iteration_bounds = array<i64: 2, 2>, scalar_prefetch = 0 : i64, scratch_operands = 1 : i64, tpu.core_type = #tpu.core_type<tc>, window_params = [{transform_indices = @transform_0, window_bounds = array<i64: 256, 256>}, {transform_indices = @transform_1, window_bounds = array<i64: 256, 32>}, {transform_indices = @transform_2, window_bounds = array<i64: 256, 32>}, {pipeline_mode = #tpu.pipeline_mode<synchronous>, transform_indices = @transform_3, window_bounds = array<i64: 32, 32>}, {pipeline_mode = #tpu.pipeline_mode<synchronous>, transform_indices = @transform_4, window_bounds = array<i64: 1, 32>}, {pipeline_mode = #tpu.pipeline_mode<synchronous>, transform_indices = @transform_5, window_bounds = array<i64: 1, 32>}, {pipeline_mode = #tpu.pipeline_mode<synchronous>, transform_indices = @transform_6, window_bounds = array<i64: 1, 32>}, {pipeline_mode = #tpu.pipeline_mode<synchronous>, transform_indices = @transform_7, window_bounds = array<i64: 32, 128>}, {pipeline_mode = #tpu.pipeline_mode<synchronous>, transform_indices = @transform_8, window_bounds = array<i64: 1, 128>}, {transform_indices = @transform_9, window_bounds = array<i64: 256, 128>}]} {
    %c0_i32 = arith.constant 0 : i32
    %0 = arith.cmpi eq, %arg1, %c0_i32 : i32
    %1 = arith.extui %0 : i1 to i32
    %c0_i32_0 = arith.constant 0 : i32
    %2 = arith.cmpi ne, %1, %c0_i32_0 : i32
    scf.if %2 {
      %cst_9 = arith.constant 0.000000e+00 : f32
      %13 = vector.broadcast %cst_9 : f32 to vector<256x32xf32>
      %c0_10 = arith.constant 0 : index
      %c0_11 = arith.constant 0 : index
      %14 = vector.load %arg12[%c0_10, %c0_11] : memref<256x32xf32, #tpu.memory_space<vmem>>, vector<256x32xf32>
      tpu.vector_store %arg12[%c0_10, %c0_11], %13 {strides = array<i32>} : memref<256x32xf32, #tpu.memory_space<vmem>>, vector<256x32xf32>,
    } else {
    }
    %c0 = arith.constant 0 : index
    %c0_1 = arith.constant 0 : index
    %3 = vector.load %arg12[%c0, %c0_1] : memref<256x32xf32, #tpu.memory_space<vmem>>, vector<256x32xf32>
    %c0_2 = arith.constant 0 : index
    %c0_3 = arith.constant 0 : index
    %4 = vector.load %arg2[%c0_2, %c0_3] : memref<256x256xbf16, #tpu.memory_space<vmem>>, vector<256x256xbf16>
    %c0_4 = arith.constant 0 : index
    %c0_5 = arith.constant 0 : index
    %5 = vector.load %arg3[%c0_4, %c0_5] : memref<256x32xf32, #tpu.memory_space<vmem>>, vector<256x32xf32>
    %6 = arith.truncf %5 : vector<256x32xf32> to vector<256x32xbf16>
    %cst = arith.constant dense<0.000000e+00> : vector<256x32xf32>
    %7 = tpu.matmul %4, %6, %cst {dimension_numbers = #tpu.dot_dimension_numbers<[1], [0], [0], [1], [0, 0, 1, 1], [], []>} : vector<256x256xbf16>, vector<256x32xbf16>, vector<256x32xf32> -> vector<256x32xf32>
    %8 = arith.addf %3, %7 : vector<256x32xf32>
    %c0_6 = arith.constant 0 : index
    %c0_7 = arith.constant 0 : index
    %9 = vector.load %arg12[%c0_6, %c0_7] : memref<256x32xf32, #tpu.memory_space<vmem>>, vector<256x32xf32>
    tpu.vector_store %arg12[%c0_6, %c0_7], %8 {strides = array<i32>} : memref<256x32xf32, #tpu.memory_space<vmem>>, vector<256x32xf32>,
    %c1_i32 = arith.constant 1 : i32
    %10 = arith.cmpi eq, %arg1, %c1_i32 : i32
    %11 = arith.extui %10 : i1 to i32
    %c0_i32_8 = arith.constant 0 : i32
    %12 = arith.cmpi ne, %11, %c0_i32_8 : i32
    scf.if %12 {
      %c0_9 = arith.constant 0 : index
      %c0_10 = arith.constant 0 : index
      %13 = vector.load %arg12[%c0_9, %c0_10] : memref<256x32xf32, #tpu.memory_space<vmem>>, vector<256x32xf32>
      %c0_11 = arith.constant 0 : index
      %c0_12 = arith.constant 0 : index
      %14 = vector.load %arg5[%c0_11, %c0_12] : memref<32x32xf32, #tpu.memory_space<vmem>>, vector<32x32xf32>
      %cst_13 = arith.constant dense<0.000000e+00> : vector<256x32xf32>
      %15 = tpu.matmul %13, %14, %cst_13 {dimension_numbers = #tpu.dot_dimension_numbers<[1], [0], [0], [1], [0, 0, 1, 1], [], []>} : vector<256x32xf32>, vector<32x32xf32>, vector<256x32xf32> -> vector<256x32xf32>
      %c0_14 = arith.constant 0 : index
      %c0_15 = arith.constant 0 : index
      %16 = vector.load %arg6[%c0_14, %c0_15] : memref<1x32xf32, #tpu.memory_space<vmem>>, vector<1x32xf32>
      %17 = vector.broadcast %16 : vector<1x32xf32> to vector<256x32xf32>
      %18 = arith.addf %15, %17 : vector<256x32xf32>
      %c0_16 = arith.constant 0 : index
      %c0_17 = arith.constant 0 : index
      %19 = vector.load %arg7[%c0_16, %c0_17] : memref<1x32xf32, #tpu.memory_space<vmem>>, vector<1x32xf32>
      %c0_18 = arith.constant 0 : index
      %c0_19 = arith.constant 0 : index
      %20 = vector.load %arg8[%c0_18, %c0_19] : memref<1x32xf32, #tpu.memory_space<vmem>>, vector<1x32xf32>
      %cst_20 = arith.constant dense<0.000000e+00> : vector<256xf32>
      %21 = vector.multi_reduction <add>, %18, %cst_20 [1] : vector<256x32xf32> to vector<256xf32>
      %22 = vector.shape_cast %21 : vector<256xf32> to vector<256x1xf32>
      %cst_21 = arith.constant 3.200000e+01 : f32
      %23 = vector.broadcast %cst_21 : f32 to vector<256x1xf32>
      %24 = arith.divf %22, %23 : vector<256x1xf32>
      %25 = vector.broadcast %24 : vector<256x1xf32> to vector<256x32xf32>
      %26 = arith.subf %18, %25 : vector<256x32xf32>
      %27 = vector.broadcast %24 : vector<256x1xf32> to vector<256x32xf32>
      %28 = arith.subf %18, %27 : vector<256x32xf32>
      %29 = arith.mulf %26, %28 : vector<256x32xf32>
      %cst_22 = arith.constant dense<0.000000e+00> : vector<256xf32>
      %30 = vector.multi_reduction <add>, %29, %cst_22 [1] : vector<256x32xf32> to vector<256xf32>
      %31 = vector.shape_cast %30 : vector<256xf32> to vector<256x1xf32>
      %cst_23 = arith.constant 3.200000e+01 : f32
      %32 = vector.broadcast %cst_23 : f32 to vector<256x1xf32>
      %33 = arith.divf %31, %32 : vector<256x1xf32>
      %34 = vector.broadcast %24 : vector<256x1xf32> to vector<256x32xf32>
      %35 = arith.subf %18, %34 : vector<256x32xf32>
      %cst_24 = arith.constant 9.99999974E-6 : f32
      %36 = vector.broadcast %cst_24 : f32 to vector<256x1xf32>
      %37 = arith.addf %33, %36 : vector<256x1xf32>
      %38 = math.rsqrt %37 : vector<256x1xf32>
      %39 = vector.broadcast %38 : vector<256x1xf32> to vector<256x32xf32>
      %40 = arith.mulf %35, %39 : vector<256x32xf32>
      %41 = vector.broadcast %19 : vector<1x32xf32> to vector<256x32xf32>
      %42 = arith.mulf %40, %41 : vector<256x32xf32>
      %43 = vector.broadcast %20 : vector<1x32xf32> to vector<256x32xf32>
      %44 = arith.addf %42, %43 : vector<256x32xf32>
      %cst_25 = arith.constant 0.000000e+00 : f32
      %45 = vector.broadcast %cst_25 : f32 to vector<256x32xf32>
      %46 = arith.maximumf %44, %45 : vector<256x32xf32>
      %c0_26 = arith.constant 0 : index
      %c0_27 = arith.constant 0 : index
      %47 = vector.load %arg4[%c0_26, %c0_27] : memref<256x32xf32, #tpu.memory_space<vmem>>, vector<256x32xf32>
      %48 = arith.addf %46, %47 : vector<256x32xf32>
      %c0_28 = arith.constant 0 : index
      %c0_29 = arith.constant 0 : index
      %49 = vector.load %arg9[%c0_28, %c0_29] : memref<32x128xf32, #tpu.memory_space<vmem>>, vector<32x128xf32>
      %cst_30 = arith.constant dense<0.000000e+00> : vector<256x128xf32>
      %50 = tpu.matmul %48, %49, %cst_30 {dimension_numbers = #tpu.dot_dimension_numbers<[1], [0], [0], [1], [0, 0, 1, 1], [], []>} : vector<256x32xf32>, vector<32x128xf32>, vector<256x128xf32> -> vector<256x128xf32>
      %c0_31 = arith.constant 0 : index
      %c0_32 = arith.constant 0 : index
      %51 = vector.load %arg10[%c0_31, %c0_32] : memref<1x128xf32, #tpu.memory_space<vmem>>, vector<1x128xf32>
      %52 = vector.broadcast %51 : vector<1x128xf32> to vector<256x128xf32>
      %53 = arith.addf %50, %52 : vector<256x128xf32>
      %c0_33 = arith.constant 0 : index
      %c0_34 = arith.constant 0 : index
      %54 = vector.load %arg11[%c0_33, %c0_34] : memref<256x128xf32, #tpu.memory_space<vmem>>, vector<256x128xf32>
      tpu.vector_store %arg11[%c0_33, %c0_34], %53 {strides = array<i32>} : memref<256x128xf32, #tpu.memory_space<vmem>>, vector<256x128xf32>,
    } else {
    }
    return
  }
  func.func @transform_0(%arg0: i32, %arg1: i32) -> (i32, i32) {
    %c0_i32 = arith.constant 0 : i32
    return %arg0, %arg1 : i32, i32
  }
  func.func @transform_1(%arg0: i32, %arg1: i32) -> (i32, i32) {
    %c0_i32 = arith.constant 0 : i32
    %c0_i32_0 = arith.constant 0 : i32
    return %arg1, %c0_i32 : i32, i32
  }
  func.func @transform_2(%arg0: i32, %arg1: i32) -> (i32, i32) {
    %c0_i32 = arith.constant 0 : i32
    %c0_i32_0 = arith.constant 0 : i32
    return %arg0, %c0_i32 : i32, i32
  }
  func.func @transform_3(%arg0: i32, %arg1: i32) -> (i32, i32) {
    %c0_i32 = arith.constant 0 : i32
    %c0_i32_0 = arith.constant 0 : i32
    %c0_i32_1 = arith.constant 0 : i32
    return %c0_i32, %c0_i32_0 : i32, i32
  }
  func.func @transform_4(%arg0: i32, %arg1: i32) -> (i32, i32) {
    %c0_i32 = arith.constant 0 : i32
    %c0_i32_0 = arith.constant 0 : i32
    %c0_i32_1 = arith.constant 0 : i32
    return %c0_i32, %c0_i32_0 : i32, i32
  }
  func.func @transform_5(%arg0: i32, %arg1: i32) -> (i32, i32) {
    %c0_i32 = arith.constant 0 : i32
    %c0_i32_0 = arith.constant 0 : i32
    %c0_i32_1 = arith.constant 0 : i32
    return %c0_i32, %c0_i32_0 : i32, i32
  }
  func.func @transform_6(%arg0: i32, %arg1: i32) -> (i32, i32) {
    %c0_i32 = arith.constant 0 : i32
    %c0_i32_0 = arith.constant 0 : i32
    %c0_i32_1 = arith.constant 0 : i32
    return %c0_i32, %c0_i32_0 : i32, i32
  }
  func.func @transform_7(%arg0: i32, %arg1: i32) -> (i32, i32) {
    %c0_i32 = arith.constant 0 : i32
    %c0_i32_0 = arith.constant 0 : i32
    %c0_i32_1 = arith.constant 0 : i32
    return %c0_i32, %c0_i32_0 : i32, i32
  }
  func.func @transform_8(%arg0: i32, %arg1: i32) -> (i32, i32) {
    %c0_i32 = arith.constant 0 : i32
    %c0_i32_0 = arith.constant 0 : i32
    %c0_i32_1 = arith.constant 0 : i32
    return %c0_i32, %c0_i32_0 : i32, i32
  }
  func.func @transform_9(%arg0: i32, %arg1: i32) -> (i32, i32) {
    %c0_i32 = arith.constant 0 : i32
    %c0_i32_0 = arith.constant 0 : i32
    return %arg0, %c0_i32 : i32, i32
  }
}

module attributes {stable_mosaic.version = 11 : i64} {
  func.func @gcn_layer1_kernel(%arg0: i32, %arg1: i32, %arg2: memref<256x256xbf16, #tpu.memory_space<vmem>>, %arg3: memref<256x32xf32, #tpu.memory_space<vmem>>, %arg4: memref<1x32xf32, #tpu.memory_space<vmem>>, %arg5: memref<1x32xf32, #tpu.memory_space<vmem>>, %arg6: memref<1x32xf32, #tpu.memory_space<vmem>>, %arg7: memref<256x32xf32, #tpu.memory_space<vmem>>) attributes {dimension_semantics = [#tpu.dimension_semantics<parallel>, #tpu.dimension_semantics<arbitrary>], iteration_bounds = array<i64: 2, 2>, scalar_prefetch = 0 : i64, scratch_operands = 0 : i64, tpu.core_type = #tpu.core_type<tc>, window_params = [{transform_indices = @transform_0, window_bounds = array<i64: 256, 256>}, {transform_indices = @transform_1, window_bounds = array<i64: 256, 32>}, {pipeline_mode = #tpu.pipeline_mode<synchronous>, transform_indices = @transform_2, window_bounds = array<i64: 1, 32>}, {pipeline_mode = #tpu.pipeline_mode<synchronous>, transform_indices = @transform_3, window_bounds = array<i64: 1, 32>}, {pipeline_mode = #tpu.pipeline_mode<synchronous>, transform_indices = @transform_4, window_bounds = array<i64: 1, 32>}, {transform_indices = @transform_5, window_bounds = array<i64: 256, 32>}]} {
    %c0_i32 = arith.constant 0 : i32
    %0 = arith.cmpi eq, %arg1, %c0_i32 : i32
    %1 = arith.extui %0 : i1 to i32
    %c0_i32_0 = arith.constant 0 : i32
    %2 = arith.cmpi ne, %1, %c0_i32_0 : i32
    scf.if %2 {
      %cst_9 = arith.constant 0.000000e+00 : f32
      %13 = vector.broadcast %cst_9 : f32 to vector<256x32xf32>
      %c0_10 = arith.constant 0 : index
      %c0_11 = arith.constant 0 : index
      %14 = vector.load %arg7[%c0_10, %c0_11] : memref<256x32xf32, #tpu.memory_space<vmem>>, vector<256x32xf32>
      tpu.vector_store %arg7[%c0_10, %c0_11], %13 {strides = array<i32>} : memref<256x32xf32, #tpu.memory_space<vmem>>, vector<256x32xf32>,
    } else {
    }
    %c0 = arith.constant 0 : index
    %c0_1 = arith.constant 0 : index
    %3 = vector.load %arg7[%c0, %c0_1] : memref<256x32xf32, #tpu.memory_space<vmem>>, vector<256x32xf32>
    %c0_2 = arith.constant 0 : index
    %c0_3 = arith.constant 0 : index
    %4 = vector.load %arg2[%c0_2, %c0_3] : memref<256x256xbf16, #tpu.memory_space<vmem>>, vector<256x256xbf16>
    %c0_4 = arith.constant 0 : index
    %c0_5 = arith.constant 0 : index
    %5 = vector.load %arg3[%c0_4, %c0_5] : memref<256x32xf32, #tpu.memory_space<vmem>>, vector<256x32xf32>
    %6 = arith.truncf %5 : vector<256x32xf32> to vector<256x32xbf16>
    %cst = arith.constant dense<0.000000e+00> : vector<256x32xf32>
    %7 = tpu.matmul %4, %6, %cst {dimension_numbers = #tpu.dot_dimension_numbers<[1], [0], [0], [1], [0, 0, 1, 1], [], []>} : vector<256x256xbf16>, vector<256x32xbf16>, vector<256x32xf32> -> vector<256x32xf32>
    %8 = arith.addf %3, %7 : vector<256x32xf32>
    %c0_6 = arith.constant 0 : index
    %c0_7 = arith.constant 0 : index
    %9 = vector.load %arg7[%c0_6, %c0_7] : memref<256x32xf32, #tpu.memory_space<vmem>>, vector<256x32xf32>
    tpu.vector_store %arg7[%c0_6, %c0_7], %8 {strides = array<i32>} : memref<256x32xf32, #tpu.memory_space<vmem>>, vector<256x32xf32>,
    %c1_i32 = arith.constant 1 : i32
    %10 = arith.cmpi eq, %arg1, %c1_i32 : i32
    %11 = arith.extui %10 : i1 to i32
    %c0_i32_8 = arith.constant 0 : i32
    %12 = arith.cmpi ne, %11, %c0_i32_8 : i32
    scf.if %12 {
      %c0_9 = arith.constant 0 : index
      %c0_10 = arith.constant 0 : index
      %13 = vector.load %arg7[%c0_9, %c0_10] : memref<256x32xf32, #tpu.memory_space<vmem>>, vector<256x32xf32>
      %c0_11 = arith.constant 0 : index
      %c0_12 = arith.constant 0 : index
      %14 = vector.load %arg4[%c0_11, %c0_12] : memref<1x32xf32, #tpu.memory_space<vmem>>, vector<1x32xf32>
      %15 = vector.broadcast %14 : vector<1x32xf32> to vector<256x32xf32>
      %16 = arith.addf %13, %15 : vector<256x32xf32>
      %c0_13 = arith.constant 0 : index
      %c0_14 = arith.constant 0 : index
      %17 = vector.load %arg5[%c0_13, %c0_14] : memref<1x32xf32, #tpu.memory_space<vmem>>, vector<1x32xf32>
      %c0_15 = arith.constant 0 : index
      %c0_16 = arith.constant 0 : index
      %18 = vector.load %arg6[%c0_15, %c0_16] : memref<1x32xf32, #tpu.memory_space<vmem>>, vector<1x32xf32>
      %cst_17 = arith.constant dense<0.000000e+00> : vector<256xf32>
      %19 = vector.multi_reduction <add>, %16, %cst_17 [1] : vector<256x32xf32> to vector<256xf32>
      %20 = vector.shape_cast %19 : vector<256xf32> to vector<256x1xf32>
      %cst_18 = arith.constant 3.200000e+01 : f32
      %21 = vector.broadcast %cst_18 : f32 to vector<256x1xf32>
      %22 = arith.divf %20, %21 : vector<256x1xf32>
      %23 = vector.broadcast %22 : vector<256x1xf32> to vector<256x32xf32>
      %24 = arith.subf %16, %23 : vector<256x32xf32>
      %25 = vector.broadcast %22 : vector<256x1xf32> to vector<256x32xf32>
      %26 = arith.subf %16, %25 : vector<256x32xf32>
      %27 = arith.mulf %24, %26 : vector<256x32xf32>
      %cst_19 = arith.constant dense<0.000000e+00> : vector<256xf32>
      %28 = vector.multi_reduction <add>, %27, %cst_19 [1] : vector<256x32xf32> to vector<256xf32>
      %29 = vector.shape_cast %28 : vector<256xf32> to vector<256x1xf32>
      %cst_20 = arith.constant 3.200000e+01 : f32
      %30 = vector.broadcast %cst_20 : f32 to vector<256x1xf32>
      %31 = arith.divf %29, %30 : vector<256x1xf32>
      %32 = vector.broadcast %22 : vector<256x1xf32> to vector<256x32xf32>
      %33 = arith.subf %16, %32 : vector<256x32xf32>
      %cst_21 = arith.constant 9.99999974E-6 : f32
      %34 = vector.broadcast %cst_21 : f32 to vector<256x1xf32>
      %35 = arith.addf %31, %34 : vector<256x1xf32>
      %36 = math.rsqrt %35 : vector<256x1xf32>
      %37 = vector.broadcast %36 : vector<256x1xf32> to vector<256x32xf32>
      %38 = arith.mulf %33, %37 : vector<256x32xf32>
      %39 = vector.broadcast %17 : vector<1x32xf32> to vector<256x32xf32>
      %40 = arith.mulf %38, %39 : vector<256x32xf32>
      %41 = vector.broadcast %18 : vector<1x32xf32> to vector<256x32xf32>
      %42 = arith.addf %40, %41 : vector<256x32xf32>
      %cst_22 = arith.constant 0.000000e+00 : f32
      %43 = vector.broadcast %cst_22 : f32 to vector<256x32xf32>
      %44 = arith.maximumf %42, %43 : vector<256x32xf32>
      %c0_23 = arith.constant 0 : index
      %c0_24 = arith.constant 0 : index
      %45 = vector.load %arg7[%c0_23, %c0_24] : memref<256x32xf32, #tpu.memory_space<vmem>>, vector<256x32xf32>
      tpu.vector_store %arg7[%c0_23, %c0_24], %44 {strides = array<i32>} : memref<256x32xf32, #tpu.memory_space<vmem>>, vector<256x32xf32>,
    } else {
    }
    return
  }
  func.func @transform_0(%arg0: i32, %arg1: i32) -> (i32, i32) {
    %c0_i32 = arith.constant 0 : i32
    return %arg0, %arg1 : i32, i32
  }
  func.func @transform_1(%arg0: i32, %arg1: i32) -> (i32, i32) {
    %c0_i32 = arith.constant 0 : i32
    %c0_i32_0 = arith.constant 0 : i32
    return %arg1, %c0_i32 : i32, i32
  }
  func.func @transform_2(%arg0: i32, %arg1: i32) -> (i32, i32) {
    %c0_i32 = arith.constant 0 : i32
    %c0_i32_0 = arith.constant 0 : i32
    %c0_i32_1 = arith.constant 0 : i32
    return %c0_i32, %c0_i32_0 : i32, i32
  }
  func.func @transform_3(%arg0: i32, %arg1: i32) -> (i32, i32) {
    %c0_i32 = arith.constant 0 : i32
    %c0_i32_0 = arith.constant 0 : i32
    %c0_i32_1 = arith.constant 0 : i32
    return %c0_i32, %c0_i32_0 : i32, i32
  }
  func.func @transform_4(%arg0: i32, %arg1: i32) -> (i32, i32) {
    %c0_i32 = arith.constant 0 : i32
    %c0_i32_0 = arith.constant 0 : i32
    %c0_i32_1 = arith.constant 0 : i32
    return %c0_i32, %c0_i32_0 : i32, i32
  }
  func.func @transform_5(%arg0: i32, %arg1: i32) -> (i32, i32) {
    %c0_i32 = arith.constant 0 : i32
    %c0_i32_0 = arith.constant 0 : i32
    return %arg0, %c0_i32 : i32, i32
  }
}

</mosaic_0001>

<bundles_post_ra>
// kernel: gnn_forward.2
= control target key start
LH: loop header
LB: loop body
LE: loop exit
PB: predicated region body
PF: predicated region fallthrough
CT: control target
= control target key end

     0   :  { %10 = vsyncpa [#allocation3], 0  ;;  %s3752_s0 = inlined_call_operand.hbm [shape: bf16[512,512], index: 0, kind: input, shape index: {}]   ;;  %s3753_s1 = inlined_call_operand.vmem [shape: f32[512,32], index: 1, kind: input, shape index: {}]   ;;  %s3754_s2 = inlined_call_operand.vmem [shape: f32[1,32], index: 2, kind: input, shape index: {}]   ;;  %s3755_s3 = inlined_call_operand.vmem [shape: f32[1,32], index: 3, kind: input, shape index: {}]   ;;  %s3756_s4 = inlined_call_operand.vmem [shape: f32[1,32], index: 4, kind: input, shape index: {}]   ;;  %s3757_s5 = inlined_call_operand.vmem [shape: f32[512,32], index: 5, kind: output, shape index: {}]  }
   0x1   :  { %12 = vsyncpa [#allocation3 + $0x1], 0  ;;  %s2330_s18 = smov 0   ;;  %s2332_s19 = smov 0  }
   0x2   :  { %s2334_s20 = smov 0   ;;  %s2336_s21 = smov 0  }
   0x3   :  { %s2338_s22 = smov 0   ;;  %s2340_s23 = smov 0  }
   0x4   :  { %s2342_s24 = smov 0   ;;  %s2344_s25 = smov 0  }
   0x5 LB: > { %3761 = sst [smem:[#allocation5_spill]] %s2285_s23  ;;  %s1854_s26 = sadd.s32 4294967295, %s2293_s25   ;;  %s2293_s25 = sphi %s2344_s25, %s18_s25   ;;  %s2289_s24 = sphi %s2342_s24, %s3791_s24   ;;  %s2285_s23 = sphi %s2340_s23, %s3785_s23   ;;  %s2281_s22 = sphi %s2338_s22, %s3790_s22   ;;  %s2277_s21 = sphi %s2336_s21, %s3784_s21   ;;  %s2273_s20 = sphi %s2334_s20, %s3789_s20   ;;  %s2269_s19 = sphi %s2332_s19, %s3788_s19   ;;  %s2265_s18 = sphi %s2330_s18, %s3787_s18  }
   0x6   : > { %s27_s27 = sadd.s32 1, %s2285_s23  ;;  %s30_s28 = sadd.s32 1, %s2289_s24 }
   0x7   : > { %p28_p0 = scmp.ge.s32.totalorder %s27_s27, 2  ;;  %s39_s29 = sadd.s32 1, %s2273_s20 }
   0x8   : > { %p46_p1 = scmp.ne.s32.totalorder %s2273_s20, %s2269_s19  ;;  %p47_p2 = scmp.eq.s32.totalorder %s2293_s25, 0 }
   0x9   : > { %s3793_s27 = smov (%p28_p0, %s27_s27), 0  ;;  %s3795_s28 = smov (!%p28_p0, %s30_s28), %s2289_s24 }
   0xa   : > { %3762 = sst [smem:[#allocation6_spill]] %s3793_s27  ;;  %s35_s30 = ssub.s32 %s2285_s23, %s3793_s27 }
   0xb   : > { %p32_p3 = scmp.ge.s32.totalorder %s3795_s28, 2  ;;  %p52_p4 = scmp.ne.s32.totalorder %s2269_s19, %s2265_s18 }
   0xc   : > { %p2381_p5 = por %p47_p2, %p46_p1  ;;  %p53_p6 = scmp.eq.s32.totalorder %s1854_s26, 0 }
   0xd   : > { %s3797_s28 = smov (%p32_p3, %s3795_s28), 0  ;;  %p2056_p8 = scmp.lt.s32.totalorder %s2293_s25, 4 }
   0xe   : > { %3764 = sst [smem:[#allocation7_spill]] %s3797_s28  ;;  %p2387_p7 = por %p53_p6, %p52_p4 }
   0xf   : > { %s34_s8 = ssub.s32 %s2289_s24, %s3797_s28  ;;  %s200_s10 = sand.u32 1, %s2273_s20  }
  0x10   : > { %s36_s9 = sor.u32 %s35_s30, %s34_s8  ;;  %s1858_s11 = sshll.u32 %s200_s10, 8 }
  0x11   : > { %p37_p9 = scmp.eq.s32.totalorder %s36_s9, 0  ;;  %s1860_s12 = sshll.u32 %s2285_s23, 1 }
  0x12   : > { %s2001_s14 = sshll.u32 %s2289_s24, 7  ;;  %s204_s16 = scalar_lea.vmem [#allocation2], %s1858_s11 }
  0x13   : > { %s2397_s13 = scalar_select %p37_p9, %s2273_s20, %s39_s29  }
  0x14   : > { %s210_s15 = sadd.s32 %s2001_s14, %s1860_s12  ;;  %s215_s17 = sshll.u32 %s204_s16, 4  ;;  %s216_s17 = int_to_ptr.vmem [resolvable:$true] %s215_s17 }
  0x15   : > { %s1862_s18 = sshll.u32 %s210_s15, 2  ;;  %p2053_p10 = pnand %p2056_p8, %p2381_p5 }
  0x16   : > { %s212_s28 = scalar_lea.hbm %s3752_s0, %s1862_s18  ;;  %s201_s8 = scalar_lea.sflag [#allocation3], %s200_s10 }
  0x17   : > { %s213_s30 = sshll.u32 %s212_s28, 4  ;;  %s2295_s29 = smov 256   ;;  %s214_s30 = int_to_ptr.hbm [resolvable:$true] %s213_s30 }
  0x18   : > { %s2296_s9 = smov 128   ;;  %s2297_s23 = smov 8  }
  0x19   : > { %2055 = dma.hbm_to_vmem [thread:$0]  (!%p2053_p10), %s214_s30, 4096, %s216_s17, %s201_s8, %s2295_s29, %s2296_s9, %s2297_s23  }
  0x1a   : > { %p1863_p11 = scmp.ge.s32.totalorder %s2293_s25, 1  ;;  %p232_p12 = scmp.lt.s32.totalorder %s2293_s25, 5 }
  0x1c   : > { %p233_p13 = pnand %p1863_p11, %p232_p12 }
  0x1d   : > { %s238_s11 = sand.u32 (!%p233_p13), 1, %s2269_s19  }
  0x1e   : > { %236 = sbr.rel (%p233_p13) target bundleno = 756 (0x2f4), region = 40  ;;  %s1864_s12 = sshll.u32 (!%p233_p13), %s238_s11, 8 }
  0x1f   : > { %s239_s27 = scalar_lea.sflag (!%p233_p13), [#allocation3], %s238_s11  ;;  %s2410_s14 = scalar_lea.vmem (!%p233_p13), [#allocation2], %s1864_s12 }
  0x23   : > { %2260 = dma.done.wait (%p2387_p7), %s239_s27, 4096  }
  0x24   : > { %2262 = vsyncadd (%p2387_p7), %s239_s27, 4294963200  ;;  %s1865_s28 = sshll.u32 %s2277_s21, 5  ;;  %s1867_s23 = sshll.u32 %s2281_s22, 5 }
  0x25   : > { %p278_p0 = scmp.lt.s32.totalorder %s1865_s28, 63  ;;  %p284_p1 = scmp.lt.s32.totalorder %s1867_s23, 63 }
  0x26   : > { %p1869_p2 = scmp.ne.s32.totalorder %s2277_s21, 0 }
  0x27   : > { %s3799_s28 = smov (!%p278_p0, %s1865_s28), 63  ;;  %s3801_s23 = smov (!%p284_p1, %s1867_s23), 63 }
  0x28   : > { %s1866_s6 = sshll.u32 %s3799_s28, 3  ;;  %s1868_s17 = sshll.u32 %s3801_s23, 3 }
  0x29   : > { %s2421_s16 = scalar_lea.vmem %s3753_s1, %s1866_s6  ;;  %s2426_s7 = scalar_lea.vmem %s3757_s5, %s1868_s17 }
  0x2a   : > { %292 = sbr.rel (%p1869_p2) target bundleno = 80 (0x50), region = 48 }
  0x2f   : > { %vm293_vm0 = vcmask 261120   ;;  %v2298_v0 = vmov 0.0  }
  0x30   : > { %294 = vst.msk [vmem:[%s2426_s7] sm:$0xff] %vm293_vm0, %v2298_v0 }
  0x31   : > { %295 = vst.msk [vmem:[%s2426_s7 + $0x8] sm:$0xff] %vm293_vm0, %v2298_v0 }
  0x32   : > { %296 = vst.msk [vmem:[%s2426_s7 + $0x10] sm:$0xff] %vm293_vm0, %v2298_v0 }
  0x33   : > { %297 = vst.msk [vmem:[%s2426_s7 + $0x18] sm:$0xff] %vm293_vm0, %v2298_v0 }
  0x34   : > { %298 = vst.msk [vmem:[%s2426_s7 + $0x20] sm:$0xff] %vm293_vm0, %v2298_v0 }
  0x35   : > { %299 = vst.msk [vmem:[%s2426_s7 + $0x28] sm:$0xff] %vm293_vm0, %v2298_v0 }
  0x36   : > { %300 = vst.msk [vmem:[%s2426_s7 + $0x30] sm:$0xff] %vm293_vm0, %v2298_v0 }
  0x37   : > { %301 = vst.msk [vmem:[%s2426_s7 + $0x38] sm:$0xff] %vm293_vm0, %v2298_v0 }
  0x38   : > { %302 = vst.msk [vmem:[%s2426_s7 + $0x40] sm:$0xff] %vm293_vm0, %v2298_v0 }
  0x39   : > { %303 = vst.msk [vmem:[%s2426_s7 + $0x48] sm:$0xff] %vm293_vm0, %v2298_v0 }
  0x3a   : > { %304 = vst.msk [vmem:[%s2426_s7 + $0x50] sm:$0xff] %vm293_vm0, %v2298_v0 }
  0x3b   : > { %305 = vst.msk [vmem:[%s2426_s7 + $0x58] sm:$0xff] %vm293_vm0, %v2298_v0 }
  0x3c   : > { %306 = vst.msk [vmem:[%s2426_s7 + $0x60] sm:$0xff] %vm293_vm0, %v2298_v0 }
  0x3d   : > { %307 = vst.msk [vmem:[%s2426_s7 + $0x68] sm:$0xff] %vm293_vm0, %v2298_v0 }
  0x3e   : > { %308 = vst.msk [vmem:[%s2426_s7 + $0x70] sm:$0xff] %vm293_vm0, %v2298_v0 }
  0x3f   : > { %309 = vst.msk [vmem:[%s2426_s7 + $0x78] sm:$0xff] %vm293_vm0, %v2298_v0 }
  0x40   : > { %310 = vst.msk [vmem:[%s2426_s7 + $0x80] sm:$0xff] %vm293_vm0, %v2298_v0 }
  0x41   : > { %311 = vst.msk [vmem:[%s2426_s7 + $0x88] sm:$0xff] %vm293_vm0, %v2298_v0 }
  0x42   : > { %312 = vst.msk [vmem:[%s2426_s7 + $0x90] sm:$0xff] %vm293_vm0, %v2298_v0 }
  0x43   : > { %313 = vst.msk [vmem:[%s2426_s7 + $0x98] sm:$0xff] %vm293_vm0, %v2298_v0 }
  0x44   : > { %314 = vst.msk [vmem:[%s2426_s7 + $0xa0] sm:$0xff] %vm293_vm0, %v2298_v0 }
  0x45   : > { %315 = vst.msk [vmem:[%s2426_s7 + $0xa8] sm:$0xff] %vm293_vm0, %v2298_v0 }
  0x46   : > { %316 = vst.msk [vmem:[%s2426_s7 + $0xb0] sm:$0xff] %vm293_vm0, %v2298_v0 }
  0x47   : > { %317 = vst.msk [vmem:[%s2426_s7 + $0xb8] sm:$0xff] %vm293_vm0, %v2298_v0 }
  0x48   : > { %318 = vst.msk [vmem:[%s2426_s7 + $0xc0] sm:$0xff] %vm293_vm0, %v2298_v0 }
  0x49   : > { %319 = vst.msk [vmem:[%s2426_s7 + $0xc8] sm:$0xff] %vm293_vm0, %v2298_v0 }
  0x4a   : > { %320 = vst.msk [vmem:[%s2426_s7 + $0xd0] sm:$0xff] %vm293_vm0, %v2298_v0 }
  0x4b   : > { %321 = vst.msk [vmem:[%s2426_s7 + $0xd8] sm:$0xff] %vm293_vm0, %v2298_v0 }
  0x4c   : > { %322 = vst.msk [vmem:[%s2426_s7 + $0xe0] sm:$0xff] %vm293_vm0, %v2298_v0 }
  0x4d   : > { %323 = vst.msk [vmem:[%s2426_s7 + $0xe8] sm:$0xff] %vm293_vm0, %v2298_v0 }
  0x4e   : > { %324 = vst.msk [vmem:[%s2426_s7 + $0xf0] sm:$0xff] %vm293_vm0, %v2298_v0 }
  0x4f   : > { %325 = vst.msk [vmem:[%s2426_s7 + $0xf8] sm:$0xff] %vm293_vm0, %v2298_v0 }
  0x50 PF: > { %v404_v1 = vld [vmem:[%s2421_s16 + $0x70] sm:$0xff]  ;;  %v405_v2 = vld [vmem:[%s2421_s16 + $0x78] sm:$0xff]  ;;  %v402_v6 = vld [vmem:[%s2421_s16 + $0x60] sm:$0xff]  ;;  %vm808_vm1 = vcmask 261120   ;;  %p1998_p3 = scmp.ne.s32.totalorder %s2277_s21, 1 }
  0x51   : > { %v420_v3 = vld [vmem:[%s2421_s16 + $0xf0] sm:$0xff]  ;;  %v429_v4 = vpack.c.bf16 %v405_v2, %v404_v1  ;;  %v421_v5 = vld [vmem:[%s2421_s16 + $0xf8] sm:$0xff]  ;;  %v403_v7 = vld [vmem:[%s2421_s16 + $0x68] sm:$0xff] }
  0x52   : > { %v437_v8 = vpack.c.bf16 %v421_v5, %v420_v3  ;;  %v418_v9 = vld [vmem:[%s2421_s16 + $0xe0] sm:$0xff]  ;;  %v419_v10 = vld [vmem:[%s2421_s16 + $0xe8] sm:$0xff]  ;;  %v428_v11 = vpack.c.bf16 %v403_v7, %v402_v6  ;;  %v400_v13 = vld [vmem:[%s2421_s16 + $0x50] sm:$0xff] }
  0x53   : > { %598 = vmatpush.bf16.msra.mxu0 %v429_v4  ;;  %2034 = vmatpush.bf16.msra.mxu2 %v429_v4  ;;  %v436_v12 = vpack.c.bf16 %v419_v10, %v418_v9  ;;  %v401_v14 = vld [vmem:[%s2421_s16 + $0x58] sm:$0xff]  ;;  %v416_v15 = vld [vmem:[%s2421_s16 + $0xd0] sm:$0xff]  ;;  %v398_v19 = vld [vmem:[%s2421_s16 + $0x40] sm:$0xff] }
  0x54   : > { %687 = vmatpush.bf16.msra.mxu1 %v437_v8  ;;  %2042 = vmatpush.bf16.msra.mxu3 %v437_v8  ;;  %v417_v16 = vld [vmem:[%s2421_s16 + $0xd8] sm:$0xff]  ;;  %v427_v17 = vpack.c.bf16 %v401_v14, %v400_v13  ;;  %v399_v20 = vld [vmem:[%s2421_s16 + $0x48] sm:$0xff]  ;;  %v414_v21 = vld [vmem:[%s2421_s16 + $0xc0] sm:$0xff] }
  0x55   : > { %v435_v18 = vpack.c.bf16 %v417_v16, %v416_v15  ;;  %v415_v22 = vld [vmem:[%s2421_s16 + $0xc8] sm:$0xff]  ;;  %v426_v23 = vpack.c.bf16 %v399_v20, %v398_v19  ;;  %v396_v25 = vld [vmem:[%s2421_s16 + $0x30] sm:$0xff]  ;;  %v397_v26 = vld [vmem:[%s2421_s16 + $0x38] sm:$0xff] }
  0x56   : > { %v434_v24 = vpack.c.bf16 %v415_v22, %v414_v21  ;;  %v412_v27 = vld [vmem:[%s2421_s16 + $0xb0] sm:$0xff]  ;;  %v413_v28 = vld [vmem:[%s2421_s16 + $0xb8] sm:$0xff]  ;;  %v425_v29 = vpack.c.bf16 %v397_v26, %v396_v25  ;;  %v394_v31 = vld [vmem:[%s2421_s16 + $0x20] sm:$0xff] }
  0x57   : > { %599 = vmatpush.bf16.msra.mxu0 %v428_v11  ;;  %2035 = vmatpush.bf16.msra.mxu2 %v428_v11  ;;  %v433_v30 = vpack.c.bf16 %v413_v28, %v412_v27  ;;  %v395_v32 = vld [vmem:[%s2421_s16 + $0x28] sm:$0xff]  ;;  %v410_v33 = vld [vmem:[%s2421_s16 + $0xa0] sm:$0xff]  ;;  %v392_v37 = vld [vmem:[%s2421_s16 + $0x10] sm:$0xff] }
  0x58   : > { %688 = vmatpush.bf16.msra.mxu1 %v436_v12  ;;  %2043 = vmatpush.bf16.msra.mxu3 %v436_v12  ;;  %v411_v34 = vld [vmem:[%s2421_s16 + $0xa8] sm:$0xff]  ;;  %v424_v35 = vpack.c.bf16 %v395_v32, %v394_v31  ;;  %v393_v38 = vld [vmem:[%s2421_s16 + $0x18] sm:$0xff]  ;;  %v408_v39 = vld [vmem:[%s2421_s16 + $0x90] sm:$0xff] }
  0x59   : > { %v432_v36 = vpack.c.bf16 %v411_v34, %v410_v33  ;;  %v409_v40 = vld [vmem:[%s2421_s16 + $0x98] sm:$0xff]  ;;  %v423_v41 = vpack.c.bf16 %v393_v38, %v392_v37  ;;  %v390_v43 = vld [vmem:[%s2421_s16] sm:$0xff]  ;;  %v391_v44 = vld [vmem:[%s2421_s16 + $0x8] sm:$0xff] }
  0x5a   : > { %v431_v42 = vpack.c.bf16 %v409_v40, %v408_v39  ;;  %v406_v45 = vld [vmem:[%s2421_s16 + $0x80] sm:$0xff]  ;;  %v407_v46 = vld [vmem:[%s2421_s16 + $0x88] sm:$0xff]  ;;  %v422_v49 = vpack.c.bf16 %v391_v44, %v390_v43  ;;  %v1880_v61 = vld [vmem:[%s2410_s14 + $0x10] sm:$0xf] }
  0x5b   : > { %600 = vmatpush.bf16.msra.mxu0 %v427_v17  ;;  %2036 = vmatpush.bf16.msra.mxu2 %v427_v17  ;;  %v1872_v47 = vld [vmem:[%s2410_s14] sm:$0xf]  ;;  %v2003_v48 = vld [vmem:[%s2410_s14 + $0x4] sm:$0xf0]  ;;  %v2002_v52 = vld [vmem:[%s2410_s14 + $0x4] sm:$0xf]  ;;  %v430_v53 = vpack.c.bf16 %v407_v46, %v406_v45 }
  0x5c   : > { %689 = vmatpush.bf16.msra.mxu1 %v435_v18  ;;  %2044 = vmatpush.bf16.msra.mxu3 %v435_v18  ;;  %v1936_v50 = vld [vmem:[%s2410_s14 + $0x80] sm:$0xf]  ;;  %v2019_v51 = vld [vmem:[%s2410_s14 + $0x84] sm:$0xf0]  ;;  %v1874_v54 = vld [vmem:[%s2410_s14 + $0x8] sm:$0xf0]  ;;  %v1873_v57 = vor.u32 %v2003_v48, %v1872_v47 }
  0x5d   : > { %v2018_v55 = vld [vmem:[%s2410_s14 + $0x84] sm:$0xf]  ;;  %v1938_v56 = vld [vmem:[%s2410_s14 + $0x88] sm:$0xf0]  ;;  %v1937_v58 = vor.u32 %v2019_v51, %v1936_v50  ;;  %v1877_v59 = vor.u32 %v2002_v52, %v1874_v54  ;;  %v2005_v62 = vld [vmem:[%s2410_s14 + $0x14] sm:$0xf0] }
  0x5e   : > { %v1941_v60 = vor.u32 %v2018_v55, %v1938_v56  ;;  %v1944_v63 = vld [vmem:[%s2410_s14 + $0x90] sm:$0xf]  ;;  %v2021_v0 = vld [vmem:[%s2410_s14 + $0x94] sm:$0xf0]  ;;  %v2004_v1 = vld [vmem:[%s2410_s14 + $0x14] sm:$0xf]  ;;  %v1881_v5 = vor.u32 %v2005_v62, %v1880_v61 }
  0x5f   : > { %601 = vmatpush.bf16.msra.mxu0 %v426_v23  ;;  %2037 = vmatpush.bf16.msra.mxu2 %v426_v23  ;;  %v1882_v2 = vld [vmem:[%s2410_s14 + $0x18] sm:$0xf0]  ;;  %v2020_v3 = vld [vmem:[%s2410_s14 + $0x94] sm:$0xf]  ;;  %v1945_v6 = vor.u32 %v2021_v0, %v1944_v63  ;;  %v1888_v9 = vld [vmem:[%s2410_s14 + $0x20] sm:$0xf] }
  0x60   : > { %690 = vmatpush.bf16.msra.mxu1 %v434_v24  ;;  %2045 = vmatpush.bf16.msra.mxu3 %v434_v24  ;;  %v1946_v4 = vld [vmem:[%s2410_s14 + $0x98] sm:$0xf0]  ;;  %v1885_v7 = vor.u32 %v2004_v1, %v1882_v2  ;;  %v2007_v10 = vld [vmem:[%s2410_s14 + $0x24] sm:$0xf0]  ;;  %v1952_v11 = vld [vmem:[%s2410_s14 + $0xa0] sm:$0xf] }
  0x61   : > { %v1949_v8 = vor.u32 %v2020_v3, %v1946_v4  ;;  %v2023_v12 = vld [vmem:[%s2410_s14 + $0xa4] sm:$0xf0]  ;;  %v2006_v13 = vld [vmem:[%s2410_s14 + $0x24] sm:$0xf]  ;;  %v1890_v14 = vld [vmem:[%s2410_s14 + $0x28] sm:$0xf0]  ;;  %v1889_v17 = vor.u32 %v2007_v10, %v1888_v9 }
  0x62   : > { %v2022_v15 = vld [vmem:[%s2410_s14 + $0xa4] sm:$0xf]  ;;  %v1954_v16 = vld [vmem:[%s2410_s14 + $0xa8] sm:$0xf0]  ;;  %v1953_v18 = vor.u32 %v2023_v12, %v1952_v11  ;;  %v1893_v19 = vor.u32 %v2006_v13, %v1890_v14  ;;  %v1896_v21 = vld [vmem:[%s2410_s14 + $0x30] sm:$0xf] }
  0x63   : > { %602 = vmatpush.bf16.msra.mxu0 %v425_v29  ;;  %2038 = vmatpush.bf16.msra.mxu2 %v425_v29  ;;  %v1957_v20 = vor.u32 %v2022_v15, %v1954_v16  ;;  %v2009_v22 = vld [vmem:[%s2410_s14 + $0x34] sm:$0xf0]  ;;  %v1960_v23 = vld [vmem:[%s2410_s14 + $0xb0] sm:$0xf]  ;;  %v2008_v25 = vld [vmem:[%s2410_s14 + $0x34] sm:$0xf] }
  0x64   : > { %691 = vmatpush.bf16.msra.mxu1 %v433_v30  ;;  %2046 = vmatpush.bf16.msra.mxu3 %v433_v30  ;;  %v2025_v24 = vld [vmem:[%s2410_s14 + $0xb4] sm:$0xf0]  ;;  %v1898_v26 = vld [vmem:[%s2410_s14 + $0x38] sm:$0xf0]  ;;  %v2024_v27 = vld [vmem:[%s2410_s14 + $0xb4] sm:$0xf]  ;;  %v1897_v29 = vor.u32 %v2009_v22, %v1896_v21 }
  0x65   : > { %v1962_v28 = vld [vmem:[%s2410_s14 + $0xb8] sm:$0xf0]  ;;  %v1961_v30 = vor.u32 %v2025_v24, %v1960_v23  ;;  %v1901_v31 = vor.u32 %v2008_v25, %v1898_v26  ;;  %v1904_v33 = vld [vmem:[%s2410_s14 + $0x40] sm:$0xf]  ;;  %v2011_v34 = vld [vmem:[%s2410_s14 + $0x44] sm:$0xf0] }
  0x66   : > { %v1965_v32 = vor.u32 %v2024_v27, %v1962_v28  ;;  %v2010_v37 = vld [vmem:[%s2410_s14 + $0x44] sm:$0xf]  ;;  %v1906_v38 = vld [vmem:[%s2410_s14 + $0x48] sm:$0xf0]  ;;  %v1912_v45 = vld [vmem:[%s2410_s14 + $0x50] sm:$0xf] }
  0x67   : > { %603 = vmatpush.bf16.msra.mxu0 %v424_v35  ;;  %2039 = vmatpush.bf16.msra.mxu2 %v424_v35  ;;  %v1968_v35 = vld [vmem:[%s2410_s14 + $0xc0] sm:$0xf]  ;;  %v2026_v39 = vld [vmem:[%s2410_s14 + $0xc4] sm:$0xf]  ;;  %v1970_v40 = vld [vmem:[%s2410_s14 + $0xc8] sm:$0xf0]  ;;  %v1909_v43 = vor.u32 %v2010_v37, %v1906_v38 }
  0x68   : > { %692 = vmatpush.bf16.msra.mxu1 %v432_v36  ;;  %2047 = vmatpush.bf16.msra.mxu3 %v432_v36  ;;  %v2027_v36 = vld [vmem:[%s2410_s14 + $0xc4] sm:$0xf0]  ;;  %v1973_v44 = vor.u32 %v2026_v39, %v1970_v40  ;;  %v2013_v46 = vld [vmem:[%s2410_s14 + $0x54] sm:$0xf0]  ;;  %v1976_v47 = vld [vmem:[%s2410_s14 + $0xd0] sm:$0xf] }
  0x69   : > { %v2029_v48 = vld [vmem:[%s2410_s14 + $0xd4] sm:$0xf0]  ;;  %v1914_v50 = vld [vmem:[%s2410_s14 + $0x58] sm:$0xf0]  ;;  %v2028_v51 = vld [vmem:[%s2410_s14 + $0xd4] sm:$0xf] }
  0x6a   : > { %v1978_v52 = vld [vmem:[%s2410_s14 + $0xd8] sm:$0xf0]  ;;  %v1977_v54 = vor.u32 %v2029_v48, %v1976_v47  ;;  %v2014_v61 = vld [vmem:[%s2410_s14 + $0x64] sm:$0xf]  ;;  %v1922_v62 = vld [vmem:[%s2410_s14 + $0x68] sm:$0xf0] }
  0x6b   : > { %604 = vmatpush.bf16.msra.mxu0 %v423_v41  ;;  %2040 = vmatpush.bf16.msra.mxu2 %v423_v41  ;;  %v1905_v41 = vor.u32 %v2011_v34, %v1904_v33  ;;  %v1981_v56 = vor.u32 %v2028_v51, %v1978_v52  ;;  %v2030_v63 = vld [vmem:[%s2410_s14 + $0xe4] sm:$0xf]  ;;  %v1986_v0 = vld [vmem:[%s2410_s14 + $0xe8] sm:$0xf0]  ;;  %v1925_v3 = vor.u32 %v2014_v61, %v1922_v62  ;;  %v2016_v9 = vld [vmem:[%s2410_s14 + $0x74] sm:$0xf] }
  0x6c   : > { %693 = vmatpush.bf16.msra.mxu1 %v431_v42  ;;  %2048 = vmatpush.bf16.msra.mxu3 %v431_v42  ;;  %v1969_v42 = vor.u32 %v2027_v36, %v1968_v35  ;;  %v1989_v4 = vor.u32 %v2030_v63, %v1986_v0  ;;  %v1930_v10 = vld [vmem:[%s2410_s14 + $0x78] sm:$0xf0]  ;;  %v2032_v11 = vld [vmem:[%s2410_s14 + $0xf4] sm:$0xf]  ;;  %v342_v23 = vld [vmem:[%s2426_s7 + $0x80] sm:$0xff] }
  0x6d   : > { %v1994_v12 = vld [vmem:[%s2410_s14 + $0xf8] sm:$0xf0]  ;;  %v1933_v15 = vor.u32 %v2016_v9, %v1930_v10  ;;  %v327_v27 = vld [vmem:[%s2426_s7 + $0x8] sm:$0xff]  ;;  %v328_v37 = vld [vmem:[%s2426_s7 + $0x10] sm:$0xff] }
  0x6e   : > { %v1997_v16 = vor.u32 %v2032_v11, %v1994_v12  ;;  %v343_v33 = vld [vmem:[%s2426_s7 + $0x88] sm:$0xff]  ;;  %v329_v47 = vld [vmem:[%s2426_s7 + $0x18] sm:$0xff]  ;;  %v346_v63 = vld [vmem:[%s2426_s7 + $0xa0] sm:$0xff] }
  0x6f   : > { %605 = vmatpush.bf16.msra.mxu0 %v422_v49  ;;  %2041 = vmatpush.bf16.msra.mxu2 %v422_v49  ;;  %v2012_v49 = vld [vmem:[%s2410_s14 + $0x54] sm:$0xf]  ;;  %v347_v9 = vld [vmem:[%s2426_s7 + $0xa8] sm:$0xff] }
  0x70   : > { %694 = vmatpush.bf16.msra.mxu1 %v430_v53  ;;  %2049 = vmatpush.bf16.msra.mxu3 %v430_v53  ;;  %v1913_v53 = vor.u32 %v2013_v46, %v1912_v45  ;;  %v1917_v55 = vor.u32 %v2012_v49, %v1914_v50 }
  0x72   : > { %606 = vmatmul.bf16.vlgmr.msra.gmra.mxu0 %v1873_v57  ;;  %646 = vmatmul.bf16.vlgmr.msra.gmra.mxu2 %v1937_v58  ;;  %v1920_v57 = vld [vmem:[%s2410_s14 + $0x60] sm:$0xf]  ;;  %v2015_v58 = vld [vmem:[%s2410_s14 + $0x64] sm:$0xf0] }
  0x73   : > { %695 = vmatmul.bf16.vlgmr.msra.gmra.mxu1 %v1877_v59  ;;  %735 = vmatmul.bf16.vlgmr.msra.gmra.mxu3 %v1941_v60  ;;  %v1984_v59 = vld [vmem:[%s2410_s14 + $0xe0] sm:$0xf]  ;;  %v2031_v60 = vld [vmem:[%s2410_s14 + $0xe4] sm:$0xf0]  ;;  %v1921_v1 = vor.u32 %v2015_v58, %v1920_v57 }
  0x74   : > { %v1985_v2 = vor.u32 %v2031_v60, %v1984_v59  ;;  %v330_v57 = vld [vmem:[%s2426_s7 + $0x20] sm:$0xff] }
  0x82   : > { %611 = vmatmul.bf16.gmra.mxu0 %v1881_v5  ;;  %651 = vmatmul.bf16.gmra.mxu2 %v1945_v6  ;;  %v1928_v5 = vld [vmem:[%s2410_s14 + $0x70] sm:$0xf]  ;;  %v2017_v6 = vld [vmem:[%s2410_s14 + $0x74] sm:$0xf0] }
  0x83   : > { %700 = vmatmul.bf16.gmra.mxu1 %v1885_v7  ;;  %740 = vmatmul.bf16.gmra.mxu3 %v1949_v8  ;;  %v1992_v7 = vld [vmem:[%s2410_s14 + $0xf0] sm:$0xf]  ;;  %v2033_v8 = vld [vmem:[%s2410_s14 + $0xf4] sm:$0xf0]  ;;  %v1929_v13 = vor.u32 %v2017_v6, %v1928_v5 }
  0x84   : > { %v1993_v14 = vor.u32 %v2033_v8, %v1992_v7 }
  0x92   : > { %616 = vmatmul.bf16.gmra.mxu0 %v1889_v17  ;;  %656 = vmatmul.bf16.gmra.mxu2 %v1953_v18  ;;  %v326_v18 = vld [vmem:[%s2426_s7] sm:$0xff] }
  0x93   : > { %705 = vmatmul.bf16.gmra.mxu1 %v1893_v19  ;;  %745 = vmatmul.bf16.gmra.mxu3 %v1957_v20 }
  0xa2   : > { %621 = vmatmul.bf16.gmra.mxu0 %v1897_v29  ;;  %661 = vmatmul.bf16.gmra.mxu2 %v1961_v30 }
  0xa3   : > { %710 = vmatmul.bf16.gmra.mxu1 %v1901_v31  ;;  %750 = vmatmul.bf16.gmra.mxu3 %v1965_v32 }
  0xb2   : > { %626 = vmatmul.bf16.gmra.mxu0 %v1905_v41  ;;  %666 = vmatmul.bf16.gmra.mxu2 %v1969_v42 }
  0xb3   : > { %715 = vmatmul.bf16.gmra.mxu1 %v1909_v43  ;;  %755 = vmatmul.bf16.gmra.mxu3 %v1973_v44  ;;  %v344_v43 = vld [vmem:[%s2426_s7 + $0x90] sm:$0xff] }
  0xc2   : > { %631 = vmatmul.bf16.gmra.mxu0 %v1913_v53  ;;  %671 = vmatmul.bf16.gmra.mxu2 %v1977_v54  ;;  %v345_v53 = vld [vmem:[%s2426_s7 + $0x98] sm:$0xff] }
  0xc3   : > { %720 = vmatmul.bf16.gmra.mxu1 %v1917_v55  ;;  %760 = vmatmul.bf16.gmra.mxu3 %v1981_v56 }
  0xd2   : > { %636 = vmatmul.bf16.gmra.mxu0 %v1921_v1  ;;  %676 = vmatmul.bf16.gmra.mxu2 %v1985_v2 }
  0xd3   : > { %725 = vmatmul.bf16.gmra.mxu1 %v1925_v3  ;;  %765 = vmatmul.bf16.gmra.mxu3 %v1989_v4  ;;  %v331_v3 = vld [vmem:[%s2426_s7 + $0x28] sm:$0xff] }
  0xe2   : > { %641 = vmatmul.bf16.gmra.mxu0 %v1929_v13  ;;  %681 = vmatmul.bf16.gmra.mxu2 %v1993_v14  ;;  %v332_v13 = vld [vmem:[%s2426_s7 + $0x30] sm:$0xff] }
  0xe3   : > { %730 = vmatmul.bf16.gmra.mxu1 %v1933_v15  ;;  %770 = vmatmul.bf16.gmra.mxu3 %v1997_v16 }
  0xef   : > { %v607_v17 = vpop.f32.mrf.mxu0 }
  0xf0   : > { %v696_v19 = vpop.f32.mrf.mxu1 }
  0xf1   : > { %v697_v20 = vadd.f32 %v696_v19, %v607_v17  ;;  %v348_v19 = vld [vmem:[%s2426_s7 + $0xb0] sm:$0xff] }
  0xf3   : > { %v776_v21 = vadd.f32 %v697_v20, %v326_v18 }
  0xf5   : > { %809 = vst.msk [vmem:[%s2426_s7] sm:$0xff] %vm808_vm1, %v776_v21  ;;  %v647_v22 = vpop.f32.mrf.mxu2 }
  0xf6   : > { %v736_v24 = vpop.f32.mrf.mxu3 }
  0xf7   : > { %v737_v25 = vadd.f32 %v736_v24, %v647_v22  ;;  %v609_v26 = vpop.f32.mrf.mxu0 }
  0xf8   : > { %v698_v28 = vpop.f32.mrf.mxu1 }
  0xf9   : > { %v792_v29 = vadd.f32 %v737_v25, %v342_v23  ;;  %v699_v30 = vadd.f32 %v698_v28, %v609_v26  ;;  %v333_v23 = vld [vmem:[%s2426_s7 + $0x38] sm:$0xff] }
  0xfb   : > { %825 = vst.msk [vmem:[%s2426_s7 + $0x80] sm:$0xff] %vm808_vm1, %v792_v29  ;;  %v777_v31 = vadd.f32 %v699_v30, %v327_v27  ;;  %v349_v29 = vld [vmem:[%s2426_s7 + $0xb8] sm:$0xff] }
  0xfd   : > { %810 = vst.msk [vmem:[%s2426_s7 + $0x8] sm:$0xff] %vm808_vm1, %v777_v31  ;;  %v649_v32 = vpop.f32.mrf.mxu2 }
  0xfe   : > { %v738_v34 = vpop.f32.mrf.mxu3 }
  0xff   : > { %v739_v35 = vadd.f32 %v738_v34, %v649_v32  ;;  %v612_v36 = vpop.f32.mrf.mxu0 }
 0x100   : > { %v701_v38 = vpop.f32.mrf.mxu1 }
 0x101   : > { %v793_v39 = vadd.f32 %v739_v35, %v343_v33  ;;  %v702_v40 = vadd.f32 %v701_v38, %v612_v36  ;;  %v334_v33 = vld [vmem:[%s2426_s7 + $0x40] sm:$0xff] }
 0x103   : > { %826 = vst.msk [vmem:[%s2426_s7 + $0x88] sm:$0xff] %vm808_vm1, %v793_v39  ;;  %v778_v41 = vadd.f32 %v702_v40, %v328_v37  ;;  %v350_v39 = vld [vmem:[%s2426_s7 + $0xc0] sm:$0xff] }
 0x105   : > { %811 = vst.msk [vmem:[%s2426_s7 + $0x10] sm:$0xff] %vm808_vm1, %v778_v41  ;;  %v652_v42 = vpop.f32.mrf.mxu2 }
 0x106   : > { %v741_v44 = vpop.f32.mrf.mxu3 }
 0x107   : > { %v742_v45 = vadd.f32 %v741_v44, %v652_v42  ;;  %v614_v46 = vpop.f32.mrf.mxu0 }
 0x108   : > { %v703_v48 = vpop.f32.mrf.mxu1 }
 0x109   : > { %v794_v49 = vadd.f32 %v742_v45, %v344_v43  ;;  %v704_v50 = vadd.f32 %v703_v48, %v614_v46  ;;  %v335_v43 = vld [vmem:[%s2426_s7 + $0x48] sm:$0xff] }
 0x10b   : > { %827 = vst.msk [vmem:[%s2426_s7 + $0x90] sm:$0xff] %vm808_vm1, %v794_v49  ;;  %v779_v51 = vadd.f32 %v704_v50, %v329_v47  ;;  %v351_v49 = vld [vmem:[%s2426_s7 + $0xc8] sm:$0xff] }
 0x10d   : > { %812 = vst.msk [vmem:[%s2426_s7 + $0x18] sm:$0xff] %vm808_vm1, %v779_v51  ;;  %v654_v52 = vpop.f32.mrf.mxu2 }
 0x10e   : > { %v743_v54 = vpop.f32.mrf.mxu3 }
 0x10f   : > { %v744_v55 = vadd.f32 %v743_v54, %v654_v52  ;;  %v617_v56 = vpop.f32.mrf.mxu0 }
 0x110   : > { %v706_v58 = vpop.f32.mrf.mxu1 }
 0x111   : > { %v795_v59 = vadd.f32 %v744_v55, %v345_v53  ;;  %v707_v60 = vadd.f32 %v706_v58, %v617_v56  ;;  %v336_v53 = vld [vmem:[%s2426_s7 + $0x50] sm:$0xff] }
 0x113   : > { %828 = vst.msk [vmem:[%s2426_s7 + $0x98] sm:$0xff] %vm808_vm1, %v795_v59  ;;  %v780_v61 = vadd.f32 %v707_v60, %v330_v57  ;;  %v352_v59 = vld [vmem:[%s2426_s7 + $0xd0] sm:$0xff] }
 0x115   : > { %813 = vst.msk [vmem:[%s2426_s7 + $0x20] sm:$0xff] %vm808_vm1, %v780_v61  ;;  %v657_v62 = vpop.f32.mrf.mxu2 }
 0x116   : > { %v746_v0 = vpop.f32.mrf.mxu3 }
 0x117   : > { %v747_v1 = vadd.f32 %v746_v0, %v657_v62  ;;  %v619_v2 = vpop.f32.mrf.mxu0 }
 0x118   : > { %v708_v4 = vpop.f32.mrf.mxu1 }
 0x119   : > { %v796_v5 = vadd.f32 %v747_v1, %v346_v63  ;;  %v709_v6 = vadd.f32 %v708_v4, %v619_v2  ;;  %v337_v63 = vld [vmem:[%s2426_s7 + $0x58] sm:$0xff] }
 0x11b   : > { %829 = vst.msk [vmem:[%s2426_s7 + $0xa0] sm:$0xff] %vm808_vm1, %v796_v5  ;;  %v781_v7 = vadd.f32 %v709_v6, %v331_v3  ;;  %v353_v5 = vld [vmem:[%s2426_s7 + $0xd8] sm:$0xff] }
 0x11d   : > { %814 = vst.msk [vmem:[%s2426_s7 + $0x28] sm:$0xff] %vm808_vm1, %v781_v7  ;;  %v659_v8 = vpop.f32.mrf.mxu2 }
 0x11e   : > { %v748_v10 = vpop.f32.mrf.mxu3 }
 0x11f   : > { %v749_v11 = vadd.f32 %v748_v10, %v659_v8  ;;  %v622_v12 = vpop.f32.mrf.mxu0 }
 0x120   : > { %v711_v14 = vpop.f32.mrf.mxu1 }
 0x121   : > { %v797_v15 = vadd.f32 %v749_v11, %v347_v9  ;;  %v712_v16 = vadd.f32 %v711_v14, %v622_v12  ;;  %v338_v9 = vld [vmem:[%s2426_s7 + $0x60] sm:$0xff] }
 0x123   : > { %830 = vst.msk [vmem:[%s2426_s7 + $0xa8] sm:$0xff] %vm808_vm1, %v797_v15  ;;  %v782_v17 = vadd.f32 %v712_v16, %v332_v13  ;;  %v354_v15 = vld [vmem:[%s2426_s7 + $0xe0] sm:$0xff] }
 0x125   : > { %815 = vst.msk [vmem:[%s2426_s7 + $0x30] sm:$0xff] %vm808_vm1, %v782_v17  ;;  %v662_v18 = vpop.f32.mrf.mxu2 }
 0x126   : > { %v751_v20 = vpop.f32.mrf.mxu3 }
 0x127   : > { %v752_v21 = vadd.f32 %v751_v20, %v662_v18  ;;  %v624_v22 = vpop.f32.mrf.mxu0 }
 0x128   : > { %v713_v24 = vpop.f32.mrf.mxu1 }
 0x129   : > { %v798_v25 = vadd.f32 %v752_v21, %v348_v19  ;;  %v714_v26 = vadd.f32 %v713_v24, %v624_v22  ;;  %v339_v19 = vld [vmem:[%s2426_s7 + $0x68] sm:$0xff] }
 0x12b   : > { %831 = vst.msk [vmem:[%s2426_s7 + $0xb0] sm:$0xff] %vm808_vm1, %v798_v25  ;;  %v783_v27 = vadd.f32 %v714_v26, %v333_v23  ;;  %v355_v25 = vld [vmem:[%s2426_s7 + $0xe8] sm:$0xff] }
 0x12d   : > { %816 = vst.msk [vmem:[%s2426_s7 + $0x38] sm:$0xff] %vm808_vm1, %v783_v27  ;;  %v664_v28 = vpop.f32.mrf.mxu2 }
 0x12e   : > { %v753_v30 = vpop.f32.mrf.mxu3 }
 0x12f   : > { %v754_v31 = vadd.f32 %v753_v30, %v664_v28  ;;  %v627_v32 = vpop.f32.mrf.mxu0 }
 0x130   : > { %v716_v34 = vpop.f32.mrf.mxu1 }
 0x131   : > { %v799_v35 = vadd.f32 %v754_v31, %v349_v29  ;;  %v717_v36 = vadd.f32 %v716_v34, %v627_v32  ;;  %v340_v29 = vld [vmem:[%s2426_s7 + $0x70] sm:$0xff] }
 0x133   : > { %832 = vst.msk [vmem:[%s2426_s7 + $0xb8] sm:$0xff] %vm808_vm1, %v799_v35  ;;  %v784_v37 = vadd.f32 %v717_v36, %v334_v33  ;;  %v356_v35 = vld [vmem:[%s2426_s7 + $0xf0] sm:$0xff] }
 0x135   : > { %817 = vst.msk [vmem:[%s2426_s7 + $0x40] sm:$0xff] %vm808_vm1, %v784_v37  ;;  %v667_v38 = vpop.f32.mrf.mxu2 }
 0x136   : > { %v756_v40 = vpop.f32.mrf.mxu3 }
 0x137   : > { %v757_v41 = vadd.f32 %v756_v40, %v667_v38  ;;  %v629_v42 = vpop.f32.mrf.mxu0 }
 0x138   : > { %v718_v44 = vpop.f32.mrf.mxu1 }
 0x139   : > { %v800_v45 = vadd.f32 %v757_v41, %v350_v39  ;;  %v719_v46 = vadd.f32 %v718_v44, %v629_v42  ;;  %v341_v39 = vld [vmem:[%s2426_s7 + $0x78] sm:$0xff] }
 0x13b   : > { %833 = vst.msk [vmem:[%s2426_s7 + $0xc0] sm:$0xff] %vm808_vm1, %v800_v45  ;;  %v785_v47 = vadd.f32 %v719_v46, %v335_v43  ;;  %v357_v45 = vld [vmem:[%s2426_s7 + $0xf8] sm:$0xff] }
 0x13d   : > { %818 = vst.msk [vmem:[%s2426_s7 + $0x48] sm:$0xff] %vm808_vm1, %v785_v47  ;;  %v669_v48 = vpop.f32.mrf.mxu2 }
 0x13e   : > { %v758_v50 = vpop.f32.mrf.mxu3 }
 0x13f   : > { %v759_v51 = vadd.f32 %v758_v50, %v669_v48  ;;  %v632_v52 = vpop.f32.mrf.mxu0 }
 0x140   : > { %v721_v54 = vpop.f32.mrf.mxu1 }
 0x141   : > { %v801_v55 = vadd.f32 %v759_v51, %v351_v49  ;;  %v722_v56 = vadd.f32 %v721_v54, %v632_v52 }
 0x143   : > { %834 = vst.msk [vmem:[%s2426_s7 + $0xc8] sm:$0xff] %vm808_vm1, %v801_v55  ;;  %v786_v57 = vadd.f32 %v722_v56, %v336_v53 }
 0x145   : > { %819 = vst.msk [vmem:[%s2426_s7 + $0x50] sm:$0xff] %vm808_vm1, %v786_v57  ;;  %v672_v58 = vpop.f32.mrf.mxu2 }
 0x146   : > { %v761_v60 = vpop.f32.mrf.mxu3 }
 0x147   : > { %v762_v61 = vadd.f32 %v761_v60, %v672_v58  ;;  %v634_v62 = vpop.f32.mrf.mxu0 }
 0x148   : > { %v723_v0 = vpop.f32.mrf.mxu1 }
 0x149   : > { %v802_v1 = vadd.f32 %v762_v61, %v352_v59  ;;  %v724_v2 = vadd.f32 %v723_v0, %v634_v62 }
 0x14b   : > { %835 = vst.msk [vmem:[%s2426_s7 + $0xd0] sm:$0xff] %vm808_vm1, %v802_v1  ;;  %v787_v3 = vadd.f32 %v724_v2, %v337_v63 }
 0x14d   : > { %820 = vst.msk [vmem:[%s2426_s7 + $0x58] sm:$0xff] %vm808_vm1, %v787_v3  ;;  %v674_v4 = vpop.f32.mrf.mxu2 }
 0x14e   : > { %v763_v6 = vpop.f32.mrf.mxu3 }
 0x14f   : > { %v764_v7 = vadd.f32 %v763_v6, %v674_v4  ;;  %v637_v8 = vpop.f32.mrf.mxu0 }
 0x150   : > { %v726_v10 = vpop.f32.mrf.mxu1 }
 0x151   : > { %v803_v11 = vadd.f32 %v764_v7, %v353_v5  ;;  %v727_v12 = vadd.f32 %v726_v10, %v637_v8 }
 0x153   : > { %836 = vst.msk [vmem:[%s2426_s7 + $0xd8] sm:$0xff] %vm808_vm1, %v803_v11  ;;  %v788_v13 = vadd.f32 %v727_v12, %v338_v9 }
 0x155   : > { %821 = vst.msk [vmem:[%s2426_s7 + $0x60] sm:$0xff] %vm808_vm1, %v788_v13  ;;  %v677_v14 = vpop.f32.mrf.mxu2 }
 0x156   : > { %v766_v16 = vpop.f32.mrf.mxu3 }
 0x157   : > { %v767_v17 = vadd.f32 %v766_v16, %v677_v14  ;;  %v639_v18 = vpop.f32.mrf.mxu0 }
 0x158   : > { %v728_v20 = vpop.f32.mrf.mxu1 }
 0x159   : > { %v804_v21 = vadd.f32 %v767_v17, %v354_v15  ;;  %v729_v22 = vadd.f32 %v728_v20, %v639_v18 }
 0x15b   : > { %837 = vst.msk [vmem:[%s2426_s7 + $0xe0] sm:$0xff] %vm808_vm1, %v804_v21  ;;  %v789_v23 = vadd.f32 %v729_v22, %v339_v19 }
 0x15d   : > { %822 = vst.msk [vmem:[%s2426_s7 + $0x68] sm:$0xff] %vm808_vm1, %v789_v23  ;;  %v679_v24 = vpop.f32.mrf.mxu2 }
 0x15e   : > { %v768_v26 = vpop.f32.mrf.mxu3 }
 0x15f   : > { %v769_v27 = vadd.f32 %v768_v26, %v679_v24  ;;  %v642_v28 = vpop.f32.mrf.mxu0 }
 0x160   : > { %v731_v30 = vpop.f32.mrf.mxu1 }
 0x161   : > { %v805_v31 = vadd.f32 %v769_v27, %v355_v25  ;;  %v732_v32 = vadd.f32 %v731_v30, %v642_v28 }
 0x163   : > { %838 = vst.msk [vmem:[%s2426_s7 + $0xe8] sm:$0xff] %vm808_vm1, %v805_v31  ;;  %v790_v33 = vadd.f32 %v732_v32, %v340_v29 }
 0x165   : > { %823 = vst.msk [vmem:[%s2426_s7 + $0x70] sm:$0xff] %vm808_vm1, %v790_v33  ;;  %v682_v34 = vpop.f32.mrf.mxu2 }
 0x166   : > { %v771_v36 = vpop.f32.mrf.mxu3 }
 0x167   : > { %v772_v37 = vadd.f32 %v771_v36, %v682_v34  ;;  %v644_v38 = vpop.f32.mrf.mxu0 }
 0x168   : > { %v733_v40 = vpop.f32.mrf.mxu1 }
 0x169   : > { %v806_v41 = vadd.f32 %v772_v37, %v356_v35  ;;  %v734_v42 = vadd.f32 %v733_v40, %v644_v38 }
 0x16b   : > { %839 = vst.msk [vmem:[%s2426_s7 + $0xf0] sm:$0xff] %vm808_vm1, %v806_v41  ;;  %v791_v43 = vadd.f32 %v734_v42, %v341_v39 }
 0x16d   : > { %824 = vst.msk [vmem:[%s2426_s7 + $0x78] sm:$0xff] %vm808_vm1, %v791_v43  ;;  %v684_v44 = vpop.f32.mrf.mxu2 }
 0x16e   : > { %v773_v46 = vpop.f32.mrf.mxu3 }
 0x16f   : > { %v774_v47 = vadd.f32 %v773_v46, %v684_v44  ;;  %844 = sbr.rel (%p1998_p3) target bundleno = 756 (0x2f4), region = 52 }
 0x171   : > { %v807_v48 = vadd.f32 %v774_v47, %v357_v45 }
 0x173   : > { %840 = vst.msk [vmem:[%s2426_s7 + $0xf8] sm:$0xff] %vm808_vm1, %v807_v48 }
 0x174   : > { %v849_v49 = vld [vmem:[%s2426_s7 + $0x20] sm:$0xff]  ;;  %v847_v51 = vld [vmem:[%s2426_s7 + $0x10] sm:$0xff]  ;;  %v850_v56 = vld [vmem:[%s2426_s7 + $0x28] sm:$0xff] }
 0x175   : > { %v2690_v50 = vld [vmem:[%s3754_s2] ss:$0 sm:$0xff]  ;;  %v848_v57 = vld [vmem:[%s2426_s7 + $0x18] sm:$0xff]  ;;  %v846_v61 = vld [vmem:[%s2426_s7 + $0x8] sm:$0xff] }
 0x176   : > { %v845_v52 = vld [vmem:[%s2426_s7] sm:$0xff]  ;;  %v2695_v53 = vadd.f32 %v2690_v50, %v849_v49  ;;  %v2698_v54 = vadd.f32 %v2690_v50, %v847_v51  ;;  %v2713_v62 = vadd.f32 %v2690_v50, %v850_v56  ;;  %v2716_v63 = vadd.f32 %v2690_v50, %v848_v57  ;;  %v852_v5 = vld [vmem:[%s2426_s7 + $0x38] sm:$0xff]  ;;  %v851_v6 = vld [vmem:[%s2426_s7 + $0x30] sm:$0xff] }
 0x177   : > { %v2701_v55 = vadd.f32 %v2690_v50, %v845_v52  ;;  %v2719_v0 = vadd.f32 %v2690_v50, %v846_v61  ;;  %v853_v4 = vld [vmem:[%s2426_s7 + $0x40] sm:$0xff]  ;;  %v2734_v8 = vadd.f32 %v2690_v50, %v852_v5  ;;  %v2737_v9 = vadd.f32 %v2690_v50, %v851_v6  ;;  %v856_v13 = vld [vmem:[%s2426_s7 + $0x58] sm:$0xff]  ;;  %v855_v14 = vld [vmem:[%s2426_s7 + $0x50] sm:$0xff] }
 0x178   : > { %v927_v58 = vsel %vm808_vm1, %v2695_v53, 0.0  ;;  %v921_v59 = vsel %vm808_vm1, %v2698_v54, 0.0  ;;  %v930_v1 = vsel %vm808_vm1, %v2713_v62, 0.0  ;;  %v924_v2 = vsel %vm808_vm1, %v2716_v63, 0.0  ;;  %v854_v15 = vld [vmem:[%s2426_s7 + $0x48] sm:$0xff]  ;;  %v859_v22 = vld [vmem:[%s2426_s7 + $0x70] sm:$0xff] }
 0x179   : > { %v915_v60 = vsel %vm808_vm1, %v2701_v55, 0.0  ;;  %928 = vadd.xlane.f32.xlu2 %v927_v58  ;;  %922 = vadd.xlane.f32.xlu1 %v921_v59  ;;  %v918_v3 = vsel %vm808_vm1, %v2719_v0, 0.0  ;;  %v2731_v7 = vadd.f32 %v2690_v50, %v853_v4  ;;  %v936_v11 = vsel %vm808_vm1, %v2734_v8, 0.0  ;;  %v858_v23 = vld [vmem:[%s2426_s7 + $0x68] sm:$0xff]  ;;  %v857_v24 = vld [vmem:[%s2426_s7 + $0x60] sm:$0xff]  ;;  %v860_v33 = vld [vmem:[%s2426_s7 + $0x78] sm:$0xff] }
 0x17a   : > { %916 = vadd.xlane.f32.xlu0 %v915_v60  ;;  %v933_v12 = vsel %vm808_vm1, %v2737_v9, 0.0  ;;  %v2749_v16 = vadd.f32 %v2690_v50, %v856_v13  ;;  %v2752_v17 = vadd.f32 %v2690_v50, %v855_v14  ;;  %v2755_v18 = vadd.f32 %v2690_v50, %v854_v15  ;;  %v862_v31 = vld [vmem:[%s2426_s7 + $0x88] sm:$0xff]  ;;  %v861_v32 = vld [vmem:[%s2426_s7 + $0x80] sm:$0xff]  ;;  %v864_v41 = vld [vmem:[%s2426_s7 + $0x98] sm:$0xff] }
 0x17b   : > { %v939_v10 = vsel %vm808_vm1, %v2731_v7, 0.0  ;;  %v2767_v25 = vadd.f32 %v2690_v50, %v859_v22  ;;  %v2770_v26 = vadd.f32 %v2690_v50, %v858_v23  ;;  %v2773_v27 = vadd.f32 %v2690_v50, %v857_v24  ;;  %v865_v40 = vld [vmem:[%s2426_s7 + $0xa0] sm:$0xff]  ;;  %v863_v42 = vld [vmem:[%s2426_s7 + $0x90] sm:$0xff]  ;;  %v868_v49 = vld [vmem:[%s2426_s7 + $0xb8] sm:$0xff] }
 0x17c   : > { %v948_v19 = vsel %vm808_vm1, %v2749_v16, 0.0  ;;  %v945_v20 = vsel %vm808_vm1, %v2752_v17, 0.0  ;;  %v942_v21 = vsel %vm808_vm1, %v2755_v18, 0.0  ;;  %v2785_v34 = vadd.f32 %v2690_v50, %v862_v31  ;;  %v867_v51 = vld [vmem:[%s2426_s7 + $0xb0] sm:$0xff]  ;;  %v866_v52 = vld [vmem:[%s2426_s7 + $0xa8] sm:$0xff]  ;;  %v873_v14 = vld [vmem:[%s2426_s7 + $0xe0] sm:$0xff] }
 0x17d   : > { %v957_v28 = vsel %vm808_vm1, %v2767_v25, 0.0  ;;  %v954_v29 = vsel %vm808_vm1, %v2770_v26, 0.0  ;;  %v951_v30 = vsel %vm808_vm1, %v2773_v27, 0.0  ;;  %v2788_v35 = vadd.f32 %v2690_v50, %v861_v32  ;;  %v874_v13 = vld [vmem:[%s2426_s7 + $0xe8] sm:$0xff]  ;;  %v872_v15 = vld [vmem:[%s2426_s7 + $0xd8] sm:$0xff] }
 0x17e   : > { %v2791_v36 = vadd.f32 %v2690_v50, %v860_v33  ;;  %v966_v37 = vsel %vm808_vm1, %v2785_v34, 0.0  ;;  %v2803_v43 = vadd.f32 %v2690_v50, %v865_v40  ;;  %v2806_v44 = vadd.f32 %v2690_v50, %v864_v41 }
 0x17f   : > { %v963_v38 = vsel %vm808_vm1, %v2788_v35, 0.0  ;;  %v2809_v45 = vadd.f32 %v2690_v50, %v863_v42  ;;  %v2821_v56 = vadd.f32 %v2690_v50, %v868_v49  ;;  %v2824_v57 = vadd.f32 %v2690_v50, %v867_v51 }
 0x180   : > { %v960_v39 = vsel %vm808_vm1, %v2791_v36, 0.0  ;;  %v975_v46 = vsel %vm808_vm1, %v2803_v43, 0.0  ;;  %v972_v47 = vsel %vm808_vm1, %v2806_v44, 0.0  ;;  %v2827_v58 = vadd.f32 %v2690_v50, %v866_v52 }
 0x181   : > { %931 = vadd.xlane.f32.xlu2 %v930_v1  ;;  %925 = vadd.xlane.f32.xlu1 %v924_v2  ;;  %v969_v48 = vsel %vm808_vm1, %v2809_v45, 0.0  ;;  %v984_v59 = vsel %vm808_vm1, %v2821_v56, 0.0  ;;  %v981_v60 = vsel %vm808_vm1, %v2824_v57, 0.0  ;;  %v871_v1 = vld [vmem:[%s2426_s7 + $0xd0] sm:$0xff]  ;;  %v870_v2 = vld [vmem:[%s2426_s7 + $0xc8] sm:$0xff] }
 0x182   : > { %919 = vadd.xlane.f32.xlu0 %v918_v3  ;;  %v978_v61 = vsel %vm808_vm1, %v2827_v58, 0.0  ;;  %v869_v3 = vld [vmem:[%s2426_s7 + $0xc0] sm:$0xff]  ;;  %v2839_v4 = vadd.f32 %v2690_v50, %v871_v1  ;;  %v2842_v5 = vadd.f32 %v2690_v50, %v870_v2 }
 0x183   : > { %v2845_v6 = vadd.f32 %v2690_v50, %v869_v3 }
 0x189   : > { %940 = vadd.xlane.f32.xlu2 %v939_v10  ;;  %937 = vadd.xlane.f32.xlu1 %v936_v11  ;;  %v993_v10 = vsel %vm808_vm1, %v2839_v4, 0.0  ;;  %v990_v11 = vsel %vm808_vm1, %v2842_v5, 0.0 }
 0x18a   : > { %934 = vadd.xlane.f32.xlu0 %v933_v12  ;;  %v987_v12 = vsel %vm808_vm1, %v2845_v6, 0.0 }
 0x191   : > { %949 = vadd.xlane.f32.xlu2 %v948_v19  ;;  %946 = vadd.xlane.f32.xlu1 %v945_v20  ;;  %v2857_v19 = vadd.f32 %v2690_v50, %v874_v13  ;;  %v2860_v20 = vadd.f32 %v2690_v50, %v873_v14 }
 0x192   : > { %943 = vadd.xlane.f32.xlu0 %v942_v21  ;;  %v2863_v21 = vadd.f32 %v2690_v50, %v872_v15 }
 0x193   : > { %v1002_v22 = vsel %vm808_vm1, %v2857_v19, 0.0  ;;  %v999_v23 = vsel %vm808_vm1, %v2860_v20, 0.0 }
 0x194   : > { %v996_v24 = vsel %vm808_vm1, %v2863_v21, 0.0 }
 0x199   : > { %958 = vadd.xlane.f32.xlu2 %v957_v28  ;;  %955 = vadd.xlane.f32.xlu1 %v954_v29  ;;  %v876_v28 = vld [vmem:[%s2426_s7 + $0xf8] sm:$0xff]  ;;  %v875_v29 = vld [vmem:[%s2426_s7 + $0xf0] sm:$0xff] }
 0x19a   : > { %952 = vadd.xlane.f32.xlu0 %v951_v30  ;;  %v2874_v30 = vadd.f32 %v2690_v50, %v876_v28  ;;  %v2877_v31 = vadd.f32 %v2690_v50, %v875_v29 }
 0x19c   : > { %v1008_v32 = vsel %vm808_vm1, %v2874_v30, 0.0  ;;  %v1005_v33 = vsel %vm808_vm1, %v2877_v31, 0.0 }
 0x1a1   : > { %967 = vadd.xlane.f32.xlu2 %v966_v37  ;;  %964 = vadd.xlane.f32.xlu1 %v963_v38  ;;  %v2299_v37 = vmov 32.0  }
 0x1a2   : > { %961 = vadd.xlane.f32.xlu0 %v960_v39  ;;  %2129 = vrcp.f32 %v2299_v37 }
 0x1a8   : > { %v2130_v38 = vpop.eup %2129 }
 0x1a9   : > { %976 = vadd.xlane.f32.xlu2 %v975_v46  ;;  %973 = vadd.xlane.f32.xlu1 %v972_v47  ;;  %v1012_v39 = vmul.f32 32.0, %v2130_v38  ;;  %vm1016_vm2 = vweird.f32 %v2130_v38 }
 0x1aa   : > { %970 = vadd.xlane.f32.xlu0 %v969_v48 }
 0x1ab   : > { %v1013_v40 = vsub.f32 1.0, %v1012_v39 }
 0x1ad   : > { %v1014_v41 = vmul.f32 %v2130_v38, %v1013_v40 }
 0x1af   : > { %v1015_v42 = vadd.f32 %v2130_v38, %v1014_v41 }
 0x1b1   : > { %985 = vadd.xlane.f32.xlu2 %v984_v59  ;;  %982 = vadd.xlane.f32.xlu1 %v981_v60  ;;  %v2883_v46 = vsel %vm1016_vm2, %v2130_v38, %v1015_v42 }
 0x1b2   : > { %979 = vadd.xlane.f32.xlu0 %v978_v61 }
 0x1b9   : > { %994 = vadd.xlane.f32.xlu2 %v993_v10  ;;  %991 = vadd.xlane.f32.xlu1 %v990_v11 }
 0x1ba   : > { %988 = vadd.xlane.f32.xlu0 %v987_v12 }
 0x1c1   : > { %1003 = vadd.xlane.f32.xlu2 %v1002_v22  ;;  %1000 = vadd.xlane.f32.xlu1 %v999_v23 }
 0x1c2   : > { %997 = vadd.xlane.f32.xlu0 %v996_v24 }
 0x1c9   : > { %1009 = vadd.xlane.f32.xlu1 %v1008_v32 }
 0x1ca   : > { %1006 = vadd.xlane.f32.xlu0 %v1005_v33 }
 0x1ec   : > { %v929_v50 = vpop.xlane.xlu2 %928  ;;  %v923_v47 = vpop.xlane.xlu1 %922 }
 0x1ed   : > { %v1020_v48 = vmul.f32 %v2883_v46, %v923_v47  ;;  %v917_v49 = vpop.xlane.xlu0 %916  ;;  %v1022_v12 = vmul.f32 %v2883_v46, %v929_v50 }
 0x1ee   : > { %v1018_v51 = vmul.f32 %v2883_v46, %v917_v49 }
 0x1ef   : > { %v2888_v52 = vsub.f32 %v2698_v54, %v1020_v48  ;;  %v2917_v28 = vsub.f32 %v2695_v53, %v1022_v12 }
 0x1f0   : > { %v2891_v59 = vsub.f32 %v2701_v55, %v1018_v51 }
 0x1f1   : > { %v1084_v60 = vmul.f32 %v2888_v52, %v2888_v52  ;;  %v1086_v40 = vmul.f32 %v2917_v28, %v2917_v28 }
 0x1f2   : > { %v1082_v61 = vmul.f32 %v2891_v59, %v2891_v59 }
 0x1f3   : > { %v1120_v1 = vsel %vm808_vm1, %v1084_v60, 0.0  ;;  %v1126_v48 = vsel %vm808_vm1, %v1086_v40, 0.0 }
 0x1f4   : > { %v932_v2 = vpop.xlane.xlu2 %931  ;;  %1121 = vadd.xlane.f32.xlu1 %v1120_v1  ;;  %v926_v3 = vpop.xlane.xlu1 %925  ;;  %v1114_v10 = vsel %vm808_vm1, %v1082_v61, 0.0 }
 0x1f5   : > { %v1023_v11 = vmul.f32 %v2883_v46, %v932_v2  ;;  %v1021_v54 = vmul.f32 %v2883_v46, %v926_v3  ;;  %1115 = vadd.xlane.f32.xlu2 %v1114_v10  ;;  %v920_v55 = vpop.xlane.xlu0 %919 }
 0x1f6   : > { %v1019_v13 = vmul.f32 %v2883_v46, %v920_v55 }
 0x1f7   : > { %v2904_v14 = vsub.f32 %v2713_v62, %v1023_v11  ;;  %v2907_v15 = vsub.f32 %v2716_v63, %v1021_v54 }
 0x1f8   : > { %v2910_v22 = vsub.f32 %v2719_v0, %v1019_v13 }
 0x1f9   : > { %v1087_v23 = vmul.f32 %v2904_v14, %v2904_v14  ;;  %v1085_v24 = vmul.f32 %v2907_v15, %v2907_v15 }
 0x1fa   : > { %v1083_v29 = vmul.f32 %v2910_v22, %v2910_v22 }
 0x1fb   : > { %v1129_v62 = vsel %vm808_vm1, %v1087_v23, 0.0  ;;  %v1123_v63 = vsel %vm808_vm1, %v1085_v24, 0.0 }
 0x1fc   : > { %v941_v32 = vpop.xlane.xlu2 %940  ;;  %1130 = vadd.xlane.f32.xlu1 %v1129_v62  ;;  %v1117_v0 = vsel %vm808_vm1, %v1083_v29, 0.0  ;;  %v938_v33 = vpop.xlane.xlu1 %937 }
 0x1fd   : > { %v1026_v37 = vmul.f32 %v2883_v46, %v941_v32  ;;  %1124 = vadd.xlane.f32.xlu2 %v1123_v63  ;;  %1118 = vadd.xlane.f32.xlu0 %v1117_v0  ;;  %v935_v38 = vpop.xlane.xlu0 %934  ;;  %v1025_v39 = vmul.f32 %v2883_v46, %v938_v33 }
 0x1fe   : > { %v1024_v53 = vmul.f32 %v2883_v46, %v935_v38 }
 0x1ff   : > { %v2930_v41 = vsub.f32 %v2731_v7, %v1026_v37  ;;  %v2938_v47 = vsub.f32 %v2734_v8, %v1025_v39 }
 0x200   : > { %v2933_v42 = vsub.f32 %v2737_v9, %v1024_v53 }
 0x201   : > { %v1090_v50 = vmul.f32 %v2930_v41, %v2930_v41  ;;  %v1089_v3 = vmul.f32 %v2938_v47, %v2938_v47 }
 0x202   : > { %v1088_v49 = vmul.f32 %v2933_v42, %v2933_v42 }
 0x203   : > { %v1138_v51 = vsel %vm808_vm1, %v1090_v50, 0.0  ;;  %v1135_v12 = vsel %vm808_vm1, %v1089_v3, 0.0 }
 0x204   : > { %v950_v60 = vpop.xlane.xlu2 %949  ;;  %1139 = vadd.xlane.f32.xlu1 %v1138_v51  ;;  %v1132_v7 = vsel %vm808_vm1, %v1088_v49, 0.0  ;;  %v947_v61 = vpop.xlane.xlu1 %946 }
 0x205   : > { %v1029_v9 = vmul.f32 %v2883_v46, %v950_v60  ;;  %1127 = vadd.xlane.f32.xlu0 %v1126_v48  ;;  %1133 = vadd.xlane.f32.xlu2 %v1132_v7  ;;  %v944_v1 = vpop.xlane.xlu0 %943  ;;  %v1028_v2 = vmul.f32 %v2883_v46, %v947_v61 }
 0x206   : > { %v1027_v8 = vmul.f32 %v2883_v46, %v944_v1 }
 0x207   : > { %v2951_v10 = vsub.f32 %v2749_v16, %v1029_v9  ;;  %v2959_v55 = vsub.f32 %v2752_v17, %v1028_v2 }
 0x208   : > { %v2954_v11 = vsub.f32 %v2755_v18, %v1027_v8 }
 0x209   : > { %v1093_v54 = vmul.f32 %v2951_v10, %v2951_v10  ;;  %v1092_v32 = vmul.f32 %v2959_v55, %v2959_v55 }
 0x20a   : > { %v1091_v13 = vmul.f32 %v2954_v11, %v2954_v11 }
 0x20b   : > { %v1147_v23 = vsel %vm808_vm1, %v1093_v54, 0.0  ;;  %v1144_v53 = vsel %vm808_vm1, %v1092_v32, 0.0 }
 0x20c   : > { %v959_v24 = vpop.xlane.xlu2 %958  ;;  %1148 = vadd.xlane.f32.xlu1 %v1147_v23  ;;  %v1141_v16 = vsel %vm808_vm1, %v1091_v13, 0.0  ;;  %v956_v29 = vpop.xlane.xlu1 %955 }
 0x20d   : > { %v1032_v18 = vmul.f32 %v2883_v46, %v959_v24  ;;  %1136 = vadd.xlane.f32.xlu0 %v1135_v12  ;;  %1142 = vadd.xlane.f32.xlu2 %v1141_v16  ;;  %v953_v62 = vpop.xlane.xlu0 %952  ;;  %v1031_v63 = vmul.f32 %v2883_v46, %v956_v29 }
 0x20e   : > { %v1030_v17 = vmul.f32 %v2883_v46, %v953_v62 }
 0x20f   : > { %v2972_v0 = vsub.f32 %v2767_v25, %v1032_v18  ;;  %v2980_v38 = vsub.f32 %v2770_v26, %v1031_v63 }
 0x210   : > { %v2975_v33 = vsub.f32 %v2773_v27, %v1030_v17 }
 0x211   : > { %v1096_v37 = vmul.f32 %v2972_v0, %v2972_v0  ;;  %v1095_v60 = vmul.f32 %v2980_v38, %v2980_v38 }
 0x212   : > { %v1094_v39 = vmul.f32 %v2975_v33, %v2975_v33 }
 0x213   : > { %v1156_v40 = vsel %vm808_vm1, %v1096_v37, 0.0  ;;  %v1153_v8 = vsel %vm808_vm1, %v1095_v60, 0.0 }
 0x214   : > { %v968_v50 = vpop.xlane.xlu2 %967  ;;  %1157 = vadd.xlane.f32.xlu1 %v1156_v40  ;;  %v1150_v25 = vsel %vm808_vm1, %v1094_v39, 0.0  ;;  %v965_v48 = vpop.xlane.xlu1 %964 }
 0x215   : > { %v1035_v27 = vmul.f32 %v2883_v46, %v968_v50  ;;  %1145 = vadd.xlane.f32.xlu0 %v1144_v53  ;;  %1151 = vadd.xlane.f32.xlu2 %v1150_v25  ;;  %v962_v49 = vpop.xlane.xlu0 %961  ;;  %v1034_v51 = vmul.f32 %v2883_v46, %v965_v48 }
 0x216   : > { %v1033_v26 = vmul.f32 %v2883_v46, %v962_v49 }
 0x217   : > { %v2993_v7 = vsub.f32 %v2785_v34, %v1035_v27  ;;  %v3001_v1 = vsub.f32 %v2788_v35, %v1034_v51 }
 0x218   : > { %v2996_v61 = vsub.f32 %v2791_v36, %v1033_v26 }
 0x219   : > { %v1099_v9 = vmul.f32 %v2993_v7, %v2993_v7  ;;  %v1098_v24 = vmul.f32 %v3001_v1, %v3001_v1 }
 0x21a   : > { %v1097_v2 = vmul.f32 %v2996_v61, %v2996_v61 }
 0x21b   : > { %v1165_v3 = vsel %vm808_vm1, %v1099_v9, 0.0  ;;  %v1162_v17 = vsel %vm808_vm1, %v1098_v24, 0.0 }
 0x21c   : > { %v977_v54 = vpop.xlane.xlu2 %976  ;;  %1166 = vadd.xlane.f32.xlu1 %v1165_v3  ;;  %v1159_v34 = vsel %vm808_vm1, %v1097_v2, 0.0  ;;  %v974_v12 = vpop.xlane.xlu1 %973 }
 0x21d   : > { %v1038_v36 = vmul.f32 %v2883_v46, %v977_v54  ;;  %1154 = vadd.xlane.f32.xlu0 %v1153_v8  ;;  %1160 = vadd.xlane.f32.xlu2 %v1159_v34  ;;  %v971_v13 = vpop.xlane.xlu0 %970  ;;  %v1037_v23 = vmul.f32 %v2883_v46, %v974_v12 }
 0x21e   : > { %v1036_v35 = vmul.f32 %v2883_v46, %v971_v13 }
 0x21f   : > { %v3014_v16 = vsub.f32 %v2803_v43, %v1038_v36  ;;  %v3022_v62 = vsub.f32 %v2806_v44, %v1037_v23 }
 0x220   : > { %v3017_v29 = vsub.f32 %v2809_v45, %v1036_v35 }
 0x221   : > { %v1102_v18 = vmul.f32 %v3014_v16, %v3014_v16  ;;  %v1101_v50 = vmul.f32 %v3022_v62, %v3022_v62 }
 0x222   : > { %v1100_v63 = vmul.f32 %v3017_v29, %v3017_v29 }
 0x223   : > { %v1174_v32 = vsel %vm808_vm1, %v1102_v18, 0.0  ;;  %v1171_v26 = vsel %vm808_vm1, %v1101_v50, 0.0 }
 0x224   : > { %v986_v37 = vpop.xlane.xlu2 %985  ;;  %1175 = vadd.xlane.f32.xlu1 %v1174_v32  ;;  %v1168_v43 = vsel %vm808_vm1, %v1100_v63, 0.0  ;;  %v983_v53 = vpop.xlane.xlu1 %982 }
 0x225   : > { %v1041_v45 = vmul.f32 %v2883_v46, %v986_v37  ;;  %1163 = vadd.xlane.f32.xlu0 %v1162_v17  ;;  %1169 = vadd.xlane.f32.xlu2 %v1168_v43  ;;  %v980_v39 = vpop.xlane.xlu0 %979  ;;  %v1040_v40 = vmul.f32 %v2883_v46, %v983_v53 }
 0x226   : > { %v1039_v44 = vmul.f32 %v2883_v46, %v980_v39 }
 0x227   : > { %v3035_v25 = vsub.f32 %v2821_v56, %v1041_v45  ;;  %v3043_v49 = vsub.f32 %v2824_v57, %v1040_v40 }
 0x228   : > { %v3038_v48 = vsub.f32 %v2827_v58, %v1039_v44 }
 0x229   : > { %v1105_v27 = vmul.f32 %v3035_v25, %v3035_v25  ;;  %v1104_v54 = vmul.f32 %v3043_v49, %v3043_v49 }
 0x22a   : > { %v1103_v51 = vmul.f32 %v3038_v48, %v3038_v48 }
 0x22b   : > { %v1183_v60 = vsel %vm808_vm1, %v1105_v27, 0.0  ;;  %v1180_v35 = vsel %vm808_vm1, %v1104_v54, 0.0 }
 0x22c   : > { %v995_v9 = vpop.xlane.xlu2 %994  ;;  %1184 = vadd.xlane.f32.xlu1 %v1183_v60  ;;  %v1177_v56 = vsel %vm808_vm1, %v1103_v51, 0.0  ;;  %v992_v8 = vpop.xlane.xlu1 %991 }
 0x22d   : > { %v1044_v58 = vmul.f32 %v2883_v46, %v995_v9  ;;  %1172 = vadd.xlane.f32.xlu0 %v1171_v26  ;;  %1178 = vadd.xlane.f32.xlu2 %v1177_v56  ;;  %v989_v2 = vpop.xlane.xlu0 %988  ;;  %v1043_v3 = vmul.f32 %v2883_v46, %v992_v8 }
 0x22e   : > { %v1042_v57 = vmul.f32 %v2883_v46, %v989_v2 }
 0x22f   : > { %v3056_v34 = vsub.f32 %v2839_v4, %v1044_v58  ;;  %v3064_v13 = vsub.f32 %v2842_v5, %v1043_v3 }
 0x230   : > { %v3059_v12 = vsub.f32 %v2845_v6, %v1042_v57 }
 0x231   : > { %v1108_v36 = vmul.f32 %v3056_v34, %v3056_v34  ;;  %v1107_v37 = vmul.f32 %v3064_v13, %v3064_v13 }
 0x232   : > { %v1106_v23 = vmul.f32 %v3059_v12, %v3059_v12 }
 0x233   : > { %v1192_v24 = vsel %vm808_vm1, %v1108_v36, 0.0  ;;  %v1189_v44 = vsel %vm808_vm1, %v1107_v37, 0.0 }
 0x234   : > { %v1004_v18 = vpop.xlane.xlu2 %1003  ;;  %1193 = vadd.xlane.f32.xlu1 %v1192_v24  ;;  %v1186_v4 = vsel %vm808_vm1, %v1106_v23, 0.0  ;;  %v1001_v17 = vpop.xlane.xlu1 %1000 }
 0x235   : > { %v1047_v6 = vmul.f32 %v2883_v46, %v1004_v18  ;;  %1181 = vadd.xlane.f32.xlu0 %v1180_v35  ;;  %1187 = vadd.xlane.f32.xlu2 %v1186_v4  ;;  %v998_v63 = vpop.xlane.xlu0 %997  ;;  %v1046_v32 = vmul.f32 %v2883_v46, %v1001_v17 }
 0x236   : > { %v1045_v5 = vmul.f32 %v2883_v46, %v998_v63 }
 0x237   : > { %v3077_v43 = vsub.f32 %v2857_v19, %v1047_v6  ;;  %v3085_v39 = vsub.f32 %v2860_v20, %v1046_v32 }
 0x238   : > { %v3080_v53 = vsub.f32 %v2863_v21, %v1045_v5 }
 0x239   : > { %v1111_v45 = vmul.f32 %v3077_v43, %v3077_v43  ;;  %v1110_v20 = vmul.f32 %v3085_v39, %v3085_v39 }
 0x23a   : > { %v1109_v40 = vmul.f32 %v3080_v53, %v3080_v53 }
 0x23b   : > { %v1201_v50 = vsel %vm808_vm1, %v1111_v45, 0.0  ;;  %v1198_v56 = vsel %vm808_vm1, %v1110_v20, 0.0 }
 0x23c   : > { %1202 = vadd.xlane.f32.xlu1 %v1201_v50  ;;  %v1195_v19 = vsel %vm808_vm1, %v1109_v40, 0.0  ;;  %v1010_v27 = vpop.xlane.xlu1 %1009 }
 0x23d   : > { %1190 = vadd.xlane.f32.xlu0 %v1189_v44  ;;  %1196 = vadd.xlane.f32.xlu2 %v1195_v19  ;;  %v1007_v21 = vpop.xlane.xlu0 %1006  ;;  %v1049_v51 = vmul.f32 %v2883_v46, %v1010_v27 }
 0x23e   : > { %v1048_v26 = vmul.f32 %v2883_v46, %v1007_v21 }
 0x23f   : > { %v3100_v9 = vsub.f32 %v2874_v30, %v1049_v51 }
 0x240   : > { %v3097_v60 = vsub.f32 %v2877_v31, %v1048_v26 }
 0x241   : > { %v1113_v2 = vmul.f32 %v3100_v9, %v3100_v9 }
 0x242   : > { %v1112_v8 = vmul.f32 %v3097_v60, %v3097_v60 }
 0x243   : > { %v1207_v57 = vsel %vm808_vm1, %v1113_v2, 0.0 }
 0x244   : > { %v1204_v58 = vsel %vm808_vm1, %v1112_v8, 0.0 }
 0x245   : > { %1199 = vadd.xlane.f32.xlu0 %v1198_v56  ;;  %1205 = vadd.xlane.f32.xlu2 %v1204_v58 }
 0x24d   : > { %1208 = vadd.xlane.f32.xlu0 %v1207_v57 }
 0x267   : > { %v1122_v31 = vpop.xlane.xlu1 %1121 }
 0x268   : > { %v1212_v3 = vmul.f32 %v1122_v31, %v2883_v46  ;;  %v1116_v30 = vpop.xlane.xlu2 %1115 }
 0x269   : > { %v1210_v54 = vmul.f32 %v1116_v30, %v2883_v46 }
 0x26a   : > { %v1244_v36 = vadd.f32 1e-05, %v1212_v3 }
 0x26b   : > { %v1242_v35 = vadd.f32 1e-05, %v1210_v54 }
 0x26c   : > { %2131 = vrsqrt.f32 %v1244_v36  ;;  %vm1300_vm3 = vweird.f32 %v1244_v36 }
 0x26d   : > { %2133 = vrsqrt.f32 %v1242_v35  ;;  %vm1280_vm5 = vweird.f32 %v1242_v35 }
 0x26f   : > { %v1131_v23 = vpop.xlane.xlu1 %1130 }
 0x270   : > { %v1215_v24 = vmul.f32 %v1131_v23, %v2883_v46  ;;  %v1125_v18 = vpop.xlane.xlu2 %1124  ;;  %v1119_v4 = vpop.xlane.xlu0 %1118 }
 0x271   : > { %v1213_v17 = vmul.f32 %v1125_v18, %v2883_v46  ;;  %v1211_v6 = vmul.f32 %v1119_v4, %v2883_v46  ;;  %v3142_v18 = vld [vmem:[%s3755_s3] ss:$0 sm:$0xff] }
 0x272   : > { %v2132_v63 = vpop.eup %2131  ;;  %v3114_v5 = vadd.f32 1e-05, %v1215_v24 }
 0x273   : > { %v2134_v32 = vpop.eup %2133  ;;  %v1295_v37 = vmul.f32 %v2132_v63, %v1244_v36  ;;  %v3116_v45 = vadd.f32 1e-05, %v1213_v17  ;;  %v3118_v44 = vadd.f32 1e-05, %v1211_v6  ;;  %vm1301_vm4 = vweird.f32 %v2132_v63  ;;  %v3159_v36 = vld [vmem:[%s3756_s4] ss:$0 sm:$0xff] }
 0x274   : > { %v1275_v40 = vmul.f32 %v2134_v32, %v1242_v35  ;;  %2135 = vrsqrt.f32 %v3114_v5  ;;  %vm1281_vm6 = vweird.f32 %v2134_v32  ;;  %vm1330_vm7 = vweird.f32 %v3114_v5  ;;  %vm1302_vm9 = vmor %vm1300_vm3, %vm1301_vm4 }
 0x275   : > { %v1296_v50 = vmul.f32 %v2132_v63, %v1295_v37  ;;  %2137 = vrsqrt.f32 %v3116_v45  ;;  %vm1310_vm8 = vweird.f32 %v3116_v45  ;;  %vm1282_vm10 = vmor %vm1280_vm5, %vm1281_vm6  ;;  %vm1290_vm11 = vweird.f32 %v3118_v44 }
 0x276   : > { %v1276_v19 = vmul.f32 %v2134_v32, %v1275_v40  ;;  %2139 = vrsqrt.f32 %v3118_v44 }
 0x277   : > { %v1297_v27 = vmul.f32 0.5, %v1296_v50  ;;  %v1140_v21 = vpop.xlane.xlu1 %1139 }
 0x278   : > { %v1277_v26 = vmul.f32 0.5, %v1276_v19  ;;  %v1218_v51 = vmul.f32 %v1140_v21, %v2883_v46  ;;  %v1134_v20 = vpop.xlane.xlu2 %1133  ;;  %v1128_v56 = vpop.xlane.xlu0 %1127 }
 0x279   : > { %v1298_v8 = vsub.f32 1.5, %v1297_v27  ;;  %v1216_v58 = vmul.f32 %v1134_v20, %v2883_v46  ;;  %v1214_v6 = vmul.f32 %v1128_v56, %v2883_v46 }
 0x27a   : > { %v3125_v2 = vpop.eup %2135  ;;  %v1278_v57 = vsub.f32 1.5, %v1277_v26  ;;  %v3128_v31 = vadd.f32 1e-05, %v1218_v51 }
 0x27b   : > { %v3130_v3 = vpop.eup %2137  ;;  %v1299_v30 = vmul.f32 %v2132_v63, %v1298_v8  ;;  %v1325_v54 = vmul.f32 %v3125_v2, %v3114_v5  ;;  %v3135_v23 = vadd.f32 1e-05, %v1216_v58  ;;  %vm1331_vm12 = vweird.f32 %v3125_v2 }
 0x27c   : > { %v3137_v24 = vpop.eup %2139  ;;  %v1279_v4 = vmul.f32 %v2134_v32, %v1278_v57  ;;  %v1305_v17 = vmul.f32 %v3130_v3, %v3116_v45  ;;  %2141 = vrsqrt.f32 %v3128_v31  ;;  %vm1311_vm13 = vweird.f32 %v3130_v3  ;;  %vm3180_vm14 = vmor %vm1330_vm7, %vm1331_vm12 }
 0x27d   : > { %v1303_v37 = vsel %vm1302_vm9, %v2132_v63, %v1299_v30  ;;  %v1326_v40 = vmul.f32 %v3125_v2, %v1325_v54  ;;  %v1285_v50 = vmul.f32 %v3137_v24, %v3118_v44  ;;  %2143 = vrsqrt.f32 %v3135_v23  ;;  %vm1312_vm2 = vmor %vm1310_vm8, %vm1311_vm13 }
 0x27e   : > { %v1596_v19 = vmul.f32 %v1303_v37, %v2888_v52  ;;  %v1283_v27 = vsel %vm1282_vm10, %v2134_v32, %v1279_v4  ;;  %v1306_v35 = vmul.f32 %v3130_v3, %v1305_v17  ;;  %v3169_v8 = vadd.f32 1e-05, %v1214_v6 }
 0x27f   : > { %v1594_v63 = vmul.f32 %v1283_v27, %v2891_v59  ;;  %v1327_v21 = vmul.f32 0.5, %v1326_v40  ;;  %v1286_v26 = vmul.f32 %v3137_v24, %v1285_v50  ;;  %v1149_v51 = vpop.xlane.xlu1 %1148  ;;  %vm1291_vm15 = vweird.f32 %v3137_v24 }
 0x280   : > { %v1631_v20 = vmul.f32 %v3142_v18, %v1596_v19  ;;  %v1307_v56 = vmul.f32 0.5, %v1306_v35  ;;  %v1221_v57 = vmul.f32 %v1149_v51, %v2883_v46  ;;  %2145 = vrsqrt.f32 %v3169_v8  ;;  %v1137_v17 = vpop.xlane.xlu0 %1136  ;;  %v1143_v5 = vpop.xlane.xlu2 %1142  ;;  %vm1292_vm3 = vmor %vm1290_vm11, %vm1291_vm15 }
 0x281   : > { %v1629_v52 = vmul.f32 %v3142_v18, %v1594_v63  ;;  %v1328_v32 = vsub.f32 1.5, %v1327_v21  ;;  %v1287_v58 = vmul.f32 0.5, %v1286_v26  ;;  %vm1360_vm0 = vweird.f32 %v3128_v31 }
 0x282   : > { %v3173_v59 = vpop.eup %2141  ;;  %v1666_v30 = vadd.f32 %v3159_v36, %v1631_v20  ;;  %v1308_v4 = vsub.f32 1.5, %v1307_v56  ;;  %v3192_v35 = vadd.f32 1e-05, %v1221_v57  ;;  %vm1340_vm5 = vweird.f32 %v3135_v23 }
 0x283   : > { %v1664_v6 = vadd.f32 %v3159_v36, %v1629_v52  ;;  %v1329_v37 = vmul.f32 %v3125_v2, %v1328_v32  ;;  %v1288_v40 = vsub.f32 1.5, %v1287_v58  ;;  %v1355_v50 = vmul.f32 %v3173_v59, %v3128_v31  ;;  %v3194_v63 = vpop.eup %2143 }
 0x284   : > { %v1698_v19 = vmax.f32 %v1666_v30, 0.0  ;;  %v1309_v27 = vmul.f32 %v3130_v3, %v1308_v4  ;;  %vm1361_vm4 = vweird.f32 %v3173_v59  ;;  %v1335_v45 = vmul.f32 %v3194_v63, %v3135_v23 }
 0x285   : > { %v1696_v21 = vmax.f32 %v1664_v6, 0.0  ;;  %v1333_v26 = vsel %vm3180_vm14, %v3125_v2, %v1329_v37  ;;  %v1289_v51 = vmul.f32 %v3137_v24, %v1288_v40  ;;  %v1356_v20 = vmul.f32 %v3173_v59, %v1355_v50  ;;  %vm3235_vm8 = vmor %vm1360_vm0, %vm1361_vm4 }
 0x286   : > { %1730 = vst.msk [vmem:[%s2426_s7 + $0x10] sm:$0xff] %vm808_vm1, %v1698_v19  ;;  %v1599_v56 = vmul.f32 %v1333_v26, %v2904_v14  ;;  %v1313_v52 = vsel %vm1312_vm2, %v3130_v3, %v1309_v27  ;;  %2147 = vrsqrt.f32 %v3192_v35  ;;  %v2146_v3 = vpop.eup %2145  ;;  %v1336_v30 = vmul.f32 %v3194_v63, %v1335_v45 }
 0x287   : > { %1728 = vst.msk [vmem:[%s2426_s7] sm:$0xff] %vm808_vm1, %v1696_v21  ;;  %v1597_v2 = vmul.f32 %v1313_v52, %v2907_v15  ;;  %v1293_v32 = vsel %vm1292_vm3, %v3137_v24, %v1289_v51  ;;  %v1357_v58 = vmul.f32 0.5, %v1356_v20  ;;  %v1158_v14 = vpop.xlane.xlu1 %1157  ;;  %vm1341_vm6 = vweird.f32 %v3194_v63 }
 0x288   : > { %v1634_v57 = vmul.f32 %v3142_v18, %v1599_v56  ;;  %v1595_v44 = vmul.f32 %v1293_v32, %v2910_v22  ;;  %v1315_v15 = vmul.f32 %v2146_v3, %v3169_v8  ;;  %vm1320_vm7 = vweird.f32 %v3169_v8  ;;  %v1146_v56 = vpop.xlane.xlu0 %1145  ;;  %vm1342_vm9 = vmor %vm1340_vm5, %vm1341_vm6 }
 0x289   : > { %v1632_v54 = vmul.f32 %v3142_v18, %v1597_v2  ;;  %v1358_v4 = vsub.f32 1.5, %v1357_v58  ;;  %v1337_v37 = vmul.f32 0.5, %v1336_v30  ;;  %v1219_v40 = vmul.f32 %v1143_v5, %v2883_v46  ;;  %v1152_v58 = vpop.xlane.xlu2 %1151 }
 0x28a   : > { %v1669_v24 = vadd.f32 %v3159_v36, %v1634_v57  ;;  %v1630_v6 = vmul.f32 %v3142_v18, %v1595_v44  ;;  %v1316_v27 = vmul.f32 %v2146_v3, %v1315_v15  ;;  %v1217_v21 = vmul.f32 %v1137_v17, %v2883_v46 }
 0x28b   : > { %v1667_v50 = vadd.f32 %v3159_v36, %v1632_v54  ;;  %v1359_v19 = vmul.f32 %v3173_v59, %v1358_v4  ;;  %v1338_v31 = vsub.f32 1.5, %v1337_v37  ;;  %v3244_v20 = vadd.f32 1e-05, %v1219_v40 }
 0x28c   : > { %v1701_v26 = vmax.f32 %v1669_v24, 0.0  ;;  %v1665_v51 = vadd.f32 %v3159_v36, %v1630_v6  ;;  %v2148_v52 = vpop.eup %2147  ;;  %v1317_v2 = vmul.f32 0.5, %v1316_v27  ;;  %v3249_v32 = vadd.f32 1e-05, %v1217_v21 }
 0x28d   : > { %v1699_v45 = vmax.f32 %v1667_v50, 0.0  ;;  %v1363_v5 = vsel %vm3235_vm8, %v3173_v59, %v1359_v19  ;;  %v1339_v44 = vmul.f32 %v3194_v63, %v1338_v31  ;;  %v1385_v30 = vmul.f32 %v2148_v52, %v3192_v35 }
 0x28e   : > { %1733 = vst.msk [vmem:[%s2426_s7 + $0x28] sm:$0xff] %vm808_vm1, %v1701_v26  ;;  %v1697_v17 = vmax.f32 %v1665_v51, 0.0  ;;  %v1602_v57 = vmul.f32 %v1363_v5, %v2930_v41  ;;  %v1318_v59 = vsub.f32 1.5, %v1317_v2  ;;  %vm1321_vm10 = vweird.f32 %v2146_v3 }
 0x28f   : > { %1731 = vst.msk [vmem:[%s2426_s7 + $0x18] sm:$0xff] %vm808_vm1, %v1699_v45  ;;  %vm1390_vm11 = vweird.f32 %v3192_v35  ;;  %2149 = vrsqrt.f32 %v3244_v20  ;;  %v1343_v54 = vsel %vm1342_vm9, %v3194_v63, %v1339_v44  ;;  %v1386_v4 = vmul.f32 %v2148_v52, %v1385_v30  ;;  %v1167_v15 = vpop.xlane.xlu1 %1166  ;;  %vm1322_vm13 = vmor %vm1320_vm7, %vm1321_vm10 }
 0x290   : > { %1729 = vst.msk [vmem:[%s2426_s7 + $0x8] sm:$0xff] %vm808_vm1, %v1697_v17  ;;  %v1637_v41 = vmul.f32 %v3142_v18, %v1602_v57  ;;  %2151 = vrsqrt.f32 %v3249_v32  ;;  %v1600_v24 = vmul.f32 %v1343_v54, %v2933_v42  ;;  %v1319_v23 = vmul.f32 %v2146_v3, %v1318_v59  ;;  %v1155_v2 = vpop.xlane.xlu0 %1154 }
 0x291   : > { %vm1391_vm12 = vweird.f32 %v2148_v52  ;;  %v1224_v6 = vmul.f32 %v1158_v14, %v2883_v46  ;;  %v1387_v37 = vmul.f32 0.5, %v1386_v4  ;;  %v1222_v40 = vmul.f32 %v1152_v58, %v2883_v46  ;;  %v1161_v57 = vpop.xlane.xlu2 %1160 }
 0x292   : > { %v1672_v22 = vadd.f32 %v3159_v36, %v1637_v41  ;;  %v1220_v63 = vmul.f32 %v1146_v56, %v2883_v46  ;;  %v1635_v50 = vmul.f32 %v3142_v18, %v1600_v24  ;;  %v1323_v19 = vsel %vm1322_vm13, %v2146_v3, %v1319_v23  ;;  %vm3288_vm14 = vmor %vm1390_vm11, %vm1391_vm12 }
 0x293   : > { %v3277_v27 = vadd.f32 1e-05, %v1224_v6  ;;  %v1598_v21 = vmul.f32 %v1323_v19, %v2917_v28  ;;  %v1388_v14 = vsub.f32 1.5, %v1387_v37  ;;  %v3280_v26 = vadd.f32 1e-05, %v1222_v40 }
 0x294   : > { %v1704_v42 = vmax.f32 %v1672_v22, 0.0  ;;  %v1670_v8 = vadd.f32 %v3159_v36, %v1635_v50  ;;  %v3293_v3 = vadd.f32 1e-05, %v1220_v63  ;;  %v1227_v35 = vmul.f32 %v1167_v15, %v2883_v46 }
 0x295   : > { %v3282_v51 = vpop.eup %2149  ;;  %2153 = vrsqrt.f32 %v3277_v27  ;;  %v1633_v28 = vmul.f32 %v3142_v18, %v1598_v21  ;;  %v1389_v45 = vmul.f32 %v2148_v52, %v1388_v14  ;;  %vm1370_vm15 = vweird.f32 %v3244_v20 }
 0x296   : > { %v3295_v56 = vpop.eup %2151  ;;  %1736 = vst.msk [vmem:[%s2426_s7 + $0x40] sm:$0xff] %vm808_vm1, %v1704_v42  ;;  %v1365_v5 = vmul.f32 %v3282_v51, %v3244_v20  ;;  %v1702_v58 = vmax.f32 %v1670_v8, 0.0  ;;  %2155 = vrsqrt.f32 %v3280_v26  ;;  %vm1350_vm0 = vweird.f32 %v3249_v32 }
 0x297   : > { %v1345_v17 = vmul.f32 %v3295_v56, %v3249_v32  ;;  %v1668_v44 = vadd.f32 %v3159_v36, %v1633_v28  ;;  %v1393_v30 = vsel %vm3288_vm14, %v2148_v52, %v1389_v45  ;;  %vm1420_vm2 = vweird.f32 %v3277_v27  ;;  %v1176_v23 = vpop.xlane.xlu1 %1175 }
 0x298   : > { %v1366_v59 = vmul.f32 %v3282_v51, %v1365_v5  ;;  %1734 = vst.msk [vmem:[%s2426_s7 + $0x30] sm:$0xff] %vm808_vm1, %v1702_v58  ;;  %v1605_v41 = vmul.f32 %v1393_v30, %v2951_v10  ;;  %2157 = vrsqrt.f32 %v3293_v3  ;;  %v3318_v24 = vadd.f32 1e-05, %v1227_v35 }
 0x299   : > { %v1346_v54 = vmul.f32 %v3295_v56, %v1345_v17  ;;  %v1700_v4 = vmax.f32 %v1668_v44, 0.0  ;;  %v1225_v52 = vmul.f32 %v1161_v57, %v2883_v46  ;;  %vm1371_vm3 = vweird.f32 %v3282_v51  ;;  %v3362_v57 = vpop.xlane.xlu0 %1163 }
 0x29a   : > { %v1367_v15 = vmul.f32 0.5, %v1366_v59  ;;  %v1640_v22 = vmul.f32 %v3142_v18, %v1605_v41  ;;  %vm1351_vm4 = vweird.f32 %v3295_v56  ;;  %vm1400_vm5 = vweird.f32 %v3280_v26  ;;  %vm1372_vm7 = vmor %vm1370_vm15, %vm1371_vm3 }
 0x29b   : > { %v3321_v6 = vpop.eup %2153  ;;  %v1347_v10 = vmul.f32 0.5, %v1346_v54  ;;  %1732 = vst.msk [vmem:[%s2426_s7 + $0x20] sm:$0xff] %vm808_vm1, %v1700_v4  ;;  %2159 = vrsqrt.f32 %v3318_v24  ;;  %v1223_v63 = vmul.f32 %v1155_v2, %v2883_v46  ;;  %v3336_v21 = vadd.f32 1e-05, %v1225_v52  ;;  %vm1352_vm9 = vmor %vm1350_vm0, %vm1351_vm4 }
 0x29c   : > { %v1368_v37 = vsub.f32 1.5, %v1367_v15  ;;  %v1415_v40 = vmul.f32 %v3321_v6, %v3277_v27  ;;  %v3333_v50 = vpop.eup %2155  ;;  %v1675_v19 = vadd.f32 %v3159_v36, %v1640_v22  ;;  %v1230_v14 = vmul.f32 %v1176_v23, %v2883_v46 }
 0x29d   : > { %v1348_v42 = vsub.f32 1.5, %v1347_v10  ;;  %vm1421_vm6 = vweird.f32 %v3321_v6  ;;  %v1395_v28 = vmul.f32 %v3333_v50, %v3280_v26  ;;  %vm1450_vm8 = vweird.f32 %v3318_v24 }
 0x29e   : > { %v1369_v8 = vmul.f32 %v3282_v51, %v1368_v37  ;;  %v1416_v31 = vmul.f32 %v3321_v6, %v1415_v40  ;;  %v3344_v45 = vpop.eup %2157  ;;  %v1707_v5 = vmax.f32 %v1675_v19, 0.0  ;;  %2161 = vrsqrt.f32 %v3336_v21  ;;  %vm3378_vm12 = vmor %vm1420_vm2, %vm1421_vm6 }
 0x29f   : > { %v1349_v35 = vmul.f32 %v3295_v56, %v1348_v42  ;;  %v1396_v17 = vmul.f32 %v3333_v50, %v1395_v28  ;;  %v1375_v20 = vmul.f32 %v3344_v45, %v3293_v3  ;;  %vm1380_vm10 = vweird.f32 %v3293_v3 }
 0x2a0   : > { %v1373_v2 = vsel %vm1372_vm7, %v3282_v51, %v1369_v8  ;;  %v1417_v58 = vmul.f32 0.5, %v1416_v31  ;;  %1739 = vst.msk [vmem:[%s2426_s7 + $0x58] sm:$0xff] %vm808_vm1, %v1707_v5  ;;  %vm1401_vm11 = vweird.f32 %v3333_v50  ;;  %v3369_v32 = vadd.f32 1e-05, %v1223_v63 }
 0x2a1   : > { %v1603_v44 = vmul.f32 %v1373_v2, %v2954_v11  ;;  %v1353_v51 = vsel %vm1352_vm9, %v3295_v56, %v1349_v35  ;;  %v2160_v30 = vpop.eup %2159  ;;  %v1397_v54 = vmul.f32 0.5, %v1396_v17  ;;  %v1376_v4 = vmul.f32 %v3344_v45, %v1375_v20  ;;  %vm1402_vm15 = vmor %vm1400_vm5, %vm1401_vm11  ;;  %v1173_v3 = vpop.xlane.xlu0 %1172 }
 0x2a2   : > { %v1601_v59 = vmul.f32 %v1353_v51, %v2938_v47  ;;  %v1418_v41 = vsub.f32 1.5, %v1417_v58  ;;  %vm1381_vm13 = vweird.f32 %v3344_v45  ;;  %v1445_v56 = vmul.f32 %v2160_v30, %v3318_v24  ;;  %v1170_v47 = vpop.xlane.xlu2 %1169 }
 0x2a3   : > { %v1638_v15 = vmul.f32 %v3142_v18, %v1603_v44  ;;  %2163 = vrsqrt.f32 %v3369_v32  ;;  %v1398_v22 = vsub.f32 1.5, %v1397_v54  ;;  %v1377_v10 = vmul.f32 0.5, %v1376_v4  ;;  %vm1382_vm2 = vmor %vm1380_vm10, %vm1381_vm13  ;;  %v1185_v44 = vpop.xlane.xlu1 %1184 }
 0x2a4   : > { %v1636_v52 = vmul.f32 %v3142_v18, %v1601_v59  ;;  %v1419_v23 = vmul.f32 %v3321_v6, %v1418_v41  ;;  %v3387_v37 = vpop.eup %2161  ;;  %v1446_v40 = vmul.f32 %v2160_v30, %v1445_v56  ;;  %vm1451_vm14 = vweird.f32 %v2160_v30 }
 0x2a5   : > { %v1673_v27 = vadd.f32 %v3159_v36, %v1638_v15  ;;  %v3390_v63 = vadd.f32 1e-05, %v1230_v14  ;;  %v1399_v8 = vmul.f32 %v3333_v50, %v1398_v22  ;;  %v1378_v31 = vsub.f32 1.5, %v1377_v10  ;;  %vm3424_vm3 = vmor %vm1450_vm8, %vm1451_vm14 }
 0x2a6   : > { %v1671_v19 = vadd.f32 %v3159_v36, %v1636_v52  ;;  %v1423_v42 = vsel %vm3378_vm12, %v3321_v6, %v1419_v23  ;;  %v1447_v14 = vmul.f32 0.5, %v1446_v40  ;;  %v1425_v35 = vmul.f32 %v3387_v37, %v3336_v21 }
 0x2a7   : > { %v1705_v28 = vmax.f32 %v1673_v27, 0.0  ;;  %v1608_v5 = vmul.f32 %v1423_v42, %v2972_v0  ;;  %v1403_v58 = vsel %vm1402_vm15, %v3333_v50, %v1399_v8  ;;  %v1379_v6 = vmul.f32 %v3344_v45, %v1378_v31 }
 0x2a8   : > { %v1703_v2 = vmax.f32 %v1671_v19, 0.0  ;;  %vm1430_vm0 = vweird.f32 %v3336_v21  ;;  %v1606_v26 = vmul.f32 %v1403_v58, %v2975_v33  ;;  %v1448_v20 = vsub.f32 1.5, %v1447_v14 }
 0x2a9   : > { %v3407_v17 = vpop.eup %2163  ;;  %1737 = vst.msk [vmem:[%s2426_s7 + $0x48] sm:$0xff] %vm808_vm1, %v1705_v28  ;;  %v1643_v0 = vmul.f32 %v3142_v18, %v1608_v5  ;;  %v1426_v50 = vmul.f32 %v3387_v37, %v1425_v35  ;;  %v1383_v51 = vsel %vm1382_vm2, %v3344_v45, %v1379_v6  ;;  %vm1431_vm4 = vweird.f32 %v3387_v37 }
 0x2aa   : > { %1735 = vst.msk [vmem:[%s2426_s7 + $0x38] sm:$0xff] %vm808_vm1, %v1703_v2  ;;  %v1405_v33 = vmul.f32 %v3407_v17, %v3369_v32  ;;  %2165 = vrsqrt.f32 %v3390_v63  ;;  %v1641_v54 = vmul.f32 %v3142_v18, %v1606_v26  ;;  %v1604_v45 = vmul.f32 %v1383_v51, %v2959_v55  ;;  %v1179_v10 = vpop.xlane.xlu2 %1178  ;;  %vm1432_vm6 = vmor %vm1430_vm0, %vm1431_vm4 }
 0x2ab   : > { %v1678_v41 = vadd.f32 %v3159_v36, %v1643_v0  ;;  %v1449_v24 = vmul.f32 %v2160_v30, %v1448_v20  ;;  %v1427_v4 = vmul.f32 0.5, %v1426_v50  ;;  %vm1411_vm5 = vweird.f32 %v3407_v17  ;;  %v1194_v20 = vpop.xlane.xlu1 %1193 }
 0x2ac   : > { %v1406_v15 = vmul.f32 %v3407_v17, %v1405_v33  ;;  %v1228_v11 = vmul.f32 %v1170_v47, %v2883_v46  ;;  %v1676_v52 = vadd.f32 %v3159_v36, %v1641_v54  ;;  %v1639_v23 = vmul.f32 %v3142_v18, %v1604_v45 }
 0x2ad   : > { %v1710_v56 = vmax.f32 %v1678_v41, 0.0  ;;  %v1453_v22 = vsel %vm3424_vm3, %v2160_v30, %v1449_v24  ;;  %v1428_v27 = vsub.f32 1.5, %v1427_v4  ;;  %v1226_v8 = vmul.f32 %v3362_v57, %v2883_v46 }
 0x2ae   : > { %v1611_v55 = vmul.f32 %v1453_v22, %v2993_v7  ;;  %v1407_v40 = vmul.f32 0.5, %v1406_v15  ;;  %v3443_v19 = vadd.f32 1e-05, %v1228_v11  ;;  %v1708_v42 = vmax.f32 %v1676_v52, 0.0 }
 0x2af   : > { %1742 = vst.msk [vmem:[%s2426_s7 + $0x70] sm:$0xff] %vm808_vm1, %v1710_v56  ;;  %v1674_v47 = vadd.f32 %v3159_v36, %v1639_v23  ;;  %v1233_v31 = vmul.f32 %v1185_v44, %v2883_v46  ;;  %v1429_v7 = vmul.f32 %v3387_v37, %v1428_v27  ;;  %vm1410_vm7 = vweird.f32 %v3369_v32  ;;  %v1182_v44 = vpop.xlane.xlu0 %1181 }
 0x2b0   : > { %v2166_v30 = vpop.eup %2165  ;;  %v1646_v28 = vmul.f32 %v3142_v18, %v1611_v55  ;;  %v1408_v5 = vsub.f32 1.5, %v1407_v40  ;;  %2167 = vrsqrt.f32 %v3443_v19  ;;  %1740 = vst.msk [vmem:[%s2426_s7 + $0x60] sm:$0xff] %vm808_vm1, %v1708_v42  ;;  %vm1480_vm8 = vweird.f32 %v3390_v63  ;;  %vm1412_vm9 = vmor %vm1410_vm7, %vm1411_vm5 }
 0x2b1   : > { %v1706_v14 = vmax.f32 %v1674_v47, 0.0  ;;  %v1475_v57 = vmul.f32 %v2166_v30, %v3390_v63  ;;  %v1433_v2 = vsel %vm1432_vm6, %v3387_v37, %v1429_v7  ;;  %v3466_v6 = vadd.f32 1e-05, %v1226_v8 }
 0x2b2   : > { %v1681_v35 = vadd.f32 %v3159_v36, %v1646_v28  ;;  %v1409_v58 = vmul.f32 %v3407_v17, %v1408_v5  ;;  %v1609_v0 = vmul.f32 %v1433_v2, %v2996_v61  ;;  %v3473_v32 = vadd.f32 1e-05, %v1233_v31  ;;  %v1188_v15 = vpop.xlane.xlu2 %1187 }
 0x2b3   : > { %1738 = vst.msk [vmem:[%s2426_s7 + $0x50] sm:$0xff] %vm808_vm1, %v1706_v14  ;;  %v1476_v21 = vmul.f32 %v2166_v30, %v1475_v57  ;;  %v1231_v26 = vmul.f32 %v1179_v10, %v2883_v46  ;;  %vm1481_vm10 = vweird.f32 %v2166_v30  ;;  %2169 = vrsqrt.f32 %v3466_v6 }
 0x2b4   : > { %v1713_v50 = vmax.f32 %v1681_v35, 0.0  ;;  %v1413_v37 = vsel %vm1412_vm9, %v3407_v17, %v1409_v58  ;;  %v1644_v51 = vmul.f32 %v3142_v18, %v1609_v0  ;;  %2171 = vrsqrt.f32 %v3473_v32  ;;  %vm3493_vm11 = vmor %vm1480_vm8, %vm1481_vm10 }
 0x2b5   : > { %v1607_v61 = vmul.f32 %v1413_v37, %v2980_v38  ;;  %v1477_v59 = vmul.f32 0.5, %v1476_v21  ;;  %v3483_v41 = vadd.f32 1e-05, %v1231_v26  ;;  %v1229_v54 = vmul.f32 %v1173_v3, %v2883_v46 }
 0x2b6   : > { %v2168_v33 = vpop.eup %2167  ;;  %1745 = vst.msk [vmem:[%s2426_s7 + $0x88] sm:$0xff] %vm808_vm1, %v1713_v50  ;;  %v1236_v17 = vmul.f32 %v1194_v20, %v2883_v46  ;;  %v1679_v45 = vadd.f32 %v3159_v36, %v1644_v51  ;;  %vm1460_vm12 = vweird.f32 %v3443_v19  ;;  %v1234_v55 = vmul.f32 %v1188_v15, %v2883_v46 }
 0x2b7   : > { %v1642_v24 = vmul.f32 %v3142_v18, %v1607_v61  ;;  %v1478_v4 = vsub.f32 1.5, %v1477_v59  ;;  %v1455_v38 = vmul.f32 %v2168_v33, %v3443_v19  ;;  %2173 = vrsqrt.f32 %v3483_v41  ;;  %v3534_v35 = vpop.xlane.xlu0 %1190 }
 0x2b8   : > { %v3498_v3 = vadd.f32 1e-05, %v1229_v54  ;;  %v1711_v56 = vmax.f32 %v1679_v45, 0.0  ;;  %v3505_v63 = vadd.f32 1e-05, %v1236_v17  ;;  %vm1440_vm13 = vweird.f32 %v3466_v6 }
 0x2b9   : > { %v1677_v52 = vadd.f32 %v3159_v36, %v1642_v24  ;;  %v1479_v23 = vmul.f32 %v2166_v30, %v1478_v4  ;;  %v1456_v22 = vmul.f32 %v2168_v33, %v1455_v38  ;;  %v3501_v10 = vpop.eup %2169  ;;  %vm1461_vm14 = vweird.f32 %v2168_v33 }
 0x2ba   : > { %2175 = vrsqrt.f32 %v3498_v3  ;;  %v3508_v27 = vpop.eup %2171  ;;  %1743 = vst.msk [vmem:[%s2426_s7 + $0x78] sm:$0xff] %vm808_vm1, %v1711_v56  ;;  %v1435_v8 = vmul.f32 %v3501_v10, %v3466_v6  ;;  %vm1510_vm15 = vweird.f32 %v3473_v32  ;;  %vm1441_vm0 = vweird.f32 %v3501_v10  ;;  %vm1462_vm4 = vmor %vm1460_vm12, %vm1461_vm14 }
 0x2bb   : > { %v1709_v40 = vmax.f32 %v1677_v52, 0.0  ;;  %v1483_v42 = vsel %vm3493_vm11, %v2166_v30, %v1479_v23  ;;  %v1457_v47 = vmul.f32 0.5, %v1456_v22  ;;  %v1505_v28 = vmul.f32 %v3508_v27, %v3473_v32  ;;  %vm1442_vm9 = vmor %vm1440_vm13, %vm1441_vm0  ;;  %v1197_v23 = vpop.xlane.xlu2 %1196 }
 0x2bc   : > { %v1614_v31 = vmul.f32 %v1483_v42, %v3014_v16  ;;  %v1436_v5 = vmul.f32 %v3501_v10, %v1435_v8  ;;  %vm1490_vm2 = vweird.f32 %v3483_v41  ;;  %2177 = vrsqrt.f32 %v3505_v63 }
 0x2bd   : > { %1741 = vst.msk [vmem:[%s2426_s7 + $0x68] sm:$0xff] %vm808_vm1, %v1709_v40  ;;  %v1458_v7 = vsub.f32 1.5, %v1457_v47  ;;  %v3527_v30 = vpop.eup %2173  ;;  %v1506_v14 = vmul.f32 %v3508_v27, %v1505_v28  ;;  %vm1511_vm3 = vweird.f32 %v3508_v27  ;;  %v3532_v57 = vadd.f32 1e-05, %v1234_v55 }
 0x2be   : > { %v1649_v16 = vmul.f32 %v3142_v18, %v1614_v31  ;;  %v1437_v58 = vmul.f32 0.5, %v1436_v5  ;;  %v1485_v0 = vmul.f32 %v3527_v30, %v3483_v41  ;;  %v1232_v21 = vmul.f32 %v1182_v44, %v2883_v46  ;;  %vm3560_vm8 = vmor %vm1510_vm15, %vm1511_vm3 }
 0x2bf   : > { %v1459_v2 = vmul.f32 %v2168_v33, %v1458_v7  ;;  %v1507_v50 = vmul.f32 0.5, %v1506_v14  ;;  %vm1540_vm5 = vweird.f32 %v3505_v63  ;;  %2179 = vrsqrt.f32 %v3532_v57  ;;  %v1200_v5 = vpop.xlane.xlu0 %1199 }
 0x2c0   : > { %v3539_v26 = vpop.eup %2175  ;;  %v1684_v20 = vadd.f32 %v3159_v36, %v1649_v16  ;;  %v1438_v51 = vsub.f32 1.5, %v1437_v58  ;;  %v1486_v61 = vmul.f32 %v3527_v30, %v1485_v0  ;;  %vm1470_vm6 = vweird.f32 %v3498_v3 }
 0x2c1   : > { %v1463_v37 = vsel %vm1462_vm4, %v2168_v33, %v1459_v2  ;;  %v1465_v44 = vmul.f32 %v3539_v26, %v3498_v3  ;;  %v1508_v19 = vsub.f32 1.5, %v1507_v50  ;;  %vm1491_vm7 = vweird.f32 %v3527_v30 }
 0x2c2   : > { %v1716_v59 = vmax.f32 %v1684_v20, 0.0  ;;  %v1612_v54 = vmul.f32 %v1463_v37, %v3017_v29  ;;  %v3553_v17 = vpop.eup %2177  ;;  %v1439_v45 = vmul.f32 %v3501_v10, %v1438_v51  ;;  %v1487_v24 = vmul.f32 0.5, %v1486_v61  ;;  %vm1492_vm11 = vmor %vm1490_vm2, %vm1491_vm7 }
 0x2c3   : > { %v1466_v4 = vmul.f32 %v3539_v26, %v1465_v44  ;;  %v3565_v38 = vadd.f32 1e-05, %v1232_v21  ;;  %v1509_v32 = vmul.f32 %v3508_v27, %v1508_v19  ;;  %vm1471_vm10 = vweird.f32 %v3539_v26 }
 0x2c4   : > { %1748 = vst.msk [vmem:[%s2426_s7 + $0xa0] sm:$0xff] %vm808_vm1, %v1716_v59  ;;  %v1647_v29 = vmul.f32 %v3142_v18, %v1612_v54  ;;  %v1535_v15 = vmul.f32 %v3553_v17, %v3505_v63  ;;  %v1443_v11 = vsel %vm1442_vm9, %v3501_v10, %v1439_v45  ;;  %v1488_v56 = vsub.f32 1.5, %v1487_v24  ;;  %vm1472_vm13 = vmor %vm1470_vm6, %vm1471_vm10 }
 0x2c5   : > { %v1467_v52 = vmul.f32 0.5, %v1466_v4  ;;  %2181 = vrsqrt.f32 %v3565_v38  ;;  %v2180_v22 = vpop.eup %2179  ;;  %v1610_v6 = vmul.f32 %v1443_v11, %v3001_v1  ;;  %v1513_v40 = vsel %vm3560_vm8, %v3508_v27, %v1509_v32  ;;  %v1203_v27 = vpop.xlane.xlu1 %1202 }
 0x2c6   : > { %v1682_v55 = vadd.f32 %v3159_v36, %v1647_v29  ;;  %v1536_v42 = vmul.f32 %v3553_v17, %v1535_v15  ;;  %v1617_v47 = vmul.f32 %v1513_v40, %v3035_v25  ;;  %v1489_v10 = vmul.f32 %v3527_v30, %v1488_v56  ;;  %v1206_v32 = vpop.xlane.xlu2 %1205 }
 0x2c7   : > { %v1468_v8 = vsub.f32 1.5, %v1467_v52  ;;  %v1515_v31 = vmul.f32 %v2180_v22, %v3532_v57  ;;  %v1645_v7 = vmul.f32 %v3142_v18, %v1610_v6  ;;  %vm1541_vm12 = vweird.f32 %v3553_v17  ;;  %v1209_v40 = vpop.xlane.xlu0 %1208 }
 0x2c8   : > { %v1714_v28 = vmax.f32 %v1682_v55, 0.0  ;;  %v1537_v1 = vmul.f32 0.5, %v1536_v42  ;;  %v1652_v25 = vmul.f32 %v3142_v18, %v1617_v47  ;;  %v1493_v16 = vsel %vm1492_vm11, %v3527_v30, %v1489_v10  ;;  %vm3613_vm15 = vmor %vm1540_vm5, %vm1541_vm12 }
 0x2c9   : > { %v1469_v14 = vmul.f32 %v3539_v26, %v1468_v8  ;;  %v1516_v2 = vmul.f32 %v2180_v22, %v1515_v31  ;;  %v1680_v58 = vadd.f32 %v3159_v36, %v1645_v7  ;;  %v1615_v0 = vmul.f32 %v1493_v16, %v3038_v48 }
 0x2ca   : > { %1746 = vst.msk [vmem:[%s2426_s7 + $0x90] sm:$0xff] %vm808_vm1, %v1714_v28  ;;  %v1538_v41 = vsub.f32 1.5, %v1537_v1  ;;  %vm1520_vm14 = vweird.f32 %v3532_v57  ;;  %v1687_v30 = vadd.f32 %v3159_v36, %v1652_v25  ;;  %v1239_v50 = vmul.f32 %v1203_v27, %v2883_v46 }
 0x2cb   : > { %v2182_v21 = vpop.eup %2181  ;;  %v1473_v20 = vsel %vm1472_vm13, %v3539_v26, %v1469_v14  ;;  %v1517_v3 = vmul.f32 0.5, %v1516_v2  ;;  %v1712_v37 = vmax.f32 %v1680_v58, 0.0  ;;  %v1650_v51 = vmul.f32 %v3142_v18, %v1615_v0 }
 0x2cc   : > { %v1613_v61 = vmul.f32 %v1473_v20, %v3022_v62  ;;  %v1539_v44 = vmul.f32 %v3553_v17, %v1538_v41  ;;  %v1719_v26 = vmax.f32 %v1687_v30, 0.0  ;;  %vm1521_vm0 = vweird.f32 %v2180_v22 }
 0x2cd   : > { %v1518_v59 = vsub.f32 1.5, %v1517_v3  ;;  %v1495_v63 = vmul.f32 %v2182_v21, %v3565_v38  ;;  %1744 = vst.msk [vmem:[%s2426_s7 + $0x80] sm:$0xff] %vm808_vm1, %v1712_v37  ;;  %v1685_v54 = vadd.f32 %v3159_v36, %v1650_v51  ;;  %v3629_v33 = vadd.f32 1e-05, %v1239_v50  ;;  %vm1522_vm2 = vmor %vm1520_vm14, %vm1521_vm0 }
 0x2ce   : > { %v1648_v19 = vmul.f32 %v3142_v18, %v1613_v61  ;;  %v1543_v45 = vsel %vm3613_vm15, %v3553_v17, %v1539_v44  ;;  %1751 = vst.msk [vmem:[%s2426_s7 + $0xb8] sm:$0xff] %vm808_vm1, %v1719_v26  ;;  %v1237_v29 = vmul.f32 %v1197_v23, %v2883_v46  ;;  %v1235_v6 = vmul.f32 %v3534_v35, %v2883_v46 }
 0x2cf   : > { %v1620_v62 = vmul.f32 %v1543_v45, %v3056_v34  ;;  %v1519_v24 = vmul.f32 %v2180_v22, %v1518_v59  ;;  %v1496_v4 = vmul.f32 %v2182_v21, %v1495_v63  ;;  %v1717_v15 = vmax.f32 %v1685_v54, 0.0 }
 0x2d0   : > { %v1683_v11 = vadd.f32 %v3159_v36, %v1648_v19  ;;  %2183 = vrsqrt.f32 %v3629_v33  ;;  %v3641_v34 = vadd.f32 1e-05, %v1237_v29  ;;  %v1240_v57 = vmul.f32 %v1206_v32, %v2883_v46 }
 0x2d1   : > { %v1655_v17 = vmul.f32 %v3142_v18, %v1620_v62  ;;  %v1523_v56 = vsel %vm1522_vm2, %v2180_v22, %v1519_v24  ;;  %v1497_v52 = vmul.f32 0.5, %v1496_v4  ;;  %1749 = vst.msk [vmem:[%s2426_s7 + $0xa8] sm:$0xff] %vm808_vm1, %v1717_v15  ;;  %vm1501_vm3 = vweird.f32 %v2182_v21 }
 0x2d2   : > { %v1715_v23 = vmax.f32 %v1683_v11, 0.0  ;;  %v1618_v55 = vmul.f32 %v1523_v56, %v3059_v12  ;;  %2185 = vrsqrt.f32 %v3641_v34  ;;  %v3654_v10 = vadd.f32 1e-05, %v1235_v6 }
 0x2d3   : > { %v1690_v42 = vadd.f32 %v3159_v36, %v1655_v17  ;;  %v1498_v47 = vsub.f32 1.5, %v1497_v52  ;;  %v3656_v12 = vadd.f32 1e-05, %v1240_v57  ;;  %v1238_v35 = vmul.f32 %v1200_v5, %v2883_v46 }
 0x2d4   : > { %1747 = vst.msk [vmem:[%s2426_s7 + $0x98] sm:$0xff] %vm808_vm1, %v1715_v23  ;;  %v1653_v22 = vmul.f32 %v3142_v18, %v1618_v55  ;;  %vm1500_vm4 = vweird.f32 %v3565_v38  ;;  %v1241_v28 = vmul.f32 %v1209_v40, %v2883_v46  ;;  %2187 = vrsqrt.f32 %v3654_v10 }
 0x2d5   : > { %v1722_v8 = vmax.f32 %v1690_v42, 0.0  ;;  %v1499_v31 = vmul.f32 %v2182_v21, %v1498_v47  ;;  %vm1502_vm5 = vmor %vm1500_vm4, %vm1501_vm3  ;;  %2189 = vrsqrt.f32 %v3656_v12  ;;  %v3668_v38 = vadd.f32 1e-05, %v1238_v35 }
 0x2d6   : > { %v2184_v7 = vpop.eup %2183  ;;  %v1688_v1 = vadd.f32 %v3159_v36, %v1653_v22  ;;  %v3670_v14 = vadd.f32 1e-05, %v1241_v28  ;;  %vm1570_vm6 = vweird.f32 %v3629_v33  ;;  %vm1550_vm9 = vweird.f32 %v3641_v34 }
 0x2d7   : > { %1754 = vst.msk [vmem:[%s2426_s7 + $0xd0] sm:$0xff] %vm808_vm1, %v1722_v8  ;;  %v1503_v27 = vsel %vm1502_vm5, %v2182_v21, %v1499_v31  ;;  %v1565_v25 = vmul.f32 %v2184_v7, %v3629_v33  ;;  %2191 = vrsqrt.f32 %v3668_v38  ;;  %vm1571_vm7 = vweird.f32 %v2184_v7  ;;  %v2196_v8 = vld [vmem:[%s3756_s4] ss:$0 sm:$0xff] }
 0x2d8   : > { %v1720_v5 = vmax.f32 %v1688_v1, 0.0  ;;  %v1616_v16 = vmul.f32 %v1503_v27, %v3043_v49  ;;  %v2186_v46 = vpop.eup %2185  ;;  %2193 = vrsqrt.f32 %v3670_v14  ;;  %vm3681_vm8 = vmor %vm1570_vm6, %vm1571_vm7  ;;  %vm1580_vm11 = vweird.f32 %v3656_v12 }
 0x2d9   : > { %v1566_v2 = vmul.f32 %v2184_v7, %v1565_v25  ;;  %v1545_v0 = vmul.f32 %v2186_v46, %v3641_v34  ;;  %vm1551_vm10 = vweird.f32 %v2186_v46  ;;  %vm1530_vm15 = vweird.f32 %v3654_v10 }
 0x2da   : > { %1752 = vst.msk [vmem:[%s2426_s7 + $0xc0] sm:$0xff] %vm808_vm1, %v1720_v5  ;;  %v1651_v58 = vmul.f32 %v3142_v18, %v1616_v16  ;;  %v2188_v49 = vpop.eup %2187  ;;  %vm1552_vm12 = vmor %vm1550_vm9, %vm1551_vm10  ;;  %vm1560_vm5 = vweird.f32 %v3668_v38  ;;  %vm1590_vm7 = vweird.f32 %v3670_v14 }
 0x2db   : > { %v1567_v41 = vmul.f32 0.5, %v1566_v2  ;;  %v1546_v30 = vmul.f32 %v2186_v46, %v1545_v0  ;;  %v2190_v20 = vpop.eup %2189  ;;  %v1525_v3 = vmul.f32 %v2188_v49, %v3654_v10  ;;  %vm1531_vm13 = vweird.f32 %v2188_v49 }
 0x2dc   : > { %v1686_v21 = vadd.f32 %v3159_v36, %v1651_v58  ;;  %v1575_v61 = vmul.f32 %v2190_v20, %v3656_v12  ;;  %vm1581_vm14 = vweird.f32 %v2190_v20  ;;  %vm1532_vm0 = vmor %vm1530_vm15, %vm1531_vm13 }
 0x2dd   : > { %v1568_v48 = vsub.f32 1.5, %v1567_v41  ;;  %v1547_v51 = vmul.f32 0.5, %v1546_v30  ;;  %v1526_v26 = vmul.f32 %v2188_v49, %v1525_v3  ;;  %v2192_v59 = vpop.eup %2191  ;;  %vm1582_vm3 = vmor %vm1580_vm11, %vm1581_vm14 }
 0x2de   : > { %v1718_v50 = vmax.f32 %v1686_v21, 0.0  ;;  %v1576_v54 = vmul.f32 %v2190_v20, %v1575_v61  ;;  %v2194_v19 = vpop.eup %2193  ;;  %v1555_v62 = vmul.f32 %v2192_v59, %v3668_v38  ;;  %vm1561_vm2 = vweird.f32 %v2192_v59 }
 0x2df   : > { %v1569_v44 = vmul.f32 %v2184_v7, %v1568_v48  ;;  %v1548_v63 = vsub.f32 1.5, %v1547_v51  ;;  %v1527_v33 = vmul.f32 0.5, %v1526_v26  ;;  %v1585_v32 = vmul.f32 %v2194_v19, %v3670_v14  ;;  %vm1562_vm6 = vmor %vm1560_vm5, %vm1561_vm2 }
 0x2e0   : > { %1750 = vst.msk [vmem:[%s2426_s7 + $0xb0] sm:$0xff] %vm808_vm1, %v1718_v50  ;;  %v1577_v29 = vmul.f32 0.5, %v1576_v54  ;;  %v1556_v11 = vmul.f32 %v2192_v59, %v1555_v62  ;;  %vm1591_vm4 = vweird.f32 %v2194_v19 }
 0x2e1   : > { %v1573_v45 = vsel %vm3681_vm8, %v2184_v7, %v1569_v44  ;;  %v1549_v4 = vmul.f32 %v2186_v46, %v1548_v63  ;;  %v1528_v15 = vsub.f32 1.5, %v1527_v33  ;;  %v1586_v34 = vmul.f32 %v2194_v19, %v1585_v32  ;;  %vm1592_vm8 = vmor %vm1590_vm7, %vm1591_vm4 }
 0x2e2   : > { %v1623_v24 = vmul.f32 %v1573_v45, %v3077_v43  ;;  %v1578_v52 = vsub.f32 1.5, %v1577_v29  ;;  %v1557_v43 = vmul.f32 0.5, %v1556_v11 }
 0x2e3   : > { %v1553_v56 = vsel %vm1552_vm12, %v2186_v46, %v1549_v4  ;;  %v1529_v55 = vmul.f32 %v2188_v49, %v1528_v15  ;;  %v1587_v40 = vmul.f32 0.5, %v1586_v34 }
 0x2e4   : > { %v1658_v17 = vmul.f32 %v3142_v18, %v1623_v24  ;;  %v1621_v23 = vmul.f32 %v1553_v56, %v3080_v53  ;;  %v1579_v57 = vmul.f32 %v2190_v20, %v1578_v52  ;;  %v2195_v18 = vld [vmem:[%s3755_s3] ss:$0 sm:$0xff]  ;;  %v1558_v53 = vsub.f32 1.5, %v1557_v43 }
 0x2e5   : > { %v1533_v47 = vsel %vm1532_vm0, %v2188_v49, %v1529_v55  ;;  %v1588_v35 = vsub.f32 1.5, %v1587_v40 }
 0x2e6   : > { %v1693_v6 = vadd.f32 %v3159_v36, %v1658_v17  ;;  %v1656_v42 = vmul.f32 %v2195_v18, %v1621_v23  ;;  %v1619_v36 = vmul.f32 %v1533_v47, %v3064_v13  ;;  %v1583_v10 = vsel %vm1582_vm3, %v2190_v20, %v1579_v57 }
 0x2e7   : > { %v1624_v28 = vmul.f32 %v1583_v10, %v3097_v60  ;;  %v1559_v7 = vmul.f32 %v2192_v59, %v1558_v53  ;;  %v1589_v1 = vmul.f32 %v2194_v19, %v1588_v35 }
 0x2e8   : > { %v1725_v22 = vmax.f32 %v1693_v6, 0.0  ;;  %v1691_v31 = vadd.f32 %v2196_v8, %v1656_v42  ;;  %v1654_v12 = vmul.f32 %v2195_v18, %v1619_v36 }
 0x2e9   : > { %v1659_v27 = vmul.f32 %v2195_v18, %v1624_v28  ;;  %v1563_v25 = vsel %vm1562_vm6, %v2192_v59, %v1559_v7  ;;  %v1593_v16 = vsel %vm1592_vm8, %v2194_v19, %v1589_v1 }
 0x2ea   : > { %1757 = vst.msk [vmem:[%s2426_s7 + $0xe8] sm:$0xff] %vm808_vm1, %v1725_v22  ;;  %v1723_v13 = vmax.f32 %v1691_v31, 0.0  ;;  %v1689_v5 = vadd.f32 %v2196_v8, %v1654_v12  ;;  %v1622_v60 = vmul.f32 %v1563_v25, %v3085_v39  ;;  %v1625_v46 = vmul.f32 %v1593_v16, %v3100_v9 }
 0x2eb   : > { %v1694_v38 = vadd.f32 %v2196_v8, %v1659_v27 }
 0x2ec   : > { %1755 = vst.msk [vmem:[%s2426_s7 + $0xd8] sm:$0xff] %vm808_vm1, %v1723_v13  ;;  %v1721_v2 = vmax.f32 %v1689_v5, 0.0  ;;  %v1657_v58 = vmul.f32 %v2195_v18, %v1622_v60  ;;  %v1660_v0 = vmul.f32 %v2195_v18, %v1625_v46 }
 0x2ed   : > { %v1726_v14 = vmax.f32 %v1694_v38, 0.0 }
 0x2ee   : > { %1753 = vst.msk [vmem:[%s2426_s7 + $0xc8] sm:$0xff] %vm808_vm1, %v1721_v2  ;;  %v1692_v41 = vadd.f32 %v2196_v8, %v1657_v58  ;;  %v1695_v49 = vadd.f32 %v2196_v8, %v1660_v0 }
 0x2ef   : > { %1758 = vst.msk [vmem:[%s2426_s7 + $0xf0] sm:$0xff] %vm808_vm1, %v1726_v14 }
 0x2f0   : > { %v1724_v21 = vmax.f32 %v1692_v41, 0.0  ;;  %v1727_v30 = vmax.f32 %v1695_v49, 0.0 }
 0x2f2   : > { %1756 = vst.msk [vmem:[%s2426_s7 + $0xe0] sm:$0xff] %vm808_vm1, %v1724_v21 }
 0x2f3   : > { %1759 = vst.msk [vmem:[%s2426_s7 + $0xf8] sm:$0xff] %vm808_vm1, %v1727_v30 }
 0x2f4 PF: > { %s18_s25 = sadd.s32 1, %s2293_s25   ;;  %s3784_s21 = sld [smem:[#allocation5_spill]] }
 0x2f5   : > { %p15_p4 = scmp.ge.s32.totalorder %s18_s25, 6   ;;  %s3785_s23 = sld [smem:[#allocation6_spill]] }
 0x2f6   : > { %s3786_s28 = sld [smem:[#allocation7_spill]]  ;;  %s3787_s18 = smov %s2269_s19 }
 0x2f7   : > { %s3788_s19 = smov %s2273_s20  ;;  %s3789_s20 = smov %s2397_s13 }
 0x2f8   : > { %s3790_s22 = smov %s2289_s24  ;;  %17 = sbr.rel (!%p15_p4) target bundleno = 5 (0x5), region = 91 }
 0x2fc   : > { %s3791_s24 = smov %s3786_s28 }
 0x2fd   :  { %1782 = vsyncpa [#allocation3], 1 }
 0x2fe   :  { %1784 = vsyncpa [#allocation3 + $0x1], 1 }

// kernel: gnn_forward.3
= control target key start
LH: loop header
LB: loop body
LE: loop exit
PB: predicated region body
PF: predicated region fallthrough
CT: control target
= control target key end

     0   :  { %s4444_s0 = inlined_call_operand.hbm [shape: bf16[512,512], index: 0, kind: input, shape index: {}]   ;;  %s4445_s1 = inlined_call_operand.vmem [shape: f32[512,32], index: 1, kind: input, shape index: {}, may-alias: {1,2}]   ;;  %s4446_s2 = inlined_call_operand.vmem [shape: f32[512,32], index: 2, kind: input, shape index: {}, may-alias: {1,2}]   ;;  %s4447_s3 = inlined_call_operand.vmem [shape: f32[32,32], index: 3, kind: input, shape index: {}]   ;;  %s4448_s4 = inlined_call_operand.vmem [shape: f32[1,32], index: 4, kind: input, shape index: {}]   ;;  %s4449_s5 = inlined_call_operand.vmem [shape: f32[1,32], index: 5, kind: input, shape index: {}]   ;;  %s4450_s6 = inlined_call_operand.vmem [shape: f32[1,32], index: 6, kind: input, shape index: {}]   ;;  %s4451_s7 = inlined_call_operand.vmem [shape: f32[32,128], index: 7, kind: input, shape index: {}]   ;;  %s4452_s8 = inlined_call_operand.vmem [shape: f32[1,128], index: 8, kind: input, shape index: {}]   ;;  %s4453_s9 = inlined_call_operand.vmem [shape: f32[512,128], index: 9, kind: output, shape index: {}]  }
   0x1   :  { %4460 = sst [smem:[#allocation9_spill]] %s4449_s5 }
   0x2   :  { %4461 = sst [smem:[#allocation10_spill]] %s4450_s6 }
   0x3   :  { %4462 = sst [smem:[#allocation11_spill]] %s4451_s7 }
   0x4   :  { %4463 = sst [smem:[#allocation12_spill]] %s4452_s8 }
   0x5   :  { %14 = vsyncpa [#allocation4], 0 }
   0x6   :  { %16 = vsyncpa [#allocation4 + $0x1], 0  ;;  %s3029_s30 = smov 0   ;;  %s3031_s10 = smov 0  }
   0x7   :  { %s3033_s11 = smov 0   ;;  %s3035_s12 = smov 0  }
   0x8   :  { %s3037_s13 = smov 0   ;;  %s3039_s14 = smov 0  }
   0x9   :  { %s3041_s15 = smov 0   ;;  %s3043_s16 = smov 0  }
   0xa LB: > { %4464 = sst [smem:[#allocation6_spill]] %s2964_s14  ;;  %s2458_s17 = sadd.s32 4294967295, %s2972_s16   ;;  %s2972_s16 = sphi %s3043_s16, %s22_s16   ;;  %s2968_s15 = sphi %s3041_s15, %s4514_s15   ;;  %s2964_s14 = sphi %s3039_s14, %s4508_s14   ;;  %s2960_s13 = sphi %s3037_s13, %s4513_s13   ;;  %s2956_s12 = sphi %s3035_s12, %s4507_s12   ;;  %s2952_s11 = sphi %s3033_s11, %s4512_s11   ;;  %s2948_s10 = sphi %s3031_s10, %s4511_s10   ;;  %s2944_s30 = sphi %s3029_s30, %s4510_s30  }
   0xb   : > { %s31_s18 = sadd.s32 1, %s2964_s14  ;;  %s34_s19 = sadd.s32 1, %s2968_s15 }
   0xc   : > { %p32_p0 = scmp.ge.s32.totalorder %s31_s18, 2  ;;  %s43_s20 = sadd.s32 1, %s2952_s11 }
   0xd   : > { %p50_p1 = scmp.ne.s32.totalorder %s2952_s11, %s2948_s10  ;;  %p51_p2 = scmp.eq.s32.totalorder %s2972_s16, 0 }
   0xe   : > { %s4516_s18 = smov (%p32_p0, %s31_s18), 0  ;;  %s4518_s19 = smov (!%p32_p0, %s34_s19), %s2968_s15 }
   0xf   : > { %4465 = sst [smem:[#allocation7_spill]] %s4516_s18  ;;  %s39_s21 = ssub.s32 %s2964_s14, %s4516_s18 }
  0x10   : > { %p36_p3 = scmp.ge.s32.totalorder %s4518_s19, 2  ;;  %p56_p4 = scmp.ne.s32.totalorder %s2948_s10, %s2944_s30 }
  0x11   : > { %p3080_p5 = por %p51_p2, %p50_p1  ;;  %p57_p6 = scmp.eq.s32.totalorder %s2458_s17, 0 }
  0x12   : > { %s4520_s19 = smov (%p36_p3, %s4518_s19), 0  ;;  %p2734_p8 = scmp.lt.s32.totalorder %s2972_s16, 4 }
  0x13   : > { %4467 = sst [smem:[#allocation8_spill]] %s4520_s19  ;;  %p3086_p7 = por %p57_p6, %p56_p4 }
  0x14   : > { %s38_s24 = ssub.s32 %s2968_s15, %s4520_s19  ;;  %s302_s26 = sand.u32 1, %s2952_s11  }
  0x15   : > { %s40_s25 = sor.u32 %s39_s21, %s38_s24  ;;  %s2462_s27 = sshll.u32 %s302_s26, 8 }
  0x16   : > { %p41_p9 = scmp.eq.s32.totalorder %s40_s25, 0  ;;  %s2464_s28 = sshll.u32 %s2964_s14, 1 }
  0x17   : > { %s2671_s30 = sshll.u32 %s2968_s15, 7  ;;  %s306_s18 = scalar_lea.vmem [#allocation3], %s2462_s27 }
  0x18   : > { %s3096_s29 = scalar_select %p41_p9, %s2952_s11, %s43_s20  }
  0x19   : > { %s312_s17 = sadd.s32 %s2671_s30, %s2464_s28  ;;  %s317_s8 = sshll.u32 %s306_s18, 4  ;;  %s318_s8 = int_to_ptr.vmem [resolvable:$true] %s317_s8 }
  0x1a   : > { %s2466_s6 = sshll.u32 %s312_s17, 2  ;;  %p2731_p10 = pnand %p2734_p8, %p3080_p5 }
  0x1b   : > { %s314_s19 = scalar_lea.hbm %s4444_s0, %s2466_s6  ;;  %s303_s24 = scalar_lea.sflag [#allocation4], %s302_s26 }
  0x1c   : > { %s315_s21 = sshll.u32 %s314_s19, 4  ;;  %s2974_s20 = smov 256   ;;  %s316_s21 = int_to_ptr.hbm [resolvable:$true] %s315_s21 }
  0x1d   : > { %s2975_s25 = smov 128   ;;  %s2976_s14 = smov 8  }
  0x1e   : > { %2733 = dma.hbm_to_vmem [thread:$0]  (!%p2731_p10), %s316_s21, 4096, %s318_s8, %s303_s24, %s2974_s20, %s2975_s25, %s2976_s14  }
  0x1f   : > { %p2467_p11 = scmp.ge.s32.totalorder %s2972_s16, 1  ;;  %p343_p12 = scmp.lt.s32.totalorder %s2972_s16, 5 }
  0x21   : > { %p344_p13 = pnand %p2467_p11, %p343_p12 }
  0x22   : > { %s349_s18 = sand.u32 (!%p344_p13), 1, %s2948_s10  }
  0x23   : > { %347 = sbr.rel (%p344_p13) target bundleno = 1127 (0x467), region = 56  ;;  %s2468_s27 = sshll.u32 (!%p344_p13), %s349_s18, 8 }
  0x24   : > { %s350_s5 = scalar_lea.sflag (!%p344_p13), [#allocation4], %s349_s18  ;;  %s3109_s6 = scalar_lea.vmem (!%p344_p13), [#allocation3], %s2468_s27 }
  0x28   : > { %2939 = dma.done.wait (%p3086_p7), %s350_s5, 4096  }
  0x29   : > { %2941 = vsyncadd (%p3086_p7), %s350_s5, 4294963200  ;;  %s2469_s7 = sshll.u32 %s2956_s12, 5  ;;  %s2471_s8 = sshll.u32 %s2960_s13, 5 }
  0x2a   : > { %p402_p0 = scmp.lt.s32.totalorder %s2469_s7, 63  ;;  %p408_p1 = scmp.lt.s32.totalorder %s2471_s8, 63 }
  0x2b   : > { %p2475_p2 = scmp.ne.s32.totalorder %s2956_s12, 0 }
  0x2c   : > { %s4522_s7 = smov (!%p402_p0, %s2469_s7), 63  ;;  %s4524_s8 = smov (!%p408_p1, %s2471_s8), 63 }
  0x2d   : > { %s2470_s14 = sshll.u32 %s4522_s7, 3  ;;  %s2472_s28 = sshll.u32 %s4524_s8, 3 }
  0x2e   : > { %s3120_s26 = scalar_lea.vmem %s4445_s1, %s2470_s14  ;;  %s3125_s23 = scalar_lea.vmem %s4446_s2, %s2472_s28 }
  0x2f   : > { %s3130_s13 = scalar_lea.vmem %s4453_s9, %s2472_s28  ;;  %422 = sbr.rel (%p2475_p2) target bundleno = 85 (0x55), region = 64 }
  0x34   : > { %vm423_vm0 = vcmask 261120   ;;  %v2977_v0 = vmov 0.0  }
  0x35   : > { %424 = vst.msk [vmem:[#allocation2] sm:$0xff] %vm423_vm0, %v2977_v0 }
  0x36   : > { %425 = vst.msk [vmem:[#allocation2 + $0x8] sm:$0xff] %vm423_vm0, %v2977_v0 }
  0x37   : > { %426 = vst.msk [vmem:[#allocation2 + $0x10] sm:$0xff] %vm423_vm0, %v2977_v0 }
  0x38   : > { %427 = vst.msk [vmem:[#allocation2 + $0x18] sm:$0xff] %vm423_vm0, %v2977_v0 }
  0x39   : > { %428 = vst.msk [vmem:[#allocation2 + $0x20] sm:$0xff] %vm423_vm0, %v2977_v0 }
  0x3a   : > { %429 = vst.msk [vmem:[#allocation2 + $0x28] sm:$0xff] %vm423_vm0, %v2977_v0 }
  0x3b   : > { %430 = vst.msk [vmem:[#allocation2 + $0x30] sm:$0xff] %vm423_vm0, %v2977_v0 }
  0x3c   : > { %431 = vst.msk [vmem:[#allocation2 + $0x38] sm:$0xff] %vm423_vm0, %v2977_v0 }
  0x3d   : > { %432 = vst.msk [vmem:[#allocation2 + $0x40] sm:$0xff] %vm423_vm0, %v2977_v0 }
  0x3e   : > { %433 = vst.msk [vmem:[#allocation2 + $0x48] sm:$0xff] %vm423_vm0, %v2977_v0 }
  0x3f   : > { %434 = vst.msk [vmem:[#allocation2 + $0x50] sm:$0xff] %vm423_vm0, %v2977_v0 }
  0x40   : > { %435 = vst.msk [vmem:[#allocation2 + $0x58] sm:$0xff] %vm423_vm0, %v2977_v0 }
  0x41   : > { %436 = vst.msk [vmem:[#allocation2 + $0x60] sm:$0xff] %vm423_vm0, %v2977_v0 }
  0x42   : > { %437 = vst.msk [vmem:[#allocation2 + $0x68] sm:$0xff] %vm423_vm0, %v2977_v0 }
  0x43   : > { %438 = vst.msk [vmem:[#allocation2 + $0x70] sm:$0xff] %vm423_vm0, %v2977_v0 }
  0x44   : > { %439 = vst.msk [vmem:[#allocation2 + $0x78] sm:$0xff] %vm423_vm0, %v2977_v0 }
  0x45   : > { %440 = vst.msk [vmem:[#allocation2 + $0x80] sm:$0xff] %vm423_vm0, %v2977_v0 }
  0x46   : > { %441 = vst.msk [vmem:[#allocation2 + $0x88] sm:$0xff] %vm423_vm0, %v2977_v0 }
  0x47   : > { %442 = vst.msk [vmem:[#allocation2 + $0x90] sm:$0xff] %vm423_vm0, %v2977_v0 }
  0x48   : > { %443 = vst.msk [vmem:[#allocation2 + $0x98] sm:$0xff] %vm423_vm0, %v2977_v0 }
  0x49   : > { %444 = vst.msk [vmem:[#allocation2 + $0xa0] sm:$0xff] %vm423_vm0, %v2977_v0 }
  0x4a   : > { %445 = vst.msk [vmem:[#allocation2 + $0xa8] sm:$0xff] %vm423_vm0, %v2977_v0 }
  0x4b   : > { %446 = vst.msk [vmem:[#allocation2 + $0xb0] sm:$0xff] %vm423_vm0, %v2977_v0 }
  0x4c   : > { %447 = vst.msk [vmem:[#allocation2 + $0xb8] sm:$0xff] %vm423_vm0, %v2977_v0 }
  0x4d   : > { %448 = vst.msk [vmem:[#allocation2 + $0xc0] sm:$0xff] %vm423_vm0, %v2977_v0 }
  0x4e   : > { %449 = vst.msk [vmem:[#allocation2 + $0xc8] sm:$0xff] %vm423_vm0, %v2977_v0 }
  0x4f   : > { %450 = vst.msk [vmem:[#allocation2 + $0xd0] sm:$0xff] %vm423_vm0, %v2977_v0 }
  0x50   : > { %451 = vst.msk [vmem:[#allocation2 + $0xd8] sm:$0xff] %vm423_vm0, %v2977_v0 }
  0x51   : > { %452 = vst.msk [vmem:[#allocation2 + $0xe0] sm:$0xff] %vm423_vm0, %v2977_v0 }
  0x52   : > { %453 = vst.msk [vmem:[#allocation2 + $0xe8] sm:$0xff] %vm423_vm0, %v2977_v0 }
  0x53   : > { %454 = vst.msk [vmem:[#allocation2 + $0xf0] sm:$0xff] %vm423_vm0, %v2977_v0 }
  0x54   : > { %455 = vst.msk [vmem:[#allocation2 + $0xf8] sm:$0xff] %vm423_vm0, %v2977_v0 }
  0x55 PF: > { %v534_v1 = vld [vmem:[%s3120_s26 + $0x70] sm:$0xff]  ;;  %v535_v2 = vld [vmem:[%s3120_s26 + $0x78] sm:$0xff]  ;;  %v532_v6 = vld [vmem:[%s3120_s26 + $0x60] sm:$0xff]  ;;  %vm938_vm1 = vcmask 261120   ;;  %p2604_p3 = scmp.ne.s32.totalorder %s2956_s12, 1 }
  0x56   : > { %v550_v3 = vld [vmem:[%s3120_s26 + $0xf0] sm:$0xff]  ;;  %v559_v4 = vpack.c.bf16 %v535_v2, %v534_v1  ;;  %v551_v5 = vld [vmem:[%s3120_s26 + $0xf8] sm:$0xff]  ;;  %v533_v7 = vld [vmem:[%s3120_s26 + $0x68] sm:$0xff]  ;;  %s4470_s27 = sld [smem:[#allocation9_spill]] (!%p2604_p3) }
  0x57   : > { %v567_v8 = vpack.c.bf16 %v551_v5, %v550_v3  ;;  %v548_v9 = vld [vmem:[%s3120_s26 + $0xe0] sm:$0xff]  ;;  %v549_v10 = vld [vmem:[%s3120_s26 + $0xe8] sm:$0xff]  ;;  %v558_v11 = vpack.c.bf16 %v533_v7, %v532_v6  ;;  %v530_v13 = vld [vmem:[%s3120_s26 + $0x50] sm:$0xff]  ;;  %s4471_s7 = sld [smem:[#allocation10_spill]] (!%p2604_p3) }
  0x58   : > { %728 = vmatpush.bf16.msra.mxu0 %v559_v4  ;;  %2704 = vmatpush.bf16.msra.mxu2 %v559_v4  ;;  %v566_v12 = vpack.c.bf16 %v549_v10, %v548_v9  ;;  %v531_v14 = vld [vmem:[%s3120_s26 + $0x58] sm:$0xff]  ;;  %v546_v15 = vld [vmem:[%s3120_s26 + $0xd0] sm:$0xff]  ;;  %v528_v19 = vld [vmem:[%s3120_s26 + $0x40] sm:$0xff]  ;;  %s4506_s14 = sld [smem:[#allocation12_spill]] (!%p2604_p3) }
  0x59   : > { %817 = vmatpush.bf16.msra.mxu1 %v567_v8  ;;  %2712 = vmatpush.bf16.msra.mxu3 %v567_v8  ;;  %v547_v16 = vld [vmem:[%s3120_s26 + $0xd8] sm:$0xff]  ;;  %v557_v17 = vpack.c.bf16 %v531_v14, %v530_v13  ;;  %v529_v20 = vld [vmem:[%s3120_s26 + $0x48] sm:$0xff]  ;;  %v544_v21 = vld [vmem:[%s3120_s26 + $0xc0] sm:$0xff] }
  0x5a   : > { %v565_v18 = vpack.c.bf16 %v547_v16, %v546_v15  ;;  %v545_v22 = vld [vmem:[%s3120_s26 + $0xc8] sm:$0xff]  ;;  %v556_v23 = vpack.c.bf16 %v529_v20, %v528_v19  ;;  %v526_v25 = vld [vmem:[%s3120_s26 + $0x30] sm:$0xff]  ;;  %v527_v26 = vld [vmem:[%s3120_s26 + $0x38] sm:$0xff] }
  0x5b   : > { %v564_v24 = vpack.c.bf16 %v545_v22, %v544_v21  ;;  %v542_v27 = vld [vmem:[%s3120_s26 + $0xb0] sm:$0xff]  ;;  %v543_v28 = vld [vmem:[%s3120_s26 + $0xb8] sm:$0xff]  ;;  %v555_v29 = vpack.c.bf16 %v527_v26, %v526_v25  ;;  %v524_v31 = vld [vmem:[%s3120_s26 + $0x20] sm:$0xff] }
  0x5c   : > { %729 = vmatpush.bf16.msra.mxu0 %v558_v11  ;;  %2705 = vmatpush.bf16.msra.mxu2 %v558_v11  ;;  %v563_v30 = vpack.c.bf16 %v543_v28, %v542_v27  ;;  %v525_v32 = vld [vmem:[%s3120_s26 + $0x28] sm:$0xff]  ;;  %v540_v33 = vld [vmem:[%s3120_s26 + $0xa0] sm:$0xff]  ;;  %v522_v37 = vld [vmem:[%s3120_s26 + $0x10] sm:$0xff] }
  0x5d   : > { %818 = vmatpush.bf16.msra.mxu1 %v566_v12  ;;  %2713 = vmatpush.bf16.msra.mxu3 %v566_v12  ;;  %v541_v34 = vld [vmem:[%s3120_s26 + $0xa8] sm:$0xff]  ;;  %v554_v35 = vpack.c.bf16 %v525_v32, %v524_v31  ;;  %v523_v38 = vld [vmem:[%s3120_s26 + $0x18] sm:$0xff]  ;;  %v538_v39 = vld [vmem:[%s3120_s26 + $0x90] sm:$0xff] }
  0x5e   : > { %v562_v36 = vpack.c.bf16 %v541_v34, %v540_v33  ;;  %v539_v40 = vld [vmem:[%s3120_s26 + $0x98] sm:$0xff]  ;;  %v553_v41 = vpack.c.bf16 %v523_v38, %v522_v37  ;;  %v520_v43 = vld [vmem:[%s3120_s26] sm:$0xff]  ;;  %v521_v44 = vld [vmem:[%s3120_s26 + $0x8] sm:$0xff] }
  0x5f   : > { %v561_v42 = vpack.c.bf16 %v539_v40, %v538_v39  ;;  %v536_v45 = vld [vmem:[%s3120_s26 + $0x80] sm:$0xff]  ;;  %v537_v46 = vld [vmem:[%s3120_s26 + $0x88] sm:$0xff]  ;;  %v552_v49 = vpack.c.bf16 %v521_v44, %v520_v43  ;;  %v2486_v61 = vld [vmem:[%s3109_s6 + $0x10] sm:$0xf]  ;;  %s4469_s26 = sld [smem:[#allocation11_spill]] (!%p2604_p3) }
  0x60   : > { %730 = vmatpush.bf16.msra.mxu0 %v557_v17  ;;  %2706 = vmatpush.bf16.msra.mxu2 %v557_v17  ;;  %v2478_v47 = vld [vmem:[%s3109_s6] sm:$0xf]  ;;  %v2673_v48 = vld [vmem:[%s3109_s6 + $0x4] sm:$0xf0]  ;;  %v2672_v52 = vld [vmem:[%s3109_s6 + $0x4] sm:$0xf]  ;;  %v560_v53 = vpack.c.bf16 %v537_v46, %v536_v45 }
  0x61   : > { %819 = vmatpush.bf16.msra.mxu1 %v565_v18  ;;  %2714 = vmatpush.bf16.msra.mxu3 %v565_v18  ;;  %v2542_v50 = vld [vmem:[%s3109_s6 + $0x80] sm:$0xf]  ;;  %v2689_v51 = vld [vmem:[%s3109_s6 + $0x84] sm:$0xf0]  ;;  %v2480_v54 = vld [vmem:[%s3109_s6 + $0x8] sm:$0xf0]  ;;  %v2479_v57 = vor.u32 %v2673_v48, %v2478_v47 }
  0x62   : > { %v2688_v55 = vld [vmem:[%s3109_s6 + $0x84] sm:$0xf]  ;;  %v2544_v56 = vld [vmem:[%s3109_s6 + $0x88] sm:$0xf0]  ;;  %v2543_v58 = vor.u32 %v2689_v51, %v2542_v50  ;;  %v2483_v59 = vor.u32 %v2672_v52, %v2480_v54  ;;  %v2675_v62 = vld [vmem:[%s3109_s6 + $0x14] sm:$0xf0] }
  0x63   : > { %v2547_v60 = vor.u32 %v2688_v55, %v2544_v56  ;;  %v2550_v63 = vld [vmem:[%s3109_s6 + $0x90] sm:$0xf]  ;;  %v2691_v0 = vld [vmem:[%s3109_s6 + $0x94] sm:$0xf0]  ;;  %v2674_v1 = vld [vmem:[%s3109_s6 + $0x14] sm:$0xf]  ;;  %v2487_v5 = vor.u32 %v2675_v62, %v2486_v61 }
  0x64   : > { %731 = vmatpush.bf16.msra.mxu0 %v556_v23  ;;  %2707 = vmatpush.bf16.msra.mxu2 %v556_v23  ;;  %v2488_v2 = vld [vmem:[%s3109_s6 + $0x18] sm:$0xf0]  ;;  %v2690_v3 = vld [vmem:[%s3109_s6 + $0x94] sm:$0xf]  ;;  %v2551_v6 = vor.u32 %v2691_v0, %v2550_v63  ;;  %v2494_v9 = vld [vmem:[%s3109_s6 + $0x20] sm:$0xf] }
  0x65   : > { %820 = vmatpush.bf16.msra.mxu1 %v564_v24  ;;  %2715 = vmatpush.bf16.msra.mxu3 %v564_v24  ;;  %v2552_v4 = vld [vmem:[%s3109_s6 + $0x98] sm:$0xf0]  ;;  %v2491_v7 = vor.u32 %v2674_v1, %v2488_v2  ;;  %v2677_v10 = vld [vmem:[%s3109_s6 + $0x24] sm:$0xf0]  ;;  %v2558_v11 = vld [vmem:[%s3109_s6 + $0xa0] sm:$0xf] }
  0x66   : > { %v2555_v8 = vor.u32 %v2690_v3, %v2552_v4  ;;  %v2693_v12 = vld [vmem:[%s3109_s6 + $0xa4] sm:$0xf0]  ;;  %v2676_v13 = vld [vmem:[%s3109_s6 + $0x24] sm:$0xf]  ;;  %v2496_v14 = vld [vmem:[%s3109_s6 + $0x28] sm:$0xf0]  ;;  %v2495_v17 = vor.u32 %v2677_v10, %v2494_v9 }
  0x67   : > { %v2692_v15 = vld [vmem:[%s3109_s6 + $0xa4] sm:$0xf]  ;;  %v2560_v16 = vld [vmem:[%s3109_s6 + $0xa8] sm:$0xf0]  ;;  %v2559_v18 = vor.u32 %v2693_v12, %v2558_v11  ;;  %v2499_v19 = vor.u32 %v2676_v13, %v2496_v14  ;;  %v2502_v21 = vld [vmem:[%s3109_s6 + $0x30] sm:$0xf] }
  0x68   : > { %732 = vmatpush.bf16.msra.mxu0 %v555_v29  ;;  %2708 = vmatpush.bf16.msra.mxu2 %v555_v29  ;;  %v2563_v20 = vor.u32 %v2692_v15, %v2560_v16  ;;  %v2679_v22 = vld [vmem:[%s3109_s6 + $0x34] sm:$0xf0]  ;;  %v2566_v23 = vld [vmem:[%s3109_s6 + $0xb0] sm:$0xf]  ;;  %v2678_v25 = vld [vmem:[%s3109_s6 + $0x34] sm:$0xf] }
  0x69   : > { %821 = vmatpush.bf16.msra.mxu1 %v563_v30  ;;  %2716 = vmatpush.bf16.msra.mxu3 %v563_v30  ;;  %v2695_v24 = vld [vmem:[%s3109_s6 + $0xb4] sm:$0xf0]  ;;  %v2504_v26 = vld [vmem:[%s3109_s6 + $0x38] sm:$0xf0]  ;;  %v2694_v27 = vld [vmem:[%s3109_s6 + $0xb4] sm:$0xf]  ;;  %v2503_v29 = vor.u32 %v2679_v22, %v2502_v21 }
  0x6a   : > { %v2568_v28 = vld [vmem:[%s3109_s6 + $0xb8] sm:$0xf0]  ;;  %v2567_v30 = vor.u32 %v2695_v24, %v2566_v23  ;;  %v2507_v31 = vor.u32 %v2678_v25, %v2504_v26  ;;  %v2510_v33 = vld [vmem:[%s3109_s6 + $0x40] sm:$0xf]  ;;  %v2681_v34 = vld [vmem:[%s3109_s6 + $0x44] sm:$0xf0] }
  0x6b   : > { %v2571_v32 = vor.u32 %v2694_v27, %v2568_v28  ;;  %v2680_v37 = vld [vmem:[%s3109_s6 + $0x44] sm:$0xf]  ;;  %v2512_v38 = vld [vmem:[%s3109_s6 + $0x48] sm:$0xf0]  ;;  %v2518_v45 = vld [vmem:[%s3109_s6 + $0x50] sm:$0xf] }
  0x6c   : > { %733 = vmatpush.bf16.msra.mxu0 %v554_v35  ;;  %2709 = vmatpush.bf16.msra.mxu2 %v554_v35  ;;  %v2574_v35 = vld [vmem:[%s3109_s6 + $0xc0] sm:$0xf]  ;;  %v2696_v39 = vld [vmem:[%s3109_s6 + $0xc4] sm:$0xf]  ;;  %v2576_v40 = vld [vmem:[%s3109_s6 + $0xc8] sm:$0xf0]  ;;  %v2515_v43 = vor.u32 %v2680_v37, %v2512_v38 }
  0x6d   : > { %822 = vmatpush.bf16.msra.mxu1 %v562_v36  ;;  %2717 = vmatpush.bf16.msra.mxu3 %v562_v36  ;;  %v2697_v36 = vld [vmem:[%s3109_s6 + $0xc4] sm:$0xf0]  ;;  %v2579_v44 = vor.u32 %v2696_v39, %v2576_v40  ;;  %v2683_v46 = vld [vmem:[%s3109_s6 + $0x54] sm:$0xf0]  ;;  %v2582_v47 = vld [vmem:[%s3109_s6 + $0xd0] sm:$0xf] }
  0x6e   : > { %v2699_v48 = vld [vmem:[%s3109_s6 + $0xd4] sm:$0xf0]  ;;  %v2520_v50 = vld [vmem:[%s3109_s6 + $0x58] sm:$0xf0]  ;;  %v2698_v51 = vld [vmem:[%s3109_s6 + $0xd4] sm:$0xf] }
  0x6f   : > { %v2584_v52 = vld [vmem:[%s3109_s6 + $0xd8] sm:$0xf0]  ;;  %v2583_v54 = vor.u32 %v2699_v48, %v2582_v47  ;;  %v2684_v61 = vld [vmem:[%s3109_s6 + $0x64] sm:$0xf]  ;;  %v2528_v62 = vld [vmem:[%s3109_s6 + $0x68] sm:$0xf0] }
  0x70   : > { %734 = vmatpush.bf16.msra.mxu0 %v553_v41  ;;  %2710 = vmatpush.bf16.msra.mxu2 %v553_v41  ;;  %v2511_v41 = vor.u32 %v2681_v34, %v2510_v33  ;;  %v2587_v56 = vor.u32 %v2698_v51, %v2584_v52  ;;  %v2700_v63 = vld [vmem:[%s3109_s6 + $0xe4] sm:$0xf]  ;;  %v2592_v0 = vld [vmem:[%s3109_s6 + $0xe8] sm:$0xf0]  ;;  %v2531_v3 = vor.u32 %v2684_v61, %v2528_v62  ;;  %v2686_v9 = vld [vmem:[%s3109_s6 + $0x74] sm:$0xf] }
  0x71   : > { %823 = vmatpush.bf16.msra.mxu1 %v561_v42  ;;  %2718 = vmatpush.bf16.msra.mxu3 %v561_v42  ;;  %v2575_v42 = vor.u32 %v2697_v36, %v2574_v35  ;;  %v2595_v4 = vor.u32 %v2700_v63, %v2592_v0  ;;  %v2536_v10 = vld [vmem:[%s3109_s6 + $0x78] sm:$0xf0]  ;;  %v2702_v11 = vld [vmem:[%s3109_s6 + $0xf4] sm:$0xf]  ;;  %v472_v23 = vld [vmem:[#allocation2 + $0x80] sm:$0xff] }
  0x72   : > { %v2600_v12 = vld [vmem:[%s3109_s6 + $0xf8] sm:$0xf0]  ;;  %v2539_v15 = vor.u32 %v2686_v9, %v2536_v10  ;;  %v457_v27 = vld [vmem:[#allocation2 + $0x8] sm:$0xff]  ;;  %v458_v37 = vld [vmem:[#allocation2 + $0x10] sm:$0xff] }
  0x73   : > { %v2603_v16 = vor.u32 %v2702_v11, %v2600_v12  ;;  %v473_v33 = vld [vmem:[#allocation2 + $0x88] sm:$0xff]  ;;  %v459_v47 = vld [vmem:[#allocation2 + $0x18] sm:$0xff]  ;;  %v476_v63 = vld [vmem:[#allocation2 + $0xa0] sm:$0xff] }
  0x74   : > { %735 = vmatpush.bf16.msra.mxu0 %v552_v49  ;;  %2711 = vmatpush.bf16.msra.mxu2 %v552_v49  ;;  %v2682_v49 = vld [vmem:[%s3109_s6 + $0x54] sm:$0xf]  ;;  %v477_v9 = vld [vmem:[#allocation2 + $0xa8] sm:$0xff] }
  0x75   : > { %824 = vmatpush.bf16.msra.mxu1 %v560_v53  ;;  %2719 = vmatpush.bf16.msra.mxu3 %v560_v53  ;;  %v2519_v53 = vor.u32 %v2683_v46, %v2518_v45  ;;  %v2523_v55 = vor.u32 %v2682_v49, %v2520_v50 }
  0x77   : > { %736 = vmatmul.bf16.vlgmr.msra.gmra.mxu0 %v2479_v57  ;;  %776 = vmatmul.bf16.vlgmr.msra.gmra.mxu2 %v2543_v58  ;;  %v2526_v57 = vld [vmem:[%s3109_s6 + $0x60] sm:$0xf]  ;;  %v2685_v58 = vld [vmem:[%s3109_s6 + $0x64] sm:$0xf0] }
  0x78   : > { %825 = vmatmul.bf16.vlgmr.msra.gmra.mxu1 %v2483_v59  ;;  %865 = vmatmul.bf16.vlgmr.msra.gmra.mxu3 %v2547_v60  ;;  %v2590_v59 = vld [vmem:[%s3109_s6 + $0xe0] sm:$0xf]  ;;  %v2701_v60 = vld [vmem:[%s3109_s6 + $0xe4] sm:$0xf0]  ;;  %v2527_v1 = vor.u32 %v2685_v58, %v2526_v57 }
  0x79   : > { %v2591_v2 = vor.u32 %v2701_v60, %v2590_v59  ;;  %v460_v57 = vld [vmem:[#allocation2 + $0x20] sm:$0xff] }
  0x87   : > { %741 = vmatmul.bf16.gmra.mxu0 %v2487_v5  ;;  %781 = vmatmul.bf16.gmra.mxu2 %v2551_v6  ;;  %v2534_v5 = vld [vmem:[%s3109_s6 + $0x70] sm:$0xf]  ;;  %v2687_v6 = vld [vmem:[%s3109_s6 + $0x74] sm:$0xf0] }
  0x88   : > { %830 = vmatmul.bf16.gmra.mxu1 %v2491_v7  ;;  %870 = vmatmul.bf16.gmra.mxu3 %v2555_v8  ;;  %v2598_v7 = vld [vmem:[%s3109_s6 + $0xf0] sm:$0xf]  ;;  %v2703_v8 = vld [vmem:[%s3109_s6 + $0xf4] sm:$0xf0]  ;;  %v2535_v13 = vor.u32 %v2687_v6, %v2534_v5 }
  0x89   : > { %v2599_v14 = vor.u32 %v2703_v8, %v2598_v7 }
  0x97   : > { %746 = vmatmul.bf16.gmra.mxu0 %v2495_v17  ;;  %786 = vmatmul.bf16.gmra.mxu2 %v2559_v18  ;;  %v456_v18 = vld [vmem:[#allocation2] sm:$0xff] }
  0x98   : > { %835 = vmatmul.bf16.gmra.mxu1 %v2499_v19  ;;  %875 = vmatmul.bf16.gmra.mxu3 %v2563_v20 }
  0xa7   : > { %751 = vmatmul.bf16.gmra.mxu0 %v2503_v29  ;;  %791 = vmatmul.bf16.gmra.mxu2 %v2567_v30 }
  0xa8   : > { %840 = vmatmul.bf16.gmra.mxu1 %v2507_v31  ;;  %880 = vmatmul.bf16.gmra.mxu3 %v2571_v32 }
  0xb7   : > { %756 = vmatmul.bf16.gmra.mxu0 %v2511_v41  ;;  %796 = vmatmul.bf16.gmra.mxu2 %v2575_v42 }
  0xb8   : > { %845 = vmatmul.bf16.gmra.mxu1 %v2515_v43  ;;  %885 = vmatmul.bf16.gmra.mxu3 %v2579_v44  ;;  %v474_v43 = vld [vmem:[#allocation2 + $0x90] sm:$0xff] }
  0xc7   : > { %761 = vmatmul.bf16.gmra.mxu0 %v2519_v53  ;;  %801 = vmatmul.bf16.gmra.mxu2 %v2583_v54  ;;  %v475_v53 = vld [vmem:[#allocation2 + $0x98] sm:$0xff] }
  0xc8   : > { %850 = vmatmul.bf16.gmra.mxu1 %v2523_v55  ;;  %890 = vmatmul.bf16.gmra.mxu3 %v2587_v56 }
  0xd7   : > { %766 = vmatmul.bf16.gmra.mxu0 %v2527_v1  ;;  %806 = vmatmul.bf16.gmra.mxu2 %v2591_v2 }
  0xd8   : > { %855 = vmatmul.bf16.gmra.mxu1 %v2531_v3  ;;  %895 = vmatmul.bf16.gmra.mxu3 %v2595_v4  ;;  %v461_v3 = vld [vmem:[#allocation2 + $0x28] sm:$0xff] }
  0xe7   : > { %771 = vmatmul.bf16.gmra.mxu0 %v2535_v13  ;;  %811 = vmatmul.bf16.gmra.mxu2 %v2599_v14  ;;  %v462_v13 = vld [vmem:[#allocation2 + $0x30] sm:$0xff] }
  0xe8   : > { %860 = vmatmul.bf16.gmra.mxu1 %v2539_v15  ;;  %900 = vmatmul.bf16.gmra.mxu3 %v2603_v16 }
  0xf4   : > { %v737_v17 = vpop.f32.mrf.mxu0 }
  0xf5   : > { %v826_v19 = vpop.f32.mrf.mxu1 }
  0xf6   : > { %v827_v20 = vadd.f32 %v826_v19, %v737_v17  ;;  %v478_v19 = vld [vmem:[#allocation2 + $0xb0] sm:$0xff] }
  0xf8   : > { %v906_v21 = vadd.f32 %v827_v20, %v456_v18 }
  0xfa   : > { %939 = vst.msk [vmem:[#allocation2] sm:$0xff] %vm938_vm1, %v906_v21  ;;  %v777_v22 = vpop.f32.mrf.mxu2 }
  0xfb   : > { %v866_v24 = vpop.f32.mrf.mxu3 }
  0xfc   : > { %v867_v25 = vadd.f32 %v866_v24, %v777_v22  ;;  %v739_v26 = vpop.f32.mrf.mxu0 }
  0xfd   : > { %v828_v28 = vpop.f32.mrf.mxu1 }
  0xfe   : > { %v922_v29 = vadd.f32 %v867_v25, %v472_v23  ;;  %v829_v30 = vadd.f32 %v828_v28, %v739_v26  ;;  %v463_v23 = vld [vmem:[#allocation2 + $0x38] sm:$0xff] }
 0x100   : > { %955 = vst.msk [vmem:[#allocation2 + $0x80] sm:$0xff] %vm938_vm1, %v922_v29  ;;  %v907_v31 = vadd.f32 %v829_v30, %v457_v27  ;;  %v479_v29 = vld [vmem:[#allocation2 + $0xb8] sm:$0xff] }
 0x102   : > { %940 = vst.msk [vmem:[#allocation2 + $0x8] sm:$0xff] %vm938_vm1, %v907_v31  ;;  %v779_v32 = vpop.f32.mrf.mxu2 }
 0x103   : > { %v868_v34 = vpop.f32.mrf.mxu3 }
 0x104   : > { %v869_v35 = vadd.f32 %v868_v34, %v779_v32  ;;  %v742_v36 = vpop.f32.mrf.mxu0 }
 0x105   : > { %v831_v38 = vpop.f32.mrf.mxu1 }
 0x106   : > { %v923_v39 = vadd.f32 %v869_v35, %v473_v33  ;;  %v832_v40 = vadd.f32 %v831_v38, %v742_v36  ;;  %v464_v33 = vld [vmem:[#allocation2 + $0x40] sm:$0xff] }
 0x108   : > { %956 = vst.msk [vmem:[#allocation2 + $0x88] sm:$0xff] %vm938_vm1, %v923_v39  ;;  %v908_v41 = vadd.f32 %v832_v40, %v458_v37  ;;  %v480_v39 = vld [vmem:[#allocation2 + $0xc0] sm:$0xff] }
 0x10a   : > { %941 = vst.msk [vmem:[#allocation2 + $0x10] sm:$0xff] %vm938_vm1, %v908_v41  ;;  %v782_v42 = vpop.f32.mrf.mxu2 }
 0x10b   : > { %v871_v44 = vpop.f32.mrf.mxu3 }
 0x10c   : > { %v872_v45 = vadd.f32 %v871_v44, %v782_v42  ;;  %v744_v46 = vpop.f32.mrf.mxu0 }
 0x10d   : > { %v833_v48 = vpop.f32.mrf.mxu1 }
 0x10e   : > { %v924_v49 = vadd.f32 %v872_v45, %v474_v43  ;;  %v834_v50 = vadd.f32 %v833_v48, %v744_v46  ;;  %v465_v43 = vld [vmem:[#allocation2 + $0x48] sm:$0xff] }
 0x110   : > { %957 = vst.msk [vmem:[#allocation2 + $0x90] sm:$0xff] %vm938_vm1, %v924_v49  ;;  %v909_v51 = vadd.f32 %v834_v50, %v459_v47  ;;  %v481_v49 = vld [vmem:[#allocation2 + $0xc8] sm:$0xff] }
 0x112   : > { %942 = vst.msk [vmem:[#allocation2 + $0x18] sm:$0xff] %vm938_vm1, %v909_v51  ;;  %v784_v52 = vpop.f32.mrf.mxu2 }
 0x113   : > { %v873_v54 = vpop.f32.mrf.mxu3 }
 0x114   : > { %v874_v55 = vadd.f32 %v873_v54, %v784_v52  ;;  %v747_v56 = vpop.f32.mrf.mxu0 }
 0x115   : > { %v836_v58 = vpop.f32.mrf.mxu1 }
 0x116   : > { %v925_v59 = vadd.f32 %v874_v55, %v475_v53  ;;  %v837_v60 = vadd.f32 %v836_v58, %v747_v56  ;;  %v466_v53 = vld [vmem:[#allocation2 + $0x50] sm:$0xff] }
 0x118   : > { %958 = vst.msk [vmem:[#allocation2 + $0x98] sm:$0xff] %vm938_vm1, %v925_v59  ;;  %v910_v61 = vadd.f32 %v837_v60, %v460_v57  ;;  %v482_v59 = vld [vmem:[#allocation2 + $0xd0] sm:$0xff] }
 0x11a   : > { %943 = vst.msk [vmem:[#allocation2 + $0x20] sm:$0xff] %vm938_vm1, %v910_v61  ;;  %v787_v62 = vpop.f32.mrf.mxu2 }
 0x11b   : > { %v876_v0 = vpop.f32.mrf.mxu3 }
 0x11c   : > { %v877_v1 = vadd.f32 %v876_v0, %v787_v62  ;;  %v749_v2 = vpop.f32.mrf.mxu0 }
 0x11d   : > { %v838_v4 = vpop.f32.mrf.mxu1 }
 0x11e   : > { %v926_v5 = vadd.f32 %v877_v1, %v476_v63  ;;  %v839_v6 = vadd.f32 %v838_v4, %v749_v2  ;;  %v467_v63 = vld [vmem:[#allocation2 + $0x58] sm:$0xff] }
 0x120   : > { %959 = vst.msk [vmem:[#allocation2 + $0xa0] sm:$0xff] %vm938_vm1, %v926_v5  ;;  %v911_v7 = vadd.f32 %v839_v6, %v461_v3  ;;  %v483_v5 = vld [vmem:[#allocation2 + $0xd8] sm:$0xff] }
 0x122   : > { %944 = vst.msk [vmem:[#allocation2 + $0x28] sm:$0xff] %vm938_vm1, %v911_v7  ;;  %v789_v8 = vpop.f32.mrf.mxu2 }
 0x123   : > { %v878_v10 = vpop.f32.mrf.mxu3 }
 0x124   : > { %v879_v11 = vadd.f32 %v878_v10, %v789_v8  ;;  %v752_v12 = vpop.f32.mrf.mxu0 }
 0x125   : > { %v841_v14 = vpop.f32.mrf.mxu1 }
 0x126   : > { %v927_v15 = vadd.f32 %v879_v11, %v477_v9  ;;  %v842_v16 = vadd.f32 %v841_v14, %v752_v12  ;;  %v468_v9 = vld [vmem:[#allocation2 + $0x60] sm:$0xff] }
 0x128   : > { %960 = vst.msk [vmem:[#allocation2 + $0xa8] sm:$0xff] %vm938_vm1, %v927_v15  ;;  %v912_v17 = vadd.f32 %v842_v16, %v462_v13  ;;  %v484_v15 = vld [vmem:[#allocation2 + $0xe0] sm:$0xff] }
 0x12a   : > { %945 = vst.msk [vmem:[#allocation2 + $0x30] sm:$0xff] %vm938_vm1, %v912_v17  ;;  %v792_v18 = vpop.f32.mrf.mxu2 }
 0x12b   : > { %v881_v20 = vpop.f32.mrf.mxu3 }
 0x12c   : > { %v882_v21 = vadd.f32 %v881_v20, %v792_v18  ;;  %v754_v22 = vpop.f32.mrf.mxu0 }
 0x12d   : > { %v843_v24 = vpop.f32.mrf.mxu1 }
 0x12e   : > { %v928_v25 = vadd.f32 %v882_v21, %v478_v19  ;;  %v844_v26 = vadd.f32 %v843_v24, %v754_v22  ;;  %v469_v19 = vld [vmem:[#allocation2 + $0x68] sm:$0xff] }
 0x130   : > { %961 = vst.msk [vmem:[#allocation2 + $0xb0] sm:$0xff] %vm938_vm1, %v928_v25  ;;  %v913_v27 = vadd.f32 %v844_v26, %v463_v23  ;;  %v485_v25 = vld [vmem:[#allocation2 + $0xe8] sm:$0xff] }
 0x132   : > { %946 = vst.msk [vmem:[#allocation2 + $0x38] sm:$0xff] %vm938_vm1, %v913_v27  ;;  %v794_v28 = vpop.f32.mrf.mxu2 }
 0x133   : > { %v883_v30 = vpop.f32.mrf.mxu3 }
 0x134   : > { %v884_v31 = vadd.f32 %v883_v30, %v794_v28  ;;  %v757_v32 = vpop.f32.mrf.mxu0 }
 0x135   : > { %v846_v34 = vpop.f32.mrf.mxu1 }
 0x136   : > { %v929_v35 = vadd.f32 %v884_v31, %v479_v29  ;;  %v847_v36 = vadd.f32 %v846_v34, %v757_v32  ;;  %v470_v29 = vld [vmem:[#allocation2 + $0x70] sm:$0xff] }
 0x138   : > { %962 = vst.msk [vmem:[#allocation2 + $0xb8] sm:$0xff] %vm938_vm1, %v929_v35  ;;  %v914_v37 = vadd.f32 %v847_v36, %v464_v33  ;;  %v486_v35 = vld [vmem:[#allocation2 + $0xf0] sm:$0xff] }
 0x13a   : > { %947 = vst.msk [vmem:[#allocation2 + $0x40] sm:$0xff] %vm938_vm1, %v914_v37  ;;  %v797_v38 = vpop.f32.mrf.mxu2 }
 0x13b   : > { %v886_v40 = vpop.f32.mrf.mxu3 }
 0x13c   : > { %v887_v41 = vadd.f32 %v886_v40, %v797_v38  ;;  %v759_v42 = vpop.f32.mrf.mxu0 }
 0x13d   : > { %v848_v44 = vpop.f32.mrf.mxu1 }
 0x13e   : > { %v930_v45 = vadd.f32 %v887_v41, %v480_v39  ;;  %v849_v46 = vadd.f32 %v848_v44, %v759_v42  ;;  %v471_v39 = vld [vmem:[#allocation2 + $0x78] sm:$0xff] }
 0x140   : > { %963 = vst.msk [vmem:[#allocation2 + $0xc0] sm:$0xff] %vm938_vm1, %v930_v45  ;;  %v915_v47 = vadd.f32 %v849_v46, %v465_v43  ;;  %v487_v45 = vld [vmem:[#allocation2 + $0xf8] sm:$0xff] }
 0x142   : > { %948 = vst.msk [vmem:[#allocation2 + $0x48] sm:$0xff] %vm938_vm1, %v915_v47  ;;  %v799_v48 = vpop.f32.mrf.mxu2 }
 0x143   : > { %v888_v50 = vpop.f32.mrf.mxu3 }
 0x144   : > { %v889_v51 = vadd.f32 %v888_v50, %v799_v48  ;;  %v762_v52 = vpop.f32.mrf.mxu0 }
 0x145   : > { %v851_v54 = vpop.f32.mrf.mxu1 }
 0x146   : > { %v931_v55 = vadd.f32 %v889_v51, %v481_v49  ;;  %v852_v56 = vadd.f32 %v851_v54, %v762_v52 }
 0x148   : > { %964 = vst.msk [vmem:[#allocation2 + $0xc8] sm:$0xff] %vm938_vm1, %v931_v55  ;;  %v916_v57 = vadd.f32 %v852_v56, %v466_v53 }
 0x14a   : > { %949 = vst.msk [vmem:[#allocation2 + $0x50] sm:$0xff] %vm938_vm1, %v916_v57  ;;  %v802_v58 = vpop.f32.mrf.mxu2 }
 0x14b   : > { %v891_v60 = vpop.f32.mrf.mxu3 }
 0x14c   : > { %v892_v61 = vadd.f32 %v891_v60, %v802_v58  ;;  %v764_v62 = vpop.f32.mrf.mxu0 }
 0x14d   : > { %v853_v0 = vpop.f32.mrf.mxu1 }
 0x14e   : > { %v932_v1 = vadd.f32 %v892_v61, %v482_v59  ;;  %v854_v2 = vadd.f32 %v853_v0, %v764_v62 }
 0x150   : > { %965 = vst.msk [vmem:[#allocation2 + $0xd0] sm:$0xff] %vm938_vm1, %v932_v1  ;;  %v917_v3 = vadd.f32 %v854_v2, %v467_v63 }
 0x152   : > { %950 = vst.msk [vmem:[#allocation2 + $0x58] sm:$0xff] %vm938_vm1, %v917_v3  ;;  %v804_v4 = vpop.f32.mrf.mxu2 }
 0x153   : > { %v893_v6 = vpop.f32.mrf.mxu3 }
 0x154   : > { %v894_v7 = vadd.f32 %v893_v6, %v804_v4  ;;  %v767_v8 = vpop.f32.mrf.mxu0 }
 0x155   : > { %v856_v10 = vpop.f32.mrf.mxu1 }
 0x156   : > { %v933_v11 = vadd.f32 %v894_v7, %v483_v5  ;;  %v857_v12 = vadd.f32 %v856_v10, %v767_v8 }
 0x158   : > { %966 = vst.msk [vmem:[#allocation2 + $0xd8] sm:$0xff] %vm938_vm1, %v933_v11  ;;  %v918_v13 = vadd.f32 %v857_v12, %v468_v9 }
 0x15a   : > { %951 = vst.msk [vmem:[#allocation2 + $0x60] sm:$0xff] %vm938_vm1, %v918_v13  ;;  %v807_v14 = vpop.f32.mrf.mxu2 }
 0x15b   : > { %v896_v16 = vpop.f32.mrf.mxu3 }
 0x15c   : > { %v897_v17 = vadd.f32 %v896_v16, %v807_v14  ;;  %v769_v18 = vpop.f32.mrf.mxu0 }
 0x15d   : > { %v858_v20 = vpop.f32.mrf.mxu1 }
 0x15e   : > { %v934_v21 = vadd.f32 %v897_v17, %v484_v15  ;;  %v859_v22 = vadd.f32 %v858_v20, %v769_v18 }
 0x160   : > { %967 = vst.msk [vmem:[#allocation2 + $0xe0] sm:$0xff] %vm938_vm1, %v934_v21  ;;  %v919_v23 = vadd.f32 %v859_v22, %v469_v19 }
 0x162   : > { %952 = vst.msk [vmem:[#allocation2 + $0x68] sm:$0xff] %vm938_vm1, %v919_v23  ;;  %v809_v24 = vpop.f32.mrf.mxu2 }
 0x163   : > { %v898_v26 = vpop.f32.mrf.mxu3 }
 0x164   : > { %v899_v27 = vadd.f32 %v898_v26, %v809_v24  ;;  %v772_v28 = vpop.f32.mrf.mxu0 }
 0x165   : > { %v861_v30 = vpop.f32.mrf.mxu1 }
 0x166   : > { %v935_v31 = vadd.f32 %v899_v27, %v485_v25  ;;  %v862_v32 = vadd.f32 %v861_v30, %v772_v28 }
 0x168   : > { %968 = vst.msk [vmem:[#allocation2 + $0xe8] sm:$0xff] %vm938_vm1, %v935_v31  ;;  %v920_v33 = vadd.f32 %v862_v32, %v470_v29 }
 0x16a   : > { %953 = vst.msk [vmem:[#allocation2 + $0x70] sm:$0xff] %vm938_vm1, %v920_v33  ;;  %v812_v34 = vpop.f32.mrf.mxu2 }
 0x16b   : > { %v901_v36 = vpop.f32.mrf.mxu3 }
 0x16c   : > { %v902_v37 = vadd.f32 %v901_v36, %v812_v34  ;;  %v774_v38 = vpop.f32.mrf.mxu0 }
 0x16d   : > { %v863_v40 = vpop.f32.mrf.mxu1 }
 0x16e   : > { %v936_v41 = vadd.f32 %v902_v37, %v486_v35  ;;  %v864_v42 = vadd.f32 %v863_v40, %v774_v38 }
 0x170   : > { %969 = vst.msk [vmem:[#allocation2 + $0xf0] sm:$0xff] %vm938_vm1, %v936_v41  ;;  %v921_v43 = vadd.f32 %v864_v42, %v471_v39 }
 0x172   : > { %954 = vst.msk [vmem:[#allocation2 + $0x78] sm:$0xff] %vm938_vm1, %v921_v43  ;;  %v814_v44 = vpop.f32.mrf.mxu2 }
 0x173   : > { %v903_v46 = vpop.f32.mrf.mxu3 }
 0x174   : > { %v904_v47 = vadd.f32 %v903_v46, %v814_v44  ;;  %974 = sbr.rel (%p2604_p3) target bundleno = 1127 (0x467), region = 68 }
 0x176   : > { %v937_v48 = vadd.f32 %v904_v47, %v487_v45 }
 0x178   : > { %970 = vst.msk [vmem:[#allocation2 + $0xf8] sm:$0xff] %vm938_vm1, %v937_v48 }
 0x179   : > { %v1010_v49 = vld [vmem:[%s4447_s3 + $0x18] sm:$0xff]  ;;  %v1009_v50 = vld [vmem:[%s4447_s3 + $0x10] sm:$0xff]  ;;  %v1008_v51 = vld [vmem:[%s4447_s3 + $0x8] sm:$0xff] }
 0x17a   : > { %1123 = vmatpush.msra.mxu0 %v1010_v49  ;;  %2720 = vmatpush.msra.mxu2 %v1010_v49  ;;  %v1007_v52 = vld [vmem:[%s4447_s3] sm:$0xff]  ;;  %v976_v55 = vld [vmem:[#allocation2 + $0x8] sm:$0xff]  ;;  %v977_v57 = vld [vmem:[#allocation2 + $0x10] sm:$0xff] }
 0x17b   : > { %v975_v53 = vld [vmem:[#allocation2] sm:$0xff]  ;;  %v992_v56 = vld [vmem:[#allocation2 + $0x88] sm:$0xff]  ;;  %v993_v58 = vld [vmem:[#allocation2 + $0x90] sm:$0xff] }
 0x17c   : > { %1124 = vmatpush.msra.mxu0 %v1009_v50  ;;  %2721 = vmatpush.msra.mxu2 %v1009_v50  ;;  %v991_v54 = vld [vmem:[#allocation2 + $0x80] sm:$0xff]  ;;  %v978_v59 = vld [vmem:[#allocation2 + $0x18] sm:$0xff]  ;;  %v980_v63 = vld [vmem:[#allocation2 + $0x28] sm:$0xff] }
 0x17d   : > { %v994_v60 = vld [vmem:[#allocation2 + $0x98] sm:$0xff]  ;;  %v979_v61 = vld [vmem:[#allocation2 + $0x20] sm:$0xff]  ;;  %v996_v0 = vld [vmem:[#allocation2 + $0xa8] sm:$0xff] }
 0x17e   : > { %1125 = vmatpush.msra.mxu0 %v1008_v51  ;;  %2722 = vmatpush.msra.mxu2 %v1008_v51  ;;  %v995_v62 = vld [vmem:[#allocation2 + $0xa0] sm:$0xff]  ;;  %v981_v1 = vld [vmem:[#allocation2 + $0x30] sm:$0xff]  ;;  %v998_v3 = vld [vmem:[#allocation2 + $0xb8] sm:$0xff] }
 0x17f   : > { %v997_v2 = vld [vmem:[#allocation2 + $0xb0] sm:$0xff]  ;;  %v982_v4 = vld [vmem:[#allocation2 + $0x38] sm:$0xff]  ;;  %v999_v5 = vld [vmem:[#allocation2 + $0xc0] sm:$0xff] }
 0x180   : > { %1126 = vmatpush.msra.mxu0 %v1007_v52  ;;  %2723 = vmatpush.msra.mxu2 %v1007_v52  ;;  %v983_v6 = vld [vmem:[#allocation2 + $0x40] sm:$0xff]  ;;  %v1000_v7 = vld [vmem:[#allocation2 + $0xc8] sm:$0xff]  ;;  %v1001_v9 = vld [vmem:[#allocation2 + $0xd0] sm:$0xff] }
 0x181   : > { %2605 = vmatmul.msk.f32.vlgmr.msra.gmra.mxu0 %vm938_vm1, %v975_v53  ;;  %2621 = vmatmul.msk.f32.vlgmr.msra.gmra.mxu2 %vm938_vm1, %v991_v54  ;;  %v984_v8 = vld [vmem:[#allocation2 + $0x48] sm:$0xff]  ;;  %v985_v10 = vld [vmem:[#allocation2 + $0x50] sm:$0xff]  ;;  %v1002_v11 = vld [vmem:[#allocation2 + $0xd8] sm:$0xff] }
 0x182   : > { %v1003_v12 = vld [vmem:[#allocation2 + $0xe0] sm:$0xff]  ;;  %v986_v13 = vld [vmem:[#allocation2 + $0x58] sm:$0xff]  ;;  %v1004_v27 = vld [vmem:[#allocation2 + $0xe8] sm:$0xff] }
 0x183   : > { %v3333_v14 = vld [vmem:[%s4448_s4] ss:$0 sm:$0xff]  ;;  %v988_v32 = vld [vmem:[#allocation2 + $0x68] sm:$0xff]  ;;  %v1005_v41 = vld [vmem:[#allocation2 + $0xf0] sm:$0xff] }
 0x184   : > { %v987_v23 = vld [vmem:[#allocation2 + $0x60] sm:$0xff]  ;;  %v1006_v48 = vld [vmem:[#allocation2 + $0xf8] sm:$0xff]  ;;  %v989_v51 = vld [vmem:[#allocation2 + $0x70] sm:$0xff] }
 0x189   : > { %2606 = vmatmul.msk.f32.gmra.mxu0 %vm938_vm1, %v976_v55  ;;  %2622 = vmatmul.msk.f32.gmra.mxu2 %vm938_vm1, %v992_v56 }
 0x191   : > { %2607 = vmatmul.msk.f32.gmra.mxu0 %vm938_vm1, %v977_v57  ;;  %2623 = vmatmul.msk.f32.gmra.mxu2 %vm938_vm1, %v993_v58 }
 0x199   : > { %2608 = vmatmul.msk.f32.gmra.mxu0 %vm938_vm1, %v978_v59  ;;  %2624 = vmatmul.msk.f32.gmra.mxu2 %vm938_vm1, %v994_v60  ;;  %v990_v59 = vld [vmem:[#allocation2 + $0x78] sm:$0xff] }
 0x1a1   : > { %2609 = vmatmul.msk.f32.gmra.mxu0 %vm938_vm1, %v979_v61  ;;  %2625 = vmatmul.msk.f32.gmra.mxu2 %vm938_vm1, %v995_v62 }
 0x1a9   : > { %2610 = vmatmul.msk.f32.gmra.mxu0 %vm938_vm1, %v980_v63  ;;  %2626 = vmatmul.msk.f32.gmra.mxu2 %vm938_vm1, %v996_v0 }
 0x1b1   : > { %2611 = vmatmul.msk.f32.gmra.mxu0 %vm938_vm1, %v981_v1  ;;  %2627 = vmatmul.msk.f32.gmra.mxu2 %vm938_vm1, %v997_v2 }
 0x1b9   : > { %2628 = vmatmul.msk.f32.gmra.mxu2 %vm938_vm1, %v998_v3  ;;  %2612 = vmatmul.msk.f32.gmra.mxu0 %vm938_vm1, %v982_v4 }
 0x1c1   : > { %2629 = vmatmul.msk.f32.gmra.mxu2 %vm938_vm1, %v999_v5  ;;  %2613 = vmatmul.msk.f32.gmra.mxu0 %vm938_vm1, %v983_v6 }
 0x1c9   : > { %2630 = vmatmul.msk.f32.gmra.mxu2 %vm938_vm1, %v1000_v7  ;;  %2614 = vmatmul.msk.f32.gmra.mxu0 %vm938_vm1, %v984_v8 }
 0x1d1   : > { %2631 = vmatmul.msk.f32.gmra.mxu2 %vm938_vm1, %v1001_v9  ;;  %2615 = vmatmul.msk.f32.gmra.mxu0 %vm938_vm1, %v985_v10 }
 0x1d9   : > { %2632 = vmatmul.msk.f32.gmra.mxu2 %vm938_vm1, %v1002_v11  ;;  %2616 = vmatmul.msk.f32.gmra.mxu0 %vm938_vm1, %v986_v13 }
 0x1e1   : > { %2633 = vmatmul.msk.f32.gmra.mxu2 %vm938_vm1, %v1003_v12  ;;  %2617 = vmatmul.msk.f32.gmra.mxu0 %vm938_vm1, %v987_v23 }
 0x1e9   : > { %2634 = vmatmul.msk.f32.gmra.mxu2 %vm938_vm1, %v1004_v27  ;;  %2618 = vmatmul.msk.f32.gmra.mxu0 %vm938_vm1, %v988_v32 }
 0x1f1   : > { %2635 = vmatmul.msk.f32.gmra.mxu2 %vm938_vm1, %v1005_v41  ;;  %2619 = vmatmul.msk.f32.gmra.mxu0 %vm938_vm1, %v989_v51 }
 0x1f9   : > { %2636 = vmatmul.msk.f32.gmra.mxu2 %vm938_vm1, %v1006_v48  ;;  %2620 = vmatmul.msk.f32.gmra.mxu0 %vm938_vm1, %v990_v59 }
 0x1fe   : > { %v1128_v15 = vpop.f32.mrf.mxu0 }
 0x1ff   : > { %v3337_v16 = vadd.f32 %v3333_v14, %v1128_v15 }
 0x201   : > { %v1226_v17 = vsel %vm938_vm1, %v3337_v16, 0.0 }
 0x202   : > { %1227 = vadd.xlane.f32.xlu0 %v1226_v17 }
 0x204   : > { %v1176_v18 = vpop.f32.mrf.mxu2 }
 0x205   : > { %v3342_v19 = vadd.f32 %v3333_v14, %v1176_v18 }
 0x206   : > { %v1131_v20 = vpop.f32.mrf.mxu0 }
 0x207   : > { %v3345_v21 = vadd.f32 %v3333_v14, %v1131_v20  ;;  %v1274_v22 = vsel %vm938_vm1, %v3342_v19, 0.0 }
 0x209   : > { %v1229_v24 = vsel %vm938_vm1, %v3345_v21, 0.0 }
 0x20a   : > { %1230 = vadd.xlane.f32.xlu1 %v1229_v24  ;;  %1275 = vadd.xlane.f32.xlu0 %v1274_v22 }
 0x20c   : > { %v1179_v25 = vpop.f32.mrf.mxu2 }
 0x20d   : > { %v3353_v26 = vadd.f32 %v3333_v14, %v1179_v25 }
 0x20e   : > { %v1134_v28 = vpop.f32.mrf.mxu0 }
 0x20f   : > { %v3357_v29 = vadd.f32 %v3333_v14, %v1134_v28  ;;  %v1277_v30 = vsel %vm938_vm1, %v3353_v26, 0.0 }
 0x211   : > { %v1232_v31 = vsel %vm938_vm1, %v3357_v29, 0.0 }
 0x212   : > { %1233 = vadd.xlane.f32.xlu2 %v1232_v31  ;;  %1278 = vadd.xlane.f32.xlu1 %v1277_v30  ;;  %v2978_v30 = vmov 32.0  }
 0x213   : > { %2808 = vrcp.f32 %v2978_v30 }
 0x214   : > { %v1182_v33 = vpop.f32.mrf.mxu2 }
 0x215   : > { %v3365_v34 = vadd.f32 %v3333_v14, %v1182_v33 }
 0x216   : > { %v1137_v35 = vpop.f32.mrf.mxu0 }
 0x217   : > { %v3368_v36 = vadd.f32 %v3333_v14, %v1137_v35  ;;  %v1280_v37 = vsel %vm938_vm1, %v3365_v34, 0.0 }
 0x219   : > { %v1235_v38 = vsel %vm938_vm1, %v3368_v36, 0.0  ;;  %v2809_v31 = vpop.eup %2808 }
 0x21a   : > { %1281 = vadd.xlane.f32.xlu2 %v1280_v37  ;;  %1236 = vadd.xlane.f32.xlu1 %v1235_v38  ;;  %v1323_v32 = vmul.f32 32.0, %v2809_v31  ;;  %vm1327_vm2 = vweird.f32 %v2809_v31 }
 0x21c   : > { %v1185_v39 = vpop.f32.mrf.mxu2  ;;  %v1324_v33 = vsub.f32 1.0, %v1323_v32 }
 0x21d   : > { %v3375_v40 = vadd.f32 %v3333_v14, %v1185_v39 }
 0x21e   : > { %v1140_v42 = vpop.f32.mrf.mxu0  ;;  %v1325_v35 = vmul.f32 %v2809_v31, %v1324_v33 }
 0x21f   : > { %v1283_v43 = vsel %vm938_vm1, %v3375_v40, 0.0  ;;  %v3381_v44 = vadd.f32 %v3333_v14, %v1140_v42 }
 0x220   : > { %1284 = vadd.xlane.f32.xlu0 %v1283_v43  ;;  %v1326_v37 = vadd.f32 %v2809_v31, %v1325_v35 }
 0x221   : > { %v1238_v47 = vsel %vm938_vm1, %v3381_v44, 0.0 }
 0x222   : > { %v3453_v38 = vsel %vm1327_vm2, %v2809_v31, %v1326_v37 }
 0x224   : > { %v1188_v45 = vpop.f32.mrf.mxu2 }
 0x225   : > { %v3384_v46 = vadd.f32 %v3333_v14, %v1188_v45 }
 0x226   : > { %v1143_v49 = vpop.f32.mrf.mxu0 }
 0x227   : > { %v1286_v50 = vsel %vm938_vm1, %v3384_v46, 0.0  ;;  %v3392_v52 = vadd.f32 %v3333_v14, %v1143_v49 }
 0x228   : > { %1287 = vadd.xlane.f32.xlu2 %v1286_v50  ;;  %1239 = vadd.xlane.f32.xlu0 %v1238_v47 }
 0x229   : > { %v1241_v55 = vsel %vm938_vm1, %v3392_v52, 0.0 }
 0x22c   : > { %v1191_v53 = vpop.f32.mrf.mxu2 }
 0x22d   : > { %v3396_v54 = vadd.f32 %v3333_v14, %v1191_v53 }
 0x22e   : > { %v1146_v56 = vpop.f32.mrf.mxu0 }
 0x22f   : > { %v3401_v57 = vadd.f32 %v3333_v14, %v1146_v56  ;;  %v1289_v58 = vsel %vm938_vm1, %v3396_v54, 0.0 }
 0x230   : > { %1242 = vadd.xlane.f32.xlu2 %v1241_v55  ;;  %1290 = vadd.xlane.f32.xlu1 %v1289_v58 }
 0x231   : > { %v1244_v60 = vsel %vm938_vm1, %v3401_v57, 0.0 }
 0x232   : > { %1245 = vadd.xlane.f32.xlu0 %v1244_v60 }
 0x234   : > { %v1194_v61 = vpop.f32.mrf.mxu2 }
 0x235   : > { %v3409_v62 = vadd.f32 %v3333_v14, %v1194_v61 }
 0x236   : > { %v1149_v63 = vpop.f32.mrf.mxu0 }
 0x237   : > { %v1292_v0 = vsel %vm938_vm1, %v3409_v62, 0.0  ;;  %v3414_v1 = vadd.f32 %v3333_v14, %v1149_v63 }
 0x238   : > { %1293 = vadd.xlane.f32.xlu1 %v1292_v0 }
 0x239   : > { %v1247_v4 = vsel %vm938_vm1, %v3414_v1, 0.0 }
 0x23c   : > { %v1197_v2 = vpop.f32.mrf.mxu2 }
 0x23d   : > { %v3417_v3 = vadd.f32 %v3333_v14, %v1197_v2 }
 0x23e   : > { %v1152_v5 = vpop.f32.mrf.mxu0 }
 0x23f   : > { %v1295_v6 = vsel %vm938_vm1, %v3417_v3, 0.0  ;;  %v3424_v7 = vadd.f32 %v3333_v14, %v1152_v5 }
 0x240   : > { %1296 = vadd.xlane.f32.xlu2 %v1295_v6  ;;  %1248 = vadd.xlane.f32.xlu1 %v1247_v4 }
 0x241   : > { %v1250_v10 = vsel %vm938_vm1, %v3424_v7, 0.0 }
 0x244   : > { %v1200_v8 = vpop.f32.mrf.mxu2 }
 0x245   : > { %v3427_v9 = vadd.f32 %v3333_v14, %v1200_v8 }
 0x246   : > { %v1155_v11 = vpop.f32.mrf.mxu0 }
 0x247   : > { %v1298_v12 = vsel %vm938_vm1, %v3427_v9, 0.0  ;;  %v3434_v13 = vadd.f32 %v3333_v14, %v1155_v11 }
 0x248   : > { %1251 = vadd.xlane.f32.xlu2 %v1250_v10  ;;  %1299 = vadd.xlane.f32.xlu0 %v1298_v12 }
 0x249   : > { %v1253_v18 = vsel %vm938_vm1, %v3434_v13, 0.0 }
 0x24c   : > { %v1203_v15 = vpop.f32.mrf.mxu2 }
 0x24d   : > { %v3437_v17 = vadd.f32 %v3333_v14, %v1203_v15 }
 0x24e   : > { %v1158_v20 = vpop.f32.mrf.mxu0 }
 0x24f   : > { %v1301_v22 = vsel %vm938_vm1, %v3437_v17, 0.0  ;;  %v3444_v23 = vadd.f32 %v3333_v14, %v1158_v20 }
 0x250   : > { %1302 = vadd.xlane.f32.xlu1 %v1301_v22  ;;  %1254 = vadd.xlane.f32.xlu0 %v1253_v18 }
 0x251   : > { %v1256_v27 = vsel %vm938_vm1, %v3444_v23, 0.0 }
 0x254   : > { %v1206_v24 = vpop.f32.mrf.mxu2 }
 0x255   : > { %v3447_v25 = vadd.f32 %v3333_v14, %v1206_v24 }
 0x256   : > { %v1161_v11 = vpop.f32.mrf.mxu0 }
 0x257   : > { %v1304_v28 = vsel %vm938_vm1, %v3447_v25, 0.0 }
 0x258   : > { %1305 = vadd.xlane.f32.xlu2 %v1304_v28  ;;  %1257 = vadd.xlane.f32.xlu1 %v1256_v27  ;;  %v3507_v28 = vadd.f32 %v3333_v14, %v1161_v11 }
 0x25a   : > { %v1259_v35 = vsel %vm938_vm1, %v3507_v28, 0.0 }
 0x25c   : > { %v1209_v63 = vpop.f32.mrf.mxu2 }
 0x25d   : > { %v3489_v6 = vadd.f32 %v3333_v14, %v1209_v63 }
 0x25f   : > { %v1307_v15 = vsel %vm938_vm1, %v3489_v6, 0.0 }
 0x264   : > { %v1212_v18 = vpop.f32.mrf.mxu2 }
 0x265   : > { %v3510_v30 = vadd.f32 %v3333_v14, %v1212_v18 }
 0x267   : > { %v1310_v33 = vsel %vm938_vm1, %v3510_v30, 0.0 }
 0x275   : > { %v1228_v39 = vpop.xlane.xlu0 %1227 }
 0x276   : > { %v1329_v41 = vmul.f32 %v3453_v38, %v1228_v39 }
 0x278   : > { %v3457_v42 = vsub.f32 %v3337_v16, %v1329_v41 }
 0x27a   : > { %v1393_v43 = vmul.f32 %v3457_v42, %v3457_v42 }
 0x27c   : > { %v1425_v45 = vsel %vm938_vm1, %v1393_v43, 0.0 }
 0x27d   : > { %v1231_v47 = vpop.xlane.xlu1 %1230  ;;  %1426 = vadd.xlane.f32.xlu2 %v1425_v45  ;;  %v1276_v48 = vpop.xlane.xlu0 %1275 }
 0x27e   : > { %v1345_v49 = vmul.f32 %v3453_v38, %v1276_v48  ;;  %v1330_v50 = vmul.f32 %v3453_v38, %v1231_v47 }
 0x280   : > { %v3465_v51 = vsub.f32 %v3342_v19, %v1345_v49  ;;  %v3470_v16 = vsub.f32 %v3345_v21, %v1330_v50  ;;  %v1164_v50 = vpop.f32.mrf.mxu0 }
 0x282   : > { %v1409_v53 = vmul.f32 %v3465_v51, %v3465_v51  ;;  %v1394_v19 = vmul.f32 %v3470_v16, %v3470_v16 }
 0x284   : > { %v1473_v55 = vsel %vm938_vm1, %v1409_v53, 0.0  ;;  %v1428_v4 = vsel %vm938_vm1, %v1394_v19, 0.0 }
 0x285   : > { %v1234_v56 = vpop.xlane.xlu2 %1233  ;;  %v1279_v58 = vpop.xlane.xlu1 %1278  ;;  %1474 = vadd.xlane.f32.xlu0 %v1473_v55 }
 0x286   : > { %v1346_v59 = vmul.f32 %v3453_v38, %v1279_v58  ;;  %v1331_v60 = vmul.f32 %v3453_v38, %v1234_v56 }
 0x288   : > { %v3476_v61 = vsub.f32 %v3353_v26, %v1346_v59  ;;  %v3483_v0 = vsub.f32 %v3357_v29, %v1331_v60 }
 0x28a   : > { %v1410_v21 = vmul.f32 %v3476_v61, %v3476_v61  ;;  %v1395_v10 = vmul.f32 %v3483_v0, %v3483_v0 }
 0x28c   : > { %v1476_v2 = vsel %vm938_vm1, %v1410_v21, 0.0  ;;  %v1431_v22 = vsel %vm938_vm1, %v1395_v10, 0.0  ;;  %v3549_v21 = vadd.f32 %v3333_v14, %v1164_v50 }
 0x28d   : > { %v1282_v5 = vpop.xlane.xlu2 %1281  ;;  %1477 = vadd.xlane.f32.xlu1 %v1476_v2  ;;  %1429 = vadd.xlane.f32.xlu0 %v1428_v4 }
 0x28e   : > { %v1347_v26 = vmul.f32 %v3453_v38, %v1282_v5  ;;  %v1167_v5 = vpop.f32.mrf.mxu0  ;;  %v1262_v10 = vsel %vm938_vm1, %v3549_v21, 0.0 }
 0x28f   : > { %v3564_v18 = vadd.f32 %v3333_v14, %v1167_v5 }
 0x290   : > { %v3492_v8 = vsub.f32 %v3365_v34, %v1347_v26  ;;  %v1237_v34 = vpop.xlane.xlu1 %1236 }
 0x291   : > { %v1332_v31 = vmul.f32 %v3453_v38, %v1237_v34  ;;  %v1265_v34 = vsel %vm938_vm1, %v3564_v18, 0.0 }
 0x292   : > { %v1411_v29 = vmul.f32 %v3492_v8, %v3492_v8 }
 0x293   : > { %v1285_v12 = vpop.xlane.xlu0 %1284  ;;  %v3520_v39 = vsub.f32 %v3368_v36, %v1332_v31 }
 0x294   : > { %v1348_v20 = vmul.f32 %v3453_v38, %v1285_v12  ;;  %v1479_v24 = vsel %vm938_vm1, %v1411_v29, 0.0 }
 0x295   : > { %1432 = vadd.xlane.f32.xlu1 %v1431_v22  ;;  %1480 = vadd.xlane.f32.xlu2 %v1479_v24  ;;  %v1396_v36 = vmul.f32 %v3520_v39, %v3520_v39 }
 0x296   : > { %v3504_v27 = vsub.f32 %v3375_v40, %v1348_v20  ;;  %1308 = vadd.xlane.f32.xlu0 %v1307_v15 }
 0x297   : > { %v1434_v59 = vsel %vm938_vm1, %v1396_v36, 0.0 }
 0x298   : > { %v1412_v32 = vmul.f32 %v3504_v27, %v3504_v27 }
 0x29a   : > { %v1482_v45 = vsel %vm938_vm1, %v1412_v32, 0.0 }
 0x29b   : > { %v1288_v40 = vpop.xlane.xlu2 %1287  ;;  %v1240_v37 = vpop.xlane.xlu0 %1239 }
 0x29c   : > { %v1349_v41 = vmul.f32 %v3453_v38, %v1288_v40  ;;  %v1333_v43 = vmul.f32 %v3453_v38, %v1240_v37 }
 0x29d   : > { %1311 = vadd.xlane.f32.xlu1 %v1310_v33  ;;  %1260 = vadd.xlane.f32.xlu2 %v1259_v35 }
 0x29e   : > { %v3526_v47 = vsub.f32 %v3384_v46, %v1349_v41  ;;  %v3529_v48 = vsub.f32 %v3381_v44, %v1333_v43  ;;  %1483 = vadd.xlane.f32.xlu0 %v1482_v45 }
 0x2a0   : > { %v1413_v49 = vmul.f32 %v3526_v47, %v3526_v47  ;;  %v1397_v53 = vmul.f32 %v3529_v48, %v3529_v48 }
 0x2a2   : > { %v1485_v44 = vsel %vm938_vm1, %v1413_v49, 0.0  ;;  %v1437_v60 = vsel %vm938_vm1, %v1397_v53, 0.0 }
 0x2a3   : > { %v1243_v55 = vpop.xlane.xlu2 %1242  ;;  %v1291_v56 = vpop.xlane.xlu1 %1290 }
 0x2a4   : > { %v1334_v58 = vmul.f32 %v3453_v38, %v1243_v55  ;;  %v1350_v46 = vmul.f32 %v3453_v38, %v1291_v56 }
 0x2a5   : > { %1486 = vadd.xlane.f32.xlu1 %v1485_v44  ;;  %1435 = vadd.xlane.f32.xlu2 %v1434_v59  ;;  %v1246_v12 = vpop.xlane.xlu0 %1245 }
 0x2a6   : > { %v3543_v19 = vsub.f32 %v3392_v52, %v1334_v58  ;;  %v3546_v63 = vsub.f32 %v3396_v54, %v1350_v46  ;;  %1438 = vadd.xlane.f32.xlu0 %v1437_v60  ;;  %v1215_v52 = vpop.f32.mrf.mxu2  ;;  %v1335_v22 = vmul.f32 %v3453_v38, %v1246_v12 }
 0x2a7   : > { %v3567_v20 = vadd.f32 %v3333_v14, %v1215_v52 }
 0x2a8   : > { %v1398_v2 = vmul.f32 %v3543_v19, %v3543_v19  ;;  %v1414_v4 = vmul.f32 %v3546_v63, %v3546_v63  ;;  %v3577_v33 = vsub.f32 %v3401_v57, %v1335_v22 }
 0x2a9   : > { %v1313_v31 = vsel %vm938_vm1, %v3567_v20, 0.0 }
 0x2aa   : > { %v1440_v54 = vsel %vm938_vm1, %v1398_v2, 0.0  ;;  %v1488_v11 = vsel %vm938_vm1, %v1414_v4, 0.0  ;;  %v1399_v57 = vmul.f32 %v3577_v33, %v3577_v33  ;;  %v1170_v4 = vpop.f32.mrf.mxu0 }
 0x2ab   : > { %v1294_v26 = vpop.xlane.xlu1 %1293 }
 0x2ac   : > { %v1351_v29 = vmul.f32 %v3453_v38, %v1294_v26  ;;  %v1443_v56 = vsel %vm938_vm1, %v1399_v57, 0.0 }
 0x2ad   : > { %1441 = vadd.xlane.f32.xlu1 %v1440_v54  ;;  %1489 = vadd.xlane.f32.xlu2 %v1488_v11  ;;  %v3621_v11 = vadd.f32 %v3333_v14, %v1170_v4 }
 0x2ae   : > { %v3561_v15 = vsub.f32 %v3409_v62, %v1351_v29  ;;  %1263 = vadd.xlane.f32.xlu0 %v1262_v10  ;;  %v1218_v36 = vpop.f32.mrf.mxu2 }
 0x2af   : > { %v3606_v59 = vadd.f32 %v3333_v14, %v1218_v36 }
 0x2b0   : > { %v1415_v24 = vmul.f32 %v3561_v15, %v3561_v15 }
 0x2b1   : > { %v1316_v26 = vsel %vm938_vm1, %v3606_v59, 0.0 }
 0x2b2   : > { %v1491_v37 = vsel %vm938_vm1, %v1415_v24, 0.0 }
 0x2b3   : > { %v1297_v62 = vpop.xlane.xlu2 %1296  ;;  %v1249_v32 = vpop.xlane.xlu1 %1248 }
 0x2b4   : > { %v1352_v35 = vmul.f32 %v3453_v38, %v1297_v62  ;;  %v1336_v40 = vmul.f32 %v3453_v38, %v1249_v32 }
 0x2b5   : > { %1266 = vadd.xlane.f32.xlu1 %v1265_v34  ;;  %1314 = vadd.xlane.f32.xlu2 %v1313_v31  ;;  %v1268_v31 = vsel %vm938_vm1, %v3621_v11, 0.0 }
 0x2b6   : > { %v3583_v41 = vsub.f32 %v3417_v3, %v1352_v35  ;;  %v3586_v43 = vsub.f32 %v3414_v1, %v1336_v40  ;;  %1492 = vadd.xlane.f32.xlu0 %v1491_v37  ;;  %v1173_v35 = vpop.f32.mrf.mxu0 }
 0x2b7   : > { %v3642_v57 = vadd.f32 %v3333_v14, %v1173_v35 }
 0x2b8   : > { %v1416_v45 = vmul.f32 %v3583_v41, %v3583_v41  ;;  %v1400_v49 = vmul.f32 %v3586_v43, %v3586_v43 }
 0x2ba   : > { %v1494_v1 = vsel %vm938_vm1, %v1416_v45, 0.0  ;;  %v1446_v58 = vsel %vm938_vm1, %v1400_v49, 0.0 }
 0x2bb   : > { %v1252_v50 = vpop.xlane.xlu2 %1251  ;;  %v1300_v53 = vpop.xlane.xlu0 %1299 }
 0x2bc   : > { %v1337_v55 = vmul.f32 %v3453_v38, %v1252_v50  ;;  %v1353_v3 = vmul.f32 %v3453_v38, %v1300_v53  ;;  %v1271_v50 = vsel %vm938_vm1, %v3642_v57, 0.0 }
 0x2bd   : > { %1495 = vadd.xlane.f32.xlu1 %v1494_v1  ;;  %1444 = vadd.xlane.f32.xlu2 %v1443_v56  ;;  %v2106_v1 = vld [vmem:[%s4469_s26 + $0x18] sm:$0xff]  ;;  %v2104_v56 = vld [vmem:[%s4469_s26 + $0x8] sm:$0xff] }
 0x2be   : > { %v3600_v46 = vsub.f32 %v3424_v7, %v1337_v55  ;;  %v3603_v44 = vsub.f32 %v3427_v9, %v1353_v3  ;;  %1447 = vadd.xlane.f32.xlu0 %v1446_v58  ;;  %v1221_v7 = vpop.f32.mrf.mxu2  ;;  %2219 = vmatpush.msra.mxu1 %v2106_v1 }
 0x2bf   : > { %v3624_v12 = vadd.f32 %v3333_v14, %v1221_v7  ;;  %2724 = vmatpush.msra.mxu3 %v2106_v1 }
 0x2c0   : > { %v1401_v60 = vmul.f32 %v3600_v46, %v3600_v46  ;;  %v1417_v2 = vmul.f32 %v3603_v44, %v3603_v44 }
 0x2c1   : > { %v1319_v34 = vsel %vm938_vm1, %v3624_v12, 0.0 }
 0x2c2   : > { %v1449_v9 = vsel %vm938_vm1, %v1401_v60, 0.0  ;;  %v1497_v52 = vsel %vm938_vm1, %v1417_v2, 0.0  ;;  %v2103_v60 = vld [vmem:[%s4469_s26] sm:$0xff] }
 0x2c3   : > { %v1303_v5 = vpop.xlane.xlu1 %1302  ;;  %v1255_v29 = vpop.xlane.xlu0 %1254 }
 0x2c4   : > { %v1354_v10 = vmul.f32 %v3453_v38, %v1303_v5  ;;  %v1338_v22 = vmul.f32 %v3453_v38, %v1255_v29 }
 0x2c5   : > { %1450 = vadd.xlane.f32.xlu1 %v1449_v9  ;;  %1498 = vadd.xlane.f32.xlu2 %v1497_v52 }
 0x2c6   : > { %v3618_v54 = vsub.f32 %v3437_v17, %v1354_v10  ;;  %1317 = vadd.xlane.f32.xlu0 %v1316_v26  ;;  %v3634_v62 = vsub.f32 %v3434_v13, %v1338_v22 }
 0x2c8   : > { %v1418_v24 = vmul.f32 %v3618_v54, %v3618_v54  ;;  %v1402_v36 = vmul.f32 %v3634_v62, %v3634_v62 }
 0x2ca   : > { %v1500_v37 = vsel %vm938_vm1, %v1418_v24, 0.0  ;;  %v1452_v55 = vsel %vm938_vm1, %v1402_v36, 0.0 }
 0x2cb   : > { %v1306_v17 = vpop.xlane.xlu2 %1305  ;;  %v1258_v40 = vpop.xlane.xlu1 %1257 }
 0x2cc   : > { %v1355_v32 = vmul.f32 %v3453_v38, %v1306_v17  ;;  %v1339_v49 = vmul.f32 %v3453_v38, %v1258_v40 }
 0x2cd   : > { %1320 = vadd.xlane.f32.xlu1 %v1319_v34  ;;  %1269 = vadd.xlane.f32.xlu2 %v1268_v31 }
 0x2ce   : > { %v3639_v45 = vsub.f32 %v3447_v25, %v1355_v32  ;;  %1501 = vadd.xlane.f32.xlu0 %v1500_v37  ;;  %v3652_v53 = vsub.f32 %v3444_v23, %v1339_v49  ;;  %v2105_v23 = vld [vmem:[%s4469_s26 + $0x10] sm:$0xff] }
 0x2cf   : > { %2220 = vmatpush.msra.mxu1 %v2105_v23  ;;  %2725 = vmatpush.msra.mxu3 %v2105_v23 }
 0x2d0   : > { %v1419_v13 = vmul.f32 %v3639_v45, %v3639_v45  ;;  %v1403_v14 = vmul.f32 %v3652_v53, %v3652_v53 }
 0x2d1   : > { %2221 = vmatpush.msra.mxu1 %v2104_v56  ;;  %2726 = vmatpush.msra.mxu3 %v2104_v56 }
 0x2d2   : > { %v1503_v25 = vsel %vm938_vm1, %v1419_v13, 0.0  ;;  %v1455_v3 = vsel %vm938_vm1, %v1403_v14, 0.0  ;;  %v3683_v13 = vld [vmem:[%s4470_s27] ss:$0 sm:$0xff] }
 0x2d3   : > { %2222 = vmatpush.msra.mxu1 %v2103_v60  ;;  %2727 = vmatpush.msra.mxu3 %v2103_v60 }
 0x2d5   : > { %1504 = vadd.xlane.f32.xlu1 %v1503_v25  ;;  %1453 = vadd.xlane.f32.xlu2 %v1452_v55  ;;  %v3690_v55 = vld [vmem:[%s4471_s7] ss:$0 sm:$0xff] }
 0x2d6   : > { %1272 = vadd.xlane.f32.xlu0 %v1271_v50 }
 0x2dd   : > { %1456 = vadd.xlane.f32.xlu2 %v1455_v3 }
 0x2f0   : > { %v1427_v58 = vpop.xlane.xlu2 %1426 }
 0x2f1   : > { %v1521_v2 = vmul.f32 %v1427_v58, %v3453_v38 }
 0x2f3   : > { %v1553_v4 = vadd.f32 1e-05, %v1521_v2 }
 0x2f5   : > { %2810 = vrsqrt.f32 %v1553_v4  ;;  %vm1591_vm4 = vweird.f32 %v1553_v4 }
 0x2f8   : > { %v1475_v5 = vpop.xlane.xlu0 %1474 }
 0x2f9   : > { %v1537_v26 = vmul.f32 %v1475_v5, %v3453_v38 }
 0x2fb   : > { %v2811_v7 = vpop.eup %2810  ;;  %v1569_v10 = vadd.f32 1e-05, %v1537_v26 }
 0x2fc   : > { %v1586_v9 = vmul.f32 %v2811_v7, %v1553_v4  ;;  %vm1592_vm3 = vweird.f32 %v2811_v7 }
 0x2fd   : > { %2812 = vrsqrt.f32 %v1569_v10  ;;  %vm1593_vm5 = vmor %vm1591_vm4, %vm1592_vm3  ;;  %vm1751_vm7 = vweird.f32 %v1569_v10 }
 0x2fe   : > { %v1587_v52 = vmul.f32 %v2811_v7, %v1586_v9 }
 0x300   : > { %v1588_v29 = vmul.f32 0.5, %v1587_v52  ;;  %v1478_v22 = vpop.xlane.xlu1 %1477  ;;  %v1430_v24 = vpop.xlane.xlu0 %1429 }
 0x301   : > { %v1538_v34 = vmul.f32 %v1478_v22, %v3453_v38  ;;  %v1522_v31 = vmul.f32 %v1430_v24, %v3453_v38 }
 0x302   : > { %v1589_v17 = vsub.f32 1.5, %v1588_v29 }
 0x303   : > { %v2813_v32 = vpop.eup %2812  ;;  %v3675_v35 = vadd.f32 1e-05, %v1538_v34  ;;  %v3677_v40 = vadd.f32 1e-05, %v1522_v31 }
 0x304   : > { %v1590_v37 = vmul.f32 %v2811_v7, %v1589_v17  ;;  %v1746_v49 = vmul.f32 %v2813_v32, %v1569_v10  ;;  %vm1752_vm6 = vweird.f32 %v2813_v32 }
 0x305   : > { %2814 = vrsqrt.f32 %v3675_v35  ;;  %vm1753_vm8 = vmor %vm1751_vm7, %vm1752_vm6  ;;  %vm1761_vm9 = vweird.f32 %v3675_v35  ;;  %vm1601_vm10 = vweird.f32 %v3677_v40 }
 0x306   : > { %v1594_v36 = vsel %vm1593_vm5, %v2811_v7, %v1590_v37  ;;  %v1747_v50 = vmul.f32 %v2813_v32, %v1746_v49  ;;  %2816 = vrsqrt.f32 %v3677_v40  ;;  %v2039_v49 = vld [vmem:[%s3125_s23] sm:$0xff] }
 0x307   : > { %v1905_v25 = vmul.f32 %v1594_v36, %v3457_v42 }
 0x308   : > { %v1748_v14 = vmul.f32 0.5, %v1747_v50  ;;  %v1433_v3 = vpop.xlane.xlu1 %1432  ;;  %v1481_v1 = vpop.xlane.xlu2 %1480 }
 0x309   : > { %v1523_v23 = vmul.f32 %v1433_v3, %v3453_v38  ;;  %v1539_v56 = vmul.f32 %v1481_v1, %v3453_v38  ;;  %v1309_v58 = vpop.xlane.xlu0 %1308  ;;  %v1940_v60 = vmul.f32 %v3683_v13, %v1905_v25 }
 0x30a   : > { %v1749_v2 = vsub.f32 1.5, %v1748_v14  ;;  %v1356_v4 = vmul.f32 %v3453_v38, %v1309_v58 }
 0x30b   : > { %v3696_v42 = vpop.eup %2814  ;;  %v3698_v5 = vadd.f32 1e-05, %v1523_v23  ;;  %v3700_v26 = vadd.f32 1e-05, %v1539_v56  ;;  %v1975_v7 = vadd.f32 %v3690_v55, %v1940_v60 }
 0x30c   : > { %v3703_v9 = vpop.eup %2816  ;;  %v1750_v52 = vmul.f32 %v2813_v32, %v1749_v2  ;;  %v1756_v29 = vmul.f32 %v3696_v42, %v3675_v35  ;;  %v3708_v22 = vsub.f32 %v3489_v6, %v1356_v4  ;;  %vm1762_vm11 = vweird.f32 %v3696_v42 }
 0x30d   : > { %v1596_v24 = vmul.f32 %v3703_v9, %v3677_v40  ;;  %2818 = vrsqrt.f32 %v3698_v5  ;;  %v2007_v37 = vmax.f32 %v1975_v7, 0.0  ;;  %vm1602_vm12 = vweird.f32 %v3703_v9  ;;  %vm3750_vm14 = vmor %vm1761_vm9, %vm1762_vm11 }
 0x30e   : > { %v1754_v34 = vsel %vm1753_vm8, %v2813_v32, %v1750_v52  ;;  %v1757_v31 = vmul.f32 %v3696_v42, %v1756_v29  ;;  %2820 = vrsqrt.f32 %v3700_v26  ;;  %v1420_v10 = vmul.f32 %v3708_v22, %v3708_v22  ;;  %vm1603_vm0 = vmor %vm1601_vm10, %vm1602_vm12 }
 0x30f   : > { %v1597_v17 = vmul.f32 %v3703_v9, %v1596_v24  ;;  %v1921_v32 = vmul.f32 %v1754_v34, %v3465_v51  ;;  %v2071_v60 = vadd.f32 %v2039_v49, %v2007_v37  ;;  %vm1611_vm13 = vweird.f32 %v3698_v5 }
 0x310   : > { %v1758_v6 = vmul.f32 0.5, %v1757_v31  ;;  %v1312_v36 = vpop.xlane.xlu1 %1311  ;;  %v1261_v50 = vpop.xlane.xlu2 %1260  ;;  %v1506_v1 = vsel %vm938_vm1, %v1420_v10, 0.0  ;;  %vm1771_vm4 = vweird.f32 %v3700_v26 }
 0x311   : > { %v1598_v25 = vmul.f32 0.5, %v1597_v17  ;;  %v1357_v14 = vmul.f32 %v3453_v38, %v1312_v36  ;;  %v1340_v3 = vmul.f32 %v3453_v38, %v1261_v50  ;;  %v1484_v23 = vpop.xlane.xlu0 %1483  ;;  %1507 = vadd.xlane.f32.xlu0 %v1506_v1  ;;  %2637 = vmatmul.msk.f32.vlgmr.msra.gmra.mxu1 %vm938_vm1, %v2071_v60  ;;  %v1956_v31 = vmul.f32 %v3683_v13, %v1921_v32  ;;  %v2055_v60 = vld [vmem:[%s3125_s23 + $0x80] sm:$0xff] }
 0x312   : > { %v1759_v56 = vsub.f32 1.5, %v1758_v6  ;;  %v1540_v58 = vmul.f32 %v1484_v23, %v3453_v38 }
 0x313   : > { %v3727_v2 = vpop.eup %2818  ;;  %v1599_v4 = vsub.f32 1.5, %v1598_v25  ;;  %v3731_v51 = vsub.f32 %v3510_v30, %v1357_v14  ;;  %v3734_v7 = vsub.f32 %v3507_v28, %v1340_v3  ;;  %v1991_v25 = vadd.f32 %v3690_v55, %v1956_v31 }
 0x314   : > { %v3736_v52 = vpop.eup %2820  ;;  %v1760_v29 = vmul.f32 %v3696_v42, %v1759_v56  ;;  %v1606_v24 = vmul.f32 %v3727_v2, %v3698_v5  ;;  %v3742_v34 = vadd.f32 1e-05, %v1540_v58  ;;  %vm1612_vm15 = vweird.f32 %v3727_v2 }
 0x315   : > { %v1600_v30 = vmul.f32 %v3703_v9, %v1599_v4  ;;  %v1766_v17 = vmul.f32 %v3736_v52, %v3700_v26  ;;  %v1404_v10 = vmul.f32 %v3734_v7, %v3734_v7  ;;  %vm1772_vm2 = vweird.f32 %v3736_v52  ;;  %vm3799_vm3 = vmor %vm1611_vm13, %vm1612_vm15 }
 0x316   : > { %v1764_v37 = vsel %vm3750_vm14, %v3696_v42, %v1760_v29  ;;  %v1607_v35 = vmul.f32 %v3727_v2, %v1606_v24  ;;  %2822 = vrsqrt.f32 %v3742_v34  ;;  %v1421_v42 = vmul.f32 %v3731_v51, %v3731_v51  ;;  %vm3813_vm5 = vmor %vm1771_vm4, %vm1772_vm2 }
 0x317   : > { %v1604_v49 = vsel %vm1603_vm0, %v3703_v9, %v1600_v30  ;;  %v1767_v6 = vmul.f32 %v3736_v52, %v1766_v17  ;;  %v1458_v36 = vsel %vm938_vm1, %v1404_v10, 0.0  ;;  %v1922_v3 = vmul.f32 %v1764_v37, %v3476_v61 }
 0x318   : > { %v1608_v50 = vmul.f32 0.5, %v1607_v35  ;;  %v1487_v32 = vpop.xlane.xlu1 %1486  ;;  %1459 = vadd.xlane.f32.xlu1 %v1458_v36  ;;  %v1436_v40 = vpop.xlane.xlu2 %1435  ;;  %v1906_v14 = vmul.f32 %v1604_v49, %v3470_v16  ;;  %v1509_v56 = vsel %vm938_vm1, %v1421_v42, 0.0  ;;  %v2023_v24 = vmax.f32 %v1991_v25, 0.0 }
 0x319   : > { %v1768_v1 = vmul.f32 0.5, %v1767_v6  ;;  %v1541_v9 = vmul.f32 %v1487_v32, %v3453_v38  ;;  %v1524_v23 = vmul.f32 %v1436_v40, %v3453_v38  ;;  %v1439_v58 = vpop.xlane.xlu0 %1438  ;;  %1510 = vadd.xlane.f32.xlu2 %v1509_v56  ;;  %v1957_v30 = vmul.f32 %v3683_v13, %v1922_v3 }
 0x31a   : > { %v1609_v4 = vsub.f32 1.5, %v1608_v50  ;;  %v1525_v29 = vmul.f32 %v1439_v58, %v3453_v38  ;;  %v1941_v31 = vmul.f32 %v3683_v13, %v1906_v14  ;;  %v2087_v35 = vadd.f32 %v2055_v60, %v2023_v24  ;;  %v2056_v58 = vld [vmem:[%s3125_s23 + $0x88] sm:$0xff] }
 0x31b   : > { %v1769_v28 = vsub.f32 1.5, %v1768_v1  ;;  %v3784_v16 = vadd.f32 1e-05, %v1541_v9  ;;  %v3786_v61 = vadd.f32 1e-05, %v1524_v23  ;;  %v1992_v3 = vadd.f32 %v3690_v55, %v1957_v30 }
 0x31c   : > { %v3789_v17 = vpop.eup %2822  ;;  %v1610_v10 = vmul.f32 %v3727_v2, %v1609_v4  ;;  %v3792_v37 = vadd.f32 1e-05, %v1525_v29  ;;  %v1976_v49 = vadd.f32 %v3690_v55, %v1941_v31  ;;  %2653 = vmatmul.msk.f32.vlgmr.msra.gmra.mxu3 %vm938_vm1, %v2087_v35  ;;  %vm1781_vm6 = vweird.f32 %v3742_v34 }
 0x31d   : > { %v1770_v36 = vmul.f32 %v3736_v52, %v1769_v28  ;;  %v1776_v42 = vmul.f32 %v3789_v17, %v3742_v34  ;;  %2824 = vrsqrt.f32 %v3784_v16  ;;  %v2024_v29 = vmax.f32 %v1992_v3, 0.0 }
 0x31e   : > { %v1614_v50 = vsel %vm3799_vm3, %v3727_v2, %v1610_v10  ;;  %2826 = vrsqrt.f32 %v3786_v61  ;;  %v2040_v2 = vld [vmem:[%s3125_s23 + $0x8] sm:$0xff]  ;;  %v2008_v14 = vmax.f32 %v1976_v49, 0.0  ;;  %vm1782_vm7 = vweird.f32 %v3789_v17 }
 0x31f   : > { %v1774_v26 = vsel %vm3813_vm5, %v3736_v52, %v1770_v36  ;;  %v1777_v32 = vmul.f32 %v3789_v17, %v1776_v42  ;;  %2828 = vrsqrt.f32 %v3792_v37  ;;  %v1907_v1 = vmul.f32 %v1614_v50, %v3483_v0  ;;  %vm3888_vm9 = vmor %vm1781_vm6, %vm1782_vm7 }
 0x320   : > { %v1442_v40 = vpop.xlane.xlu1 %1441  ;;  %v1490_v25 = vpop.xlane.xlu2 %1489  ;;  %v1923_v52 = vmul.f32 %v1774_v26, %v3492_v8  ;;  %v2072_v4 = vadd.f32 %v2040_v2, %v2008_v14  ;;  %v2088_v8 = vadd.f32 %v2056_v58, %v2024_v29  ;;  %vm1791_vm8 = vweird.f32 %v3784_v16 }
 0x321   : > { %v1526_v9 = vmul.f32 %v1442_v40, %v3453_v38  ;;  %v1542_v23 = vmul.f32 %v1490_v25, %v3453_v38  ;;  %v1264_v56 = vpop.xlane.xlu0 %1263  ;;  %v1778_v31 = vmul.f32 0.5, %v1777_v32  ;;  %v1942_v49 = vmul.f32 %v3683_v13, %v1907_v1 }
 0x322   : > { %v1341_v60 = vmul.f32 %v3453_v38, %v1264_v56  ;;  %2638 = vmatmul.msk.f32.gmra.mxu1 %vm938_vm1, %v2072_v4  ;;  %v1958_v42 = vmul.f32 %v3683_v13, %v1923_v52  ;;  %vm1621_vm12 = vweird.f32 %v3786_v61  ;;  %vm1631_vm15 = vweird.f32 %v3792_v37 }
 0x323   : > { %v3832_v24 = vpop.eup %2824  ;;  %v3834_v28 = vadd.f32 1e-05, %v1526_v9  ;;  %v3836_v30 = vadd.f32 1e-05, %v1542_v23  ;;  %v1977_v14 = vadd.f32 %v3690_v55, %v1942_v49 }
 0x324   : > { %v3838_v0 = vpop.eup %2826  ;;  %v1786_v10 = vmul.f32 %v3832_v24, %v3784_v16  ;;  %v3843_v35 = vsub.f32 %v3549_v21, %v1341_v60  ;;  %2654 = vmatmul.msk.f32.gmra.mxu3 %vm938_vm1, %v2088_v8  ;;  %v1779_v21 = vsub.f32 1.5, %v1778_v31  ;;  %v1993_v56 = vadd.f32 %v3690_v55, %v1958_v42  ;;  %v2041_v60 = vld [vmem:[%s3125_s23 + $0x10] sm:$0xff] }
 0x325   : > { %v3847_v6 = vpop.eup %2828  ;;  %v1616_v36 = vmul.f32 %v3838_v0, %v3786_v61  ;;  %2830 = vrsqrt.f32 %v3834_v28  ;;  %vm1622_vm10 = vweird.f32 %v3838_v0  ;;  %vm1792_vm11 = vweird.f32 %v3832_v24 }
 0x326   : > { %v1787_v50 = vmul.f32 %v3832_v24, %v1786_v10  ;;  %2832 = vrsqrt.f32 %v3836_v30  ;;  %v1626_v32 = vmul.f32 %v3847_v6, %v3792_v37  ;;  %v1405_v25 = vmul.f32 %v3843_v35, %v3843_v35  ;;  %vm3907_vm13 = vmor %vm1621_vm12, %vm1622_vm10 }
 0x327   : > { %v1617_v5 = vmul.f32 %v3838_v0, %v1616_v36  ;;  %v1780_v29 = vmul.f32 %v3789_v17, %v1779_v21  ;;  %v2009_v10 = vmax.f32 %v1977_v14, 0.0  ;;  %vm3934_vm14 = vmor %vm1791_vm8, %vm1792_vm11  ;;  %vm1632_vm0 = vweird.f32 %v3847_v6 }
 0x328   : > { %v1788_v26 = vmul.f32 0.5, %v1787_v50  ;;  %v1267_v2 = vpop.xlane.xlu1 %1266  ;;  %v1315_v40 = vpop.xlane.xlu2 %1314  ;;  %v1461_v58 = vsel %vm938_vm1, %v1405_v25, 0.0  ;;  %v1627_v49 = vmul.f32 %v3847_v6, %v1626_v32  ;;  %vm1641_vm2 = vweird.f32 %v3834_v28  ;;  %vm3977_vm3 = vmor %vm1631_vm15, %vm1632_vm0 }
 0x329   : > { %v1618_v3 = vmul.f32 0.5, %v1617_v5  ;;  %v1342_v1 = vmul.f32 %v3453_v38, %v1267_v2  ;;  %v1358_v9 = vmul.f32 %v3453_v38, %v1315_v40  ;;  %v1493_v23 = vpop.xlane.xlu0 %1492  ;;  %1462 = vadd.xlane.f32.xlu0 %v1461_v58  ;;  %v2073_v21 = vadd.f32 %v2041_v60, %v2009_v10  ;;  %v2057_v40 = vld [vmem:[%s3125_s23 + $0x90] sm:$0xff] }
 0x32a   : > { %v1543_v52 = vmul.f32 %v1493_v23, %v3453_v38  ;;  %v1789_v8 = vsub.f32 1.5, %v1788_v26  ;;  %v2025_v2 = vmax.f32 %v1993_v56, 0.0  ;;  %v1784_v25 = vsel %vm3888_vm9, %v3789_v17, %v1780_v29 }
 0x32b   : > { %v3869_v4 = vpop.eup %2830  ;;  %v1619_v31 = vsub.f32 1.5, %v1618_v3  ;;  %v3876_v36 = vsub.f32 %v3564_v18, %v1342_v1  ;;  %v3881_v50 = vsub.f32 %v3567_v20, %v1358_v9  ;;  %2639 = vmatmul.msk.f32.gmra.mxu1 %vm938_vm1, %v2073_v21  ;;  %v1628_v14 = vmul.f32 0.5, %v1627_v49 }
 0x32c   : > { %v3878_v42 = vpop.eup %2832  ;;  %v3883_v5 = vadd.f32 1e-05, %v1543_v52  ;;  %v1636_v18 = vmul.f32 %v3869_v4, %v3834_v28  ;;  %v1790_v34 = vmul.f32 %v3832_v24, %v1789_v8  ;;  %v2089_v1 = vadd.f32 %v2057_v40, %v2025_v2 }
 0x32d   : > { %v1620_v32 = vmul.f32 %v3838_v0, %v1619_v31  ;;  %v1796_v20 = vmul.f32 %v3878_v42, %v3836_v30  ;;  %v1422_v61 = vmul.f32 %v3881_v50, %v3881_v50  ;;  %v1406_v52 = vmul.f32 %v3876_v36, %v3876_v36 }
 0x32e   : > { %2834 = vrsqrt.f32 %v3883_v5  ;;  %v1637_v31 = vmul.f32 %v3869_v4, %v1636_v18  ;;  %2655 = vmatmul.msk.f32.gmra.mxu3 %vm938_vm1, %v2089_v1  ;;  %v1924_v8 = vmul.f32 %v1784_v25, %v3504_v27  ;;  %v1629_v26 = vsub.f32 1.5, %v1628_v14 }
 0x32f   : > { %v1797_v3 = vmul.f32 %v3878_v42, %v1796_v20  ;;  %v1624_v29 = vsel %vm3907_vm13, %v3838_v0, %v1620_v32  ;;  %v1512_v21 = vsel %vm938_vm1, %v1422_v61, 0.0  ;;  %v1464_v40 = vsel %vm938_vm1, %v1406_v52, 0.0 }
 0x330   : > { %v1496_v9 = vpop.xlane.xlu1 %1495  ;;  %v1445_v23 = vpop.xlane.xlu2 %1444  ;;  %1513 = vadd.xlane.f32.xlu1 %v1512_v21  ;;  %1465 = vadd.xlane.f32.xlu2 %v1464_v40  ;;  %v1959_v18 = vmul.f32 %v3683_v13, %v1924_v8  ;;  %v1794_v25 = vsel %vm3934_vm14, %v3832_v24, %v1790_v34  ;;  %v1908_v16 = vmul.f32 %v1624_v29, %v3520_v39  ;;  %v1638_v14 = vmul.f32 0.5, %v1637_v31  ;;  %v2058_v39 = vld [vmem:[%s3125_s23 + $0x98] sm:$0xff] }
 0x331   : > { %v1544_v17 = vmul.f32 %v1496_v9, %v3453_v38  ;;  %v1527_v58 = vmul.f32 %v1445_v23, %v3453_v38  ;;  %v1448_v60 = vpop.xlane.xlu0 %1447  ;;  %v1798_v32 = vmul.f32 0.5, %v1797_v3  ;;  %v1630_v24 = vmul.f32 %v3847_v6, %v1629_v26  ;;  %v2042_v21 = vld [vmem:[%s3125_s23 + $0x18] sm:$0xff] }
 0x332   : > { %v1528_v10 = vmul.f32 %v1448_v60, %v3453_v38  ;;  %v1994_v1 = vadd.f32 %v3690_v55, %v1959_v18  ;;  %v1943_v9 = vmul.f32 %v3683_v13, %v1908_v16  ;;  %v1639_v31 = vsub.f32 1.5, %v1638_v14 }
 0x333   : > { %v3924_v49 = vadd.f32 1e-05, %v1544_v17  ;;  %v3927_v2 = vadd.f32 1e-05, %v1527_v58  ;;  %v1799_v34 = vsub.f32 1.5, %v1798_v32  ;;  %v1925_v17 = vmul.f32 %v1794_v25, %v3526_v47 }
 0x334   : > { %v3938_v27 = vadd.f32 1e-05, %v1528_v10  ;;  %v3941_v20 = vpop.eup %2834  ;;  %v2026_v61 = vmax.f32 %v1994_v1, 0.0  ;;  %v1978_v29 = vadd.f32 %v3690_v55, %v1943_v9  ;;  %vm1802_vm4 = vweird.f32 %v3878_v42 }
 0x335   : > { %2836 = vrsqrt.f32 %v3924_v49  ;;  %v1806_v3 = vmul.f32 %v3941_v20, %v3883_v5  ;;  %v1960_v40 = vmul.f32 %v3683_v13, %v1925_v17  ;;  %v1800_v16 = vmul.f32 %v3878_v42, %v1799_v34 }
 0x336   : > { %2838 = vrsqrt.f32 %v3927_v2  ;;  %v2090_v47 = vadd.f32 %v2058_v39, %v2026_v61  ;;  %v2010_v18 = vmax.f32 %v1978_v29, 0.0  ;;  %v1634_v37 = vsel %vm3977_vm3, %v3847_v6, %v1630_v24 }
 0x337   : > { %2840 = vrsqrt.f32 %v3938_v27  ;;  %v1807_v10 = vmul.f32 %v3941_v20, %v1806_v3  ;;  %vm1642_vm5 = vweird.f32 %v3869_v4  ;;  %vm1801_vm6 = vweird.f32 %v3836_v30 }
 0x338   : > { %v1451_v23 = vpop.xlane.xlu1 %1450  ;;  %v1499_v56 = vpop.xlane.xlu2 %1498  ;;  %2656 = vmatmul.msk.f32.gmra.mxu3 %vm938_vm1, %v2090_v47  ;;  %v2074_v9 = vadd.f32 %v2042_v21, %v2010_v18  ;;  %v3999_v39 = vmul.f32 %v3869_v4, %v1639_v31  ;;  %vm4005_vm7 = vmor %vm1801_vm6, %vm1802_vm4  ;;  %vm1811_vm9 = vweird.f32 %v3883_v5  ;;  %vm1821_vm10 = vweird.f32 %v3924_v49 }
 0x339   : > { %v1529_v58 = vmul.f32 %v1451_v23, %v3453_v38  ;;  %v1545_v52 = vmul.f32 %v1499_v56, %v3453_v38  ;;  %v1318_v60 = vpop.xlane.xlu0 %1317  ;;  %v1808_v30 = vmul.f32 0.5, %v1807_v10  ;;  %v1995_v56 = vadd.f32 %v3690_v55, %v1960_v40  ;;  %vm4031_vm8 = vmor %vm1641_vm2, %vm1642_vm5 }
 0x33a   : > { %v1359_v8 = vmul.f32 %v3453_v38, %v1318_v60  ;;  %2640 = vmatmul.msk.f32.gmra.mxu1 %vm938_vm1, %v2074_v9  ;;  %v1804_v17 = vsel %vm4005_vm7, %v3878_v42, %v1800_v16  ;;  %v1909_v40 = vmul.f32 %v1634_v37, %v3529_v48  ;;  %vm1651_vm11 = vweird.f32 %v3927_v2 }
 0x33b   : > { %v3967_v0 = vpop.eup %2836  ;;  %v3969_v26 = vadd.f32 1e-05, %v1529_v58  ;;  %v3971_v32 = vadd.f32 1e-05, %v1545_v52  ;;  %v2059_v52 = vld [vmem:[%s3125_s23 + $0xa0] sm:$0xff]  ;;  %v1809_v9 = vsub.f32 1.5, %v1808_v30  ;;  %vm1812_vm12 = vweird.f32 %v3941_v20 }
 0x33c   : > { %v1816_v14 = vmul.f32 %v3967_v0, %v3924_v49  ;;  %v3986_v3 = vsub.f32 %v3606_v59, %v1359_v8  ;;  %v3988_v1 = vpop.eup %2838  ;;  %v2027_v8 = vmax.f32 %v1995_v56, 0.0  ;;  %v1944_v56 = vmul.f32 %v3683_v13, %v1909_v40  ;;  %vm4082_vm0 = vmor %vm1811_vm9, %vm1812_vm12 }
 0x33d   : > { %v3996_v34 = vpop.eup %2840  ;;  %v1646_v23 = vmul.f32 %v3988_v1, %v3927_v2  ;;  %2842 = vrsqrt.f32 %v3969_v26  ;;  %vm1822_vm13 = vweird.f32 %v3967_v0  ;;  %vm1652_vm14 = vweird.f32 %v3988_v1 }
 0x33e   : > { %v1817_v59 = vmul.f32 %v3967_v0, %v1816_v14  ;;  %v1656_v24 = vmul.f32 %v3996_v34, %v3938_v27  ;;  %2844 = vrsqrt.f32 %v3971_v32  ;;  %v1423_v31 = vmul.f32 %v3986_v3, %v3986_v3  ;;  %vm4099_vm3 = vmor %vm1821_vm10, %vm1822_vm13 }
 0x33f   : > { %v1647_v58 = vmul.f32 %v3988_v1, %v1646_v23  ;;  %v2091_v48 = vadd.f32 %v2059_v52, %v2027_v8  ;;  %vm1662_vm15 = vweird.f32 %v3996_v34  ;;  %vm1661_vm2 = vweird.f32 %v3938_v27  ;;  %vm4115_vm4 = vmor %vm1651_vm11, %vm1652_vm14 }
 0x340   : > { %v1818_v61 = vmul.f32 0.5, %v1817_v59  ;;  %v1321_v60 = vpop.xlane.xlu1 %1320  ;;  %v1270_v29 = vpop.xlane.xlu2 %1269  ;;  %v1657_v10 = vmul.f32 %v3996_v34, %v1656_v24  ;;  %v1515_v25 = vsel %vm938_vm1, %v1423_v31, 0.0  ;;  %v1644_v59 = vsel %vm4031_vm8, %v3869_v4, %v3999_v39  ;;  %vm4162_vm6 = vmor %vm1661_vm2, %vm1662_vm15 }
 0x341   : > { %v1343_v21 = vmul.f32 %v3453_v38, %v1270_v29  ;;  %v1502_v47 = vpop.xlane.xlu0 %1501  ;;  %v1648_v18 = vmul.f32 0.5, %v1647_v58  ;;  %v1360_v42 = vmul.f32 %v3453_v38, %v1321_v60  ;;  %1516 = vadd.xlane.f32.xlu0 %v1515_v25  ;;  %2657 = vmatmul.msk.f32.gmra.mxu3 %vm938_vm1, %v2091_v48  ;;  %v1926_v58 = vmul.f32 %v1804_v17, %v3546_v63 }
 0x342   : > { %v1546_v16 = vmul.f32 %v1502_v47, %v3453_v38  ;;  %v1819_v23 = vsub.f32 1.5, %v1818_v61  ;;  %v1658_v28 = vmul.f32 0.5, %v1657_v10  ;;  %v1810_v29 = vmul.f32 %v3941_v20, %v1809_v9 }
 0x343   : > { %v4037_v37 = vpop.eup %2842  ;;  %v4048_v30 = vsub.f32 %v3621_v11, %v1343_v21  ;;  %v1649_v61 = vsub.f32 1.5, %v1648_v18  ;;  %v4058_v60 = vsub.f32 %v3624_v12, %v1360_v42  ;;  %v1979_v31 = vadd.f32 %v3690_v55, %v1944_v56  ;;  %v2043_v21 = vld [vmem:[%s3125_s23 + $0x20] sm:$0xff] }
 0x344   : > { %v4044_v6 = vpop.eup %2844  ;;  %v4050_v24 = vadd.f32 1e-05, %v1546_v16  ;;  %v1820_v63 = vmul.f32 %v3967_v0, %v1819_v23  ;;  %v1666_v11 = vmul.f32 %v4037_v37, %v3969_v26  ;;  %v1659_v8 = vsub.f32 1.5, %v1658_v28 }
 0x345   : > { %v1826_v52 = vmul.f32 %v4044_v6, %v3971_v32  ;;  %v1961_v47 = vmul.f32 %v3683_v13, %v1926_v58  ;;  %v1407_v18 = vmul.f32 %v4048_v30, %v4048_v30  ;;  %v1650_v42 = vmul.f32 %v3988_v1, %v1649_v61 }
 0x346   : > { %2846 = vrsqrt.f32 %v4050_v24  ;;  %v2011_v16 = vmax.f32 %v1979_v31, 0.0  ;;  %v1424_v9 = vmul.f32 %v4058_v60, %v4058_v60  ;;  %v1814_v61 = vsel %vm4082_vm0, %v3941_v20, %v1810_v29  ;;  %v2060_v31 = vld [vmem:[%s3125_s23 + $0xa8] sm:$0xff] }
 0x347   : > { %v1827_v17 = vmul.f32 %v4044_v6, %v1826_v52  ;;  %v1996_v23 = vadd.f32 %v3690_v55, %v1961_v47  ;;  %v1467_v56 = vsel %vm938_vm1, %v1407_v18, 0.0  ;;  %v1667_v52 = vmul.f32 %v4037_v37, %v1666_v11 }
 0x348   : > { %v1505_v10 = vpop.xlane.xlu1 %1504  ;;  %v1454_v12 = vpop.xlane.xlu2 %1453  ;;  %1468 = vadd.xlane.f32.xlu1 %v1467_v56  ;;  %v1824_v20 = vsel %vm4099_vm3, %v3967_v0, %v1820_v63  ;;  %v1660_v0 = vmul.f32 %v3996_v34, %v1659_v8  ;;  %vm1832_vm5 = vweird.f32 %v4044_v6  ;;  %v1927_v8 = vmul.f32 %v1814_v61, %v3561_v15 }
 0x349   : > { %v1547_v40 = vmul.f32 %v1505_v10, %v3453_v38  ;;  %v1828_v25 = vmul.f32 0.5, %v1827_v17  ;;  %v1530_v58 = vmul.f32 %v1454_v12, %v3453_v38  ;;  %v2075_v17 = vadd.f32 %v2043_v21, %v2011_v16  ;;  %v1273_v12 = vpop.xlane.xlu0 %1272 }
 0x34a   : > { %v1518_v10 = vsel %vm938_vm1, %v1424_v9, 0.0  ;;  %v2028_v29 = vmax.f32 %v1996_v23, 0.0  ;;  %v1654_v21 = vsel %vm4115_vm4, %v3988_v1, %v1650_v42  ;;  %v1344_v18 = vmul.f32 %v3453_v38, %v1273_v12 }
 0x34b   : > { %v4088_v28 = vadd.f32 1e-05, %v1547_v40  ;;  %1519 = vadd.xlane.f32.xlu2 %v1518_v10  ;;  %v4120_v11 = vadd.f32 1e-05, %v1530_v58  ;;  %v1829_v63 = vsub.f32 1.5, %v1828_v25  ;;  %2641 = vmatmul.msk.f32.gmra.mxu1 %vm938_vm1, %v2075_v17  ;;  %v1668_v16 = vmul.f32 0.5, %v1667_v52 }
 0x34c   : > { %v4106_v47 = vpop.eup %2846  ;;  %v2092_v40 = vadd.f32 %v2060_v31, %v2028_v29  ;;  %v1910_v1 = vmul.f32 %v1644_v59, %v3543_v19  ;;  %v4142_v25 = vsub.f32 %v3642_v57, %v1344_v18  ;;  %v1911_v23 = vmul.f32 %v1654_v21, %v3577_v33  ;;  %v2044_v29 = vld [vmem:[%s3125_s23 + $0x28] sm:$0xff]  ;;  %v2061_v21 = vld [vmem:[%s3125_s23 + $0xb0] sm:$0xff] }
 0x34d   : > { %2848 = vrsqrt.f32 %v4088_v28  ;;  %v1836_v2 = vmul.f32 %v4106_v47, %v4050_v24  ;;  %v1928_v56 = vmul.f32 %v1824_v20, %v3583_v41  ;;  %v1830_v14 = vmul.f32 %v4044_v6, %v1829_v63 }
 0x34e   : > { %2850 = vrsqrt.f32 %v4120_v11  ;;  %2658 = vmatmul.msk.f32.gmra.mxu3 %vm938_vm1, %v2092_v40  ;;  %v1945_v4 = vmul.f32 %v3683_v13, %v1910_v1  ;;  %v1962_v19 = vmul.f32 %v3683_v13, %v1927_v8  ;;  %v1408_v57 = vmul.f32 %v4142_v25, %v4142_v25 }
 0x34f   : > { %v1837_v9 = vmul.f32 %v4106_v47, %v1836_v2  ;;  %v1946_v59 = vmul.f32 %v3683_v13, %v1911_v23  ;;  %v1963_v33 = vmul.f32 %v3683_v13, %v1928_v56  ;;  %vm1831_vm7 = vweird.f32 %v3971_v32 }
 0x350   : > { %v1457_v42 = vpop.xlane.xlu2 %1456  ;;  %v1980_v52 = vadd.f32 %v3690_v55, %v1945_v4  ;;  %v1664_v27 = vsel %vm4162_vm6, %v3996_v34, %v1660_v0  ;;  %vm4177_vm8 = vmor %vm1831_vm7, %vm1832_vm5  ;;  %v1997_v32 = vadd.f32 %v3690_v55, %v1962_v19  ;;  %v1470_v10 = vsel %vm938_vm1, %v1408_v57, 0.0  ;;  %v2062_v57 = vld [vmem:[%s3125_s23 + $0xb8] sm:$0xff] }
 0x351   : > { %v1531_v48 = vmul.f32 %v1457_v42, %v3453_v38  ;;  %v1838_v58 = vmul.f32 0.5, %v1837_v9  ;;  %v1669_v12 = vsub.f32 1.5, %v1668_v16  ;;  %v1834_v20 = vsel %vm4177_vm8, %v4044_v6, %v1830_v14  ;;  %1471 = vadd.xlane.f32.xlu0 %v1470_v10 }
 0x352   : > { %v2012_v0 = vmax.f32 %v1980_v52, 0.0  ;;  %v2029_v63 = vmax.f32 %v1997_v32, 0.0  ;;  %v1981_v2 = vadd.f32 %v3690_v55, %v1946_v59  ;;  %v1998_v40 = vadd.f32 %v3690_v55, %v1963_v33 }
 0x353   : > { %v4150_v15 = vpop.eup %2848  ;;  %v4152_v39 = vadd.f32 1e-05, %v1531_v48  ;;  %v1839_v61 = vsub.f32 1.5, %v1838_v58  ;;  %vm1842_vm9 = vweird.f32 %v4106_v47  ;;  %vm1672_vm10 = vweird.f32 %v4037_v37 }
 0x354   : > { %v1846_v5 = vmul.f32 %v4150_v15, %v4088_v28  ;;  %v4170_v17 = vpop.eup %2850  ;;  %v2076_v9 = vadd.f32 %v2044_v29, %v2012_v0  ;;  %v2093_v1 = vadd.f32 %v2061_v21, %v2029_v63  ;;  %v1912_v8 = vmul.f32 %v1664_v27, %v3586_v43  ;;  %v2063_v21 = vld [vmem:[%s3125_s23 + $0xc0] sm:$0xff] }
 0x355   : > { %2852 = vrsqrt.f32 %v4152_v39  ;;  %v1676_v34 = vmul.f32 %v4170_v17, %v4120_v11  ;;  %v1840_v18 = vmul.f32 %v4106_v47, %v1839_v61  ;;  %v1670_v42 = vmul.f32 %v4037_v37, %v1669_v12 }
 0x356   : > { %v1847_v49 = vmul.f32 %v4150_v15, %v1846_v5  ;;  %vm1841_vm11 = vweird.f32 %v4050_v24  ;;  %v1929_v23 = vmul.f32 %v1834_v20, %v3603_v44  ;;  %vm1671_vm12 = vweird.f32 %v3969_v26  ;;  %2642 = vmatmul.msk.f32.gmra.mxu1 %vm938_vm1, %v2076_v9  ;;  %2659 = vmatmul.msk.f32.gmra.mxu3 %vm938_vm1, %v2093_v1  ;;  %v2045_v26 = vld [vmem:[%s3125_s23 + $0x30] sm:$0xff] }
 0x357   : > { %v1677_v6 = vmul.f32 %v4170_v17, %v1676_v34  ;;  %vm4205_vm13 = vmor %vm1841_vm11, %vm1842_vm9  ;;  %v2013_v43 = vmax.f32 %v1981_v2, 0.0  ;;  %v2030_v58 = vmax.f32 %v1998_v40, 0.0  ;;  %v1947_v33 = vmul.f32 %v3683_v13, %v1912_v8  ;;  %v2064_v8 = vld [vmem:[%s3125_s23 + $0xc8] sm:$0xff] }
 0x358   : > { %v1848_v16 = vmul.f32 0.5, %v1847_v49  ;;  %v1844_v24 = vsel %vm4205_vm13, %v4106_v47, %v1840_v18  ;;  %vm4220_vm14 = vmor %vm1671_vm12, %vm1672_vm10  ;;  %v1964_v41 = vmul.f32 %v3683_v13, %v1929_v23  ;;  %vm1852_vm15 = vweird.f32 %v4150_v15 }
 0x359   : > { %v1678_v48 = vmul.f32 0.5, %v1677_v6  ;;  %v1674_v47 = vsel %vm4220_vm14, %v4037_v37, %v1670_v42  ;;  %v2077_v5 = vadd.f32 %v2045_v26, %v2013_v43  ;;  %v2094_v52 = vadd.f32 %v2062_v57, %v2030_v58 }
 0x35a   : > { %v1849_v4 = vsub.f32 1.5, %v1848_v16  ;;  %v1999_v27 = vadd.f32 %v3690_v55, %v1964_v41  ;;  %v1930_v31 = vmul.f32 %v1844_v24, %v3618_v54  ;;  %vm1682_vm0 = vweird.f32 %v4170_v17 }
 0x35b   : > { %v4202_v56 = vpop.eup %2852  ;;  %v1679_v44 = vsub.f32 1.5, %v1678_v48  ;;  %vm1851_vm2 = vweird.f32 %v4088_v28  ;;  %v1982_v37 = vadd.f32 %v3690_v55, %v1947_v33  ;;  %v1913_v20 = vmul.f32 %v1674_v47, %v3600_v46  ;;  %v2047_v48 = vld [vmem:[%s3125_s23 + $0x40] sm:$0xff]  ;;  %v2049_v33 = vld [vmem:[%s3125_s23 + $0x50] sm:$0xff] }
 0x35c   : > { %v1686_v19 = vmul.f32 %v4202_v56, %v4152_v39  ;;  %v1850_v32 = vmul.f32 %v4150_v15, %v1849_v4  ;;  %vm4239_vm3 = vmor %vm1851_vm2, %vm1852_vm15  ;;  %vm1681_vm4 = vweird.f32 %v4120_v11  ;;  %v2031_v54 = vmax.f32 %v1999_v27, 0.0  ;;  %v2046_v11 = vld [vmem:[%s3125_s23 + $0x38] sm:$0xff] }
 0x35d   : > { %v1680_v10 = vmul.f32 %v4170_v17, %v1679_v44  ;;  %vm1683_vm5 = vmor %vm1681_vm4, %vm1682_vm0  ;;  %v1965_v34 = vmul.f32 %v3683_v13, %v1930_v31  ;;  %v2014_v0 = vmax.f32 %v1982_v37, 0.0  ;;  %v1948_v63 = vmul.f32 %v3683_v13, %v1913_v20  ;;  %v2048_v44 = vld [vmem:[%s3125_s23 + $0x48] sm:$0xff] }
 0x35e   : > { %v1687_v61 = vmul.f32 %v4202_v56, %v1686_v19  ;;  %2643 = vmatmul.msk.f32.gmra.mxu1 %vm938_vm1, %v2077_v5  ;;  %2660 = vmatmul.msk.f32.gmra.mxu3 %vm938_vm1, %v2094_v52  ;;  %v1854_v28 = vsel %vm4239_vm3, %v4150_v15, %v1850_v32  ;;  %v2095_v2 = vadd.f32 %v2063_v21, %v2031_v54  ;;  %vm1692_vm6 = vweird.f32 %v4202_v56  ;;  %v2065_v19 = vld [vmem:[%s3125_s23 + $0xd0] sm:$0xff]  ;;  %v4287_v32 = vld [vmem:[%s4506_s14] ss:$0 sm:$0xff] }
 0x35f   : > { %v1684_v46 = vsel %vm1683_vm5, %v4170_v17, %v1680_v10  ;;  %v2000_v40 = vadd.f32 %v3690_v55, %v1965_v34  ;;  %v1931_v16 = vmul.f32 %v1854_v28, %v3639_v45  ;;  %v2078_v15 = vadd.f32 %v2046_v11, %v2014_v0 }
 0x360   : > { %v1688_v12 = vmul.f32 0.5, %v1687_v61  ;;  %v1914_v18 = vmul.f32 %v1684_v46, %v3634_v62  ;;  %v1983_v17 = vadd.f32 %v3690_v55, %v1948_v63  ;;  %vm1691_vm7 = vweird.f32 %v4152_v39 }
 0x361   : > { %vm1693_vm8 = vmor %vm1691_vm7, %vm1692_vm6  ;;  %v2032_v9 = vmax.f32 %v2000_v40, 0.0  ;;  %v1966_v45 = vmul.f32 %v3683_v13, %v1931_v16 }
 0x362   : > { %v1689_v29 = vsub.f32 1.5, %v1688_v12  ;;  %v1949_v62 = vmul.f32 %v3683_v13, %v1914_v18  ;;  %v2015_v42 = vmax.f32 %v1983_v17, 0.0 }
 0x363   : > { %v2096_v23 = vadd.f32 %v2064_v8, %v2032_v9  ;;  %v2001_v14 = vadd.f32 %v3690_v55, %v1966_v45  ;;  %v4295_v9 = vld [vmem:[%s4470_s27] ss:$0 sm:$0xff] }
 0x364   : > { %v1690_v6 = vmul.f32 %v4202_v56, %v1689_v29  ;;  %v1984_v39 = vadd.f32 %v3690_v55, %v1949_v62  ;;  %v2079_v58 = vadd.f32 %v2047_v48, %v2015_v42 }
 0x365   : > { %v2033_v4 = vmax.f32 %v2001_v14, 0.0 }
 0x366   : > { %2644 = vmatmul.msk.f32.gmra.mxu1 %vm938_vm1, %v2078_v15  ;;  %2661 = vmatmul.msk.f32.gmra.mxu3 %vm938_vm1, %v2095_v2  ;;  %v1694_v1 = vsel %vm1693_vm8, %v4202_v56, %v1690_v6  ;;  %v2016_v24 = vmax.f32 %v1984_v39, 0.0 }
 0x367   : > { %v1915_v43 = vmul.f32 %v1694_v1, %v3652_v53  ;;  %v2097_v57 = vadd.f32 %v2065_v19, %v2033_v4 }
 0x368   : > { %v2080_v26 = vadd.f32 %v2048_v44, %v2016_v24 }
 0x369   : > { %v1950_v56 = vmul.f32 %v3683_v13, %v1915_v43 }
 0x36b   : > { %v1985_v59 = vadd.f32 %v3690_v55, %v1950_v56 }
 0x36d   : > { %v2017_v53 = vmax.f32 %v1985_v59, 0.0 }
 0x36e   : > { %2645 = vmatmul.msk.f32.gmra.mxu1 %vm938_vm1, %v2079_v58  ;;  %2662 = vmatmul.msk.f32.gmra.mxu3 %vm938_vm1, %v2096_v23  ;;  %v2066_v58 = vld [vmem:[%s3125_s23 + $0xd8] sm:$0xff] }
 0x36f   : > { %v2081_v41 = vadd.f32 %v2049_v33, %v2017_v53 }
 0x376   : > { %2646 = vmatmul.msk.f32.gmra.mxu1 %vm938_vm1, %v2080_v26  ;;  %2663 = vmatmul.msk.f32.gmra.mxu3 %vm938_vm1, %v2097_v57 }
 0x37e   : > { %2647 = vmatmul.msk.f32.gmra.mxu1 %vm938_vm1, %v2081_v41 }
 0x384   : > { %v1508_v47 = vpop.xlane.xlu0 %1507 }
 0x385   : > { %v1548_v61 = vmul.f32 %v1508_v47, %v3453_v38 }
 0x387   : > { %v1580_v5 = vadd.f32 1e-05, %v1548_v61 }
 0x389   : > { %2854 = vrsqrt.f32 %v1580_v5  ;;  %vm1861_vm10 = vweird.f32 %v1580_v5 }
 0x38b   : > { %v1460_v13 = vpop.xlane.xlu1 %1459 }
 0x38c   : > { %v1532_v52 = vmul.f32 %v1460_v13, %v3453_v38  ;;  %v1511_v27 = vpop.xlane.xlu2 %1510  ;;  %v2050_v13 = vld [vmem:[%s3125_s23 + $0x58] sm:$0xff] }
 0x38d   : > { %v1549_v31 = vmul.f32 %v1511_v27, %v3453_v38 }
 0x38e   : > { %v1564_v55 = vadd.f32 1e-05, %v1532_v52  ;;  %v2224_v20 = vpop.f32.mrf.mxu1 }
 0x38f   : > { %v2855_v10 = vpop.eup %2854  ;;  %v1581_v12 = vadd.f32 1e-05, %v1549_v31  ;;  %v2225_v49 = vadd.f32 %v4287_v32, %v2224_v20 }
 0x390   : > { %2856 = vrsqrt.f32 %v1564_v55  ;;  %v1856_v37 = vmul.f32 %v2855_v10, %v1580_v5  ;;  %vm1862_vm9 = vweird.f32 %v2855_v10  ;;  %vm1701_vm13 = vweird.f32 %v1564_v55 }
 0x391   : > { %2858 = vrsqrt.f32 %v1581_v12  ;;  %2320 = vst [vmem:[%s3130_s13] sm:$0xff] %v2225_v49  ;;  %vm1863_vm11 = vmor %vm1861_vm10, %vm1862_vm9  ;;  %vm1871_vm0 = vweird.f32 %v1581_v12 }
 0x392   : > { %v1857_v54 = vmul.f32 %v2855_v10, %v1856_v37 }
 0x394   : > { %v1858_v34 = vmul.f32 0.5, %v1857_v54 }
 0x396   : > { %v2857_v28 = vpop.eup %2856  ;;  %v1859_v46 = vsub.f32 1.5, %v1858_v34 }
 0x397   : > { %v1696_v29 = vmul.f32 %v2857_v28, %v1564_v55  ;;  %v2859_v21 = vpop.eup %2858  ;;  %vm1702_vm12 = vweird.f32 %v2857_v28 }
 0x398   : > { %v1860_v0 = vmul.f32 %v2855_v10, %v1859_v46  ;;  %v1866_v11 = vmul.f32 %v2859_v21, %v1581_v12  ;;  %vm1872_vm14 = vweird.f32 %v2859_v21  ;;  %vm1703_vm15 = vmor %vm1701_vm13, %vm1702_vm12  ;;  %v2067_v12 = vld [vmem:[%s3125_s23 + $0xe0] sm:$0xff] }
 0x399   : > { %v1697_v63 = vmul.f32 %v2857_v28, %v1696_v29  ;;  %vm1873_vm2 = vmor %vm1871_vm0, %vm1872_vm14 }
 0x39a   : > { %v1864_v2 = vsel %vm1863_vm11, %v2855_v10, %v1860_v0  ;;  %v1867_v18 = vmul.f32 %v2859_v21, %v1866_v11 }
 0x39b   : > { %v1698_v40 = vmul.f32 0.5, %v1697_v63  ;;  %v1932_v16 = vmul.f32 %v1864_v2, %v3708_v22  ;;  %v4302_v22 = vld [vmem:[%s4471_s7] ss:$0 sm:$0xff] }
 0x39c   : > { %v1868_v15 = vmul.f32 0.5, %v1867_v18  ;;  %v1463_v17 = vpop.xlane.xlu0 %1462 }
 0x39d   : > { %v1699_v6 = vsub.f32 1.5, %v1698_v40  ;;  %v1967_v62 = vmul.f32 %v4295_v9, %v1932_v16  ;;  %v1533_v8 = vmul.f32 %v1463_v17, %v3453_v38 }
 0x39e   : > { %v1869_v1 = vsub.f32 1.5, %v1868_v15 }
 0x39f   : > { %v1700_v45 = vmul.f32 %v2857_v28, %v1699_v6  ;;  %v2002_v42 = vadd.f32 %v4302_v22, %v1967_v62  ;;  %v1565_v39 = vadd.f32 1e-05, %v1533_v8  ;;  %v2272_v14 = vpop.f32.mrf.mxu3  ;;  %v2227_v43 = vpop.f32.mrf.mxu1 }
 0x3a0   : > { %v1870_v23 = vmul.f32 %v2859_v21, %v1869_v1  ;;  %v2273_v24 = vadd.f32 %v4287_v32, %v2272_v14  ;;  %v2228_v4 = vadd.f32 %v4287_v32, %v2227_v43 }
 0x3a1   : > { %v1704_v48 = vsel %vm1703_vm15, %v2857_v28, %v1700_v45  ;;  %v2034_v56 = vmax.f32 %v2002_v42, 0.0  ;;  %2860 = vrsqrt.f32 %v1565_v39  ;;  %vm1711_vm4 = vweird.f32 %v1565_v39 }
 0x3a2   : > { %v1916_v44 = vmul.f32 %v1704_v48, %v3734_v7  ;;  %v1874_v19 = vsel %vm1873_vm2, %v2859_v21, %v1870_v23  ;;  %2336 = vst [vmem:[%s3130_s13 + $0x80] sm:$0xff] %v2273_v24 }
 0x3a3   : > { %v2098_v26 = vadd.f32 %v2066_v58, %v2034_v56  ;;  %v1933_v59 = vmul.f32 %v1874_v19, %v3731_v51  ;;  %2321 = vst [vmem:[%s3130_s13 + $0x8] sm:$0xff] %v2228_v4  ;;  %v1514_v41 = vpop.xlane.xlu1 %1513  ;;  %v1466_v47 = vpop.xlane.xlu2 %1465 }
 0x3a4   : > { %v1951_v57 = vmul.f32 %v4295_v9, %v1916_v44  ;;  %v1550_v7 = vmul.f32 %v1514_v41, %v3453_v38  ;;  %v1534_v61 = vmul.f32 %v1466_v47, %v3453_v38 }
 0x3a5   : > { %2664 = vmatmul.msk.f32.gmra.mxu3 %vm938_vm1, %v2098_v26  ;;  %v1968_v33 = vmul.f32 %v4295_v9, %v1933_v59 }
 0x3a6   : > { %v1986_v53 = vadd.f32 %v4302_v22, %v1951_v57  ;;  %v1582_v31 = vadd.f32 1e-05, %v1550_v7  ;;  %v1566_v10 = vadd.f32 1e-05, %v1534_v61 }
 0x3a7   : > { %v2003_v52 = vadd.f32 %v4302_v22, %v1968_v33  ;;  %v2861_v51 = vpop.eup %2860  ;;  %v2275_v27 = vpop.f32.mrf.mxu3 }
 0x3a8   : > { %v2018_v5 = vmax.f32 %v1986_v53, 0.0  ;;  %v1706_v55 = vmul.f32 %v2861_v51, %v1565_v39  ;;  %v2276_v37 = vadd.f32 %v4287_v32, %v2275_v27  ;;  %2862 = vrsqrt.f32 %v1582_v31  ;;  %v2230_v34 = vpop.f32.mrf.mxu1 }
 0x3a9   : > { %v2035_v49 = vmax.f32 %v2003_v52, 0.0  ;;  %2864 = vrsqrt.f32 %v1566_v10  ;;  %v2231_v28 = vadd.f32 %v4287_v32, %v2230_v34  ;;  %vm1712_vm3 = vweird.f32 %v2861_v51 }
 0x3aa   : > { %v2082_v20 = vadd.f32 %v2050_v13, %v2018_v5  ;;  %v1707_v54 = vmul.f32 %v2861_v51, %v1706_v55  ;;  %2337 = vst [vmem:[%s3130_s13 + $0x88] sm:$0xff] %v2276_v37  ;;  %vm1713_vm5 = vmor %vm1711_vm4, %vm1712_vm3  ;;  %vm1881_vm8 = vweird.f32 %v1582_v31  ;;  %vm1721_vm10 = vweird.f32 %v1566_v10  ;;  %v2052_v37 = vld [vmem:[%s3125_s23 + $0x68] sm:$0xff] }
 0x3ab   : > { %v2099_v46 = vadd.f32 %v2067_v12, %v2035_v49  ;;  %2322 = vst [vmem:[%s3130_s13 + $0x10] sm:$0xff] %v2231_v28 }
 0x3ac   : > { %2648 = vmatmul.msk.f32.gmra.mxu1 %vm938_vm1, %v2082_v20  ;;  %v1708_v29 = vmul.f32 0.5, %v1707_v54 }
 0x3ad   : > { %2665 = vmatmul.msk.f32.gmra.mxu3 %vm938_vm1, %v2099_v46 }
 0x3ae   : > { %v1709_v21 = vsub.f32 1.5, %v1708_v29  ;;  %v2863_v0 = vpop.eup %2862 }
 0x3af   : > { %v2865_v11 = vpop.eup %2864  ;;  %v1876_v2 = vmul.f32 %v2863_v0, %v1582_v31  ;;  %vm1882_vm6 = vweird.f32 %v2863_v0 }
 0x3b0   : > { %v1710_v63 = vmul.f32 %v2861_v51, %v1709_v21  ;;  %v1716_v18 = vmul.f32 %v2865_v11, %v1566_v10  ;;  %vm1722_vm7 = vweird.f32 %v2865_v11  ;;  %vm1883_vm9 = vmor %vm1881_vm8, %vm1882_vm6  ;;  %v2068_v10 = vld [vmem:[%s3125_s23 + $0xe8] sm:$0xff] }
 0x3b1   : > { %v1877_v16 = vmul.f32 %v2863_v0, %v1876_v2  ;;  %v2278_v6 = vpop.f32.mrf.mxu3  ;;  %vm1723_vm11 = vmor %vm1721_vm10, %vm1722_vm7 }
 0x3b2   : > { %v1714_v40 = vsel %vm1713_vm5, %v2861_v51, %v1710_v63  ;;  %v1717_v17 = vmul.f32 %v2865_v11, %v1716_v18  ;;  %v2279_v62 = vadd.f32 %v4287_v32, %v2278_v6 }
 0x3b3   : > { %v1917_v15 = vmul.f32 %v1714_v40, %v3843_v35  ;;  %v1878_v1 = vmul.f32 0.5, %v1877_v16  ;;  %v2051_v35 = vld [vmem:[%s3125_s23 + $0x60] sm:$0xff] }
 0x3b4   : > { %v1517_v45 = vpop.xlane.xlu0 %1516  ;;  %v1718_v48 = vmul.f32 0.5, %v1717_v17  ;;  %2338 = vst [vmem:[%s3130_s13 + $0x90] sm:$0xff] %v2279_v62 }
 0x3b5   : > { %v1551_v8 = vmul.f32 %v1517_v45, %v3453_v38  ;;  %v1952_v42 = vmul.f32 %v4295_v9, %v1917_v15  ;;  %v1879_v23 = vsub.f32 1.5, %v1878_v1 }
 0x3b6   : > { %v1719_v43 = vsub.f32 1.5, %v1718_v48 }
 0x3b7   : > { %v1583_v39 = vadd.f32 1e-05, %v1551_v8  ;;  %v1987_v14 = vadd.f32 %v4302_v22, %v1952_v42  ;;  %v1880_v58 = vmul.f32 %v2863_v0, %v1879_v23  ;;  %v2233_v56 = vpop.f32.mrf.mxu1 }
 0x3b8   : > { %v1720_v4 = vmul.f32 %v2865_v11, %v1719_v43  ;;  %v2234_v19 = vadd.f32 %v4287_v32, %v2233_v56  ;;  %v2069_v43 = vld [vmem:[%s3125_s23 + $0xf0] sm:$0xff] }
 0x3b9   : > { %2866 = vrsqrt.f32 %v1583_v39  ;;  %v2019_v24 = vmax.f32 %v1987_v14, 0.0  ;;  %v1884_v44 = vsel %vm1883_vm9, %v2863_v0, %v1880_v58  ;;  %vm1891_vm13 = vweird.f32 %v1583_v39 }
 0x3ba   : > { %v1724_v57 = vsel %vm1723_vm11, %v2865_v11, %v1720_v4  ;;  %v1934_v59 = vmul.f32 %v1884_v44, %v3881_v50  ;;  %2323 = vst [vmem:[%s3130_s13 + $0x18] sm:$0xff] %v2234_v19 }
 0x3bb   : > { %v2083_v26 = vadd.f32 %v2051_v35, %v2019_v24  ;;  %v1469_v53 = vpop.xlane.xlu1 %1468  ;;  %v1918_v33 = vmul.f32 %v1724_v57, %v3876_v36  ;;  %v2281_v41 = vpop.f32.mrf.mxu3 }
 0x3bc   : > { %v1535_v47 = vmul.f32 %v1469_v53, %v3453_v38  ;;  %v1969_v61 = vmul.f32 %v4295_v9, %v1934_v59  ;;  %v2282_v13 = vadd.f32 %v4287_v32, %v2281_v41 }
 0x3bd   : > { %2649 = vmatmul.msk.f32.gmra.mxu1 %vm938_vm1, %v2083_v26  ;;  %v1953_v52 = vmul.f32 %v4295_v9, %v1918_v33 }
 0x3be   : > { %v1520_v7 = vpop.xlane.xlu2 %1519  ;;  %v1567_v27 = vadd.f32 1e-05, %v1535_v47  ;;  %v2004_v55 = vadd.f32 %v4302_v22, %v1969_v61  ;;  %2339 = vst [vmem:[%s3130_s13 + $0x98] sm:$0xff] %v2282_v13 }
 0x3bf   : > { %v2867_v5 = vpop.eup %2866  ;;  %v1552_v50 = vmul.f32 %v1520_v7, %v3453_v38  ;;  %v1988_v31 = vadd.f32 %v4302_v22, %v1953_v52 }
 0x3c0   : > { %v1886_v51 = vmul.f32 %v2867_v5, %v1583_v39  ;;  %2868 = vrsqrt.f32 %v1567_v27  ;;  %v2036_v20 = vmax.f32 %v2004_v55, 0.0  ;;  %vm1892_vm12 = vweird.f32 %v2867_v5 }
 0x3c1   : > { %v1584_v36 = vadd.f32 1e-05, %v1552_v50  ;;  %v2020_v49 = vmax.f32 %v1988_v31, 0.0  ;;  %vm1893_vm14 = vmor %vm1891_vm13, %vm1892_vm12  ;;  %vm1731_vm2 = vweird.f32 %v1567_v27  ;;  %v2053_v50 = vld [vmem:[%s3125_s23 + $0x70] sm:$0xff] }
 0x3c2   : > { %v1887_v12 = vmul.f32 %v2867_v5, %v1886_v51  ;;  %v2100_v34 = vadd.f32 %v2068_v10, %v2036_v20 }
 0x3c3   : > { %2870 = vrsqrt.f32 %v1584_v36  ;;  %v2084_v28 = vadd.f32 %v2052_v37, %v2020_v49  ;;  %vm1901_vm4 = vweird.f32 %v1584_v36 }
 0x3c4   : > { %v1888_v54 = vmul.f32 0.5, %v1887_v12  ;;  %v2284_v29 = vpop.f32.mrf.mxu3  ;;  %2666 = vmatmul.msk.f32.gmra.mxu3 %vm938_vm1, %v2100_v34  ;;  %v1472_v0 = vpop.xlane.xlu0 %1471 }
 0x3c5   : > { %v2285_v21 = vadd.f32 %v4287_v32, %v2284_v29  ;;  %2650 = vmatmul.msk.f32.gmra.mxu1 %vm938_vm1, %v2084_v28  ;;  %v1536_v2 = vmul.f32 %v1472_v0, %v3453_v38  ;;  %v2054_v29 = vld [vmem:[%s3125_s23 + $0x78] sm:$0xff] }
 0x3c6   : > { %v1889_v46 = vsub.f32 1.5, %v1888_v54  ;;  %v2869_v63 = vpop.eup %2868 }
 0x3c7   : > { %v1726_v18 = vmul.f32 %v2869_v63, %v1567_v27  ;;  %2340 = vst [vmem:[%s3130_s13 + $0xa0] sm:$0xff] %v2285_v21  ;;  %v1568_v45 = vadd.f32 1e-05, %v1536_v2  ;;  %vm1732_vm15 = vweird.f32 %v2869_v63 }
 0x3c8   : > { %v1890_v11 = vmul.f32 %v2867_v5, %v1889_v46  ;;  %v2236_v16 = vpop.f32.mrf.mxu1  ;;  %vm1733_vm3 = vmor %vm1731_vm2, %vm1732_vm15 }
 0x3c9   : > { %v2871_v40 = vpop.eup %2870  ;;  %v2237_v17 = vadd.f32 %v4287_v32, %v2236_v16  ;;  %v1727_v62 = vmul.f32 %v2869_v63, %v1726_v18  ;;  %2872 = vrsqrt.f32 %v1568_v45  ;;  %vm1741_vm7 = vweird.f32 %v1568_v45 }
 0x3ca   : > { %v1894_v6 = vsel %vm1893_vm14, %v2867_v5, %v1890_v11  ;;  %v1896_v15 = vmul.f32 %v2871_v40, %v1584_v36  ;;  %vm1902_vm0 = vweird.f32 %v2871_v40 }
 0x3cb   : > { %v1935_v1 = vmul.f32 %v1894_v6, %v3986_v3  ;;  %2324 = vst [vmem:[%s3130_s13 + $0x20] sm:$0xff] %v2237_v17  ;;  %v1728_v42 = vmul.f32 0.5, %v1727_v62  ;;  %vm1903_vm5 = vmor %vm1901_vm4, %vm1902_vm0 }
 0x3cc   : > { %v1897_v8 = vmul.f32 %v2871_v40, %v1896_v15 }
 0x3cd   : > { %v1970_v38 = vmul.f32 %v4295_v9, %v1935_v1  ;;  %v1729_v23 = vsub.f32 1.5, %v1728_v42 }
 0x3ce   : > { %v1898_v48 = vmul.f32 0.5, %v1897_v8 }
 0x3cf   : > { %v2005_v39 = vadd.f32 %v4302_v22, %v1970_v38  ;;  %v1730_v35 = vmul.f32 %v2869_v63, %v1729_v23  ;;  %v2873_v4 = vpop.eup %2872 }
 0x3d0   : > { %v1899_v14 = vsub.f32 1.5, %v1898_v48  ;;  %v1736_v57 = vmul.f32 %v2873_v4, %v1568_v45  ;;  %vm1742_vm6 = vweird.f32 %v2873_v4 }
 0x3d1   : > { %v2037_v58 = vmax.f32 %v2005_v39, 0.0  ;;  %v2287_v24 = vpop.f32.mrf.mxu3  ;;  %v1734_v56 = vsel %vm1733_vm3, %v2869_v63, %v1730_v35  ;;  %vm1743_vm8 = vmor %vm1741_vm7, %vm1742_vm6 }
 0x3d2   : > { %v1900_v3 = vmul.f32 %v2871_v40, %v1899_v14  ;;  %v2288_v44 = vadd.f32 %v4287_v32, %v2287_v24  ;;  %v1919_v59 = vmul.f32 %v1734_v56, %v4048_v30  ;;  %v1737_v33 = vmul.f32 %v2873_v4, %v1736_v57 }
 0x3d3   : > { %v2101_v19 = vadd.f32 %v2069_v43, %v2037_v58  ;;  %v2239_v41 = vpop.f32.mrf.mxu1 }
 0x3d4   : > { %v1904_v26 = vsel %vm1903_vm5, %v2871_v40, %v1900_v3  ;;  %2341 = vst [vmem:[%s3130_s13 + $0xa8] sm:$0xff] %v2288_v44  ;;  %v1954_v47 = vmul.f32 %v4295_v9, %v1919_v59  ;;  %v2240_v7 = vadd.f32 %v4287_v32, %v2239_v41  ;;  %v1738_v5 = vmul.f32 0.5, %v1737_v33 }
 0x3d5   : > { %2667 = vmatmul.msk.f32.gmra.mxu3 %vm938_vm1, %v2101_v19  ;;  %v1936_v53 = vmul.f32 %v1904_v26, %v4058_v60  ;;  %v2070_v60 = vld [vmem:[%s3125_s23 + $0xf8] sm:$0xff] }
 0x3d6   : > { %v1989_v13 = vadd.f32 %v4302_v22, %v1954_v47  ;;  %2325 = vst [vmem:[%s3130_s13 + $0x28] sm:$0xff] %v2240_v7  ;;  %v1739_v52 = vsub.f32 1.5, %v1738_v5 }
 0x3d7   : > { %v1971_v61 = vmul.f32 %v4295_v9, %v1936_v53 }
 0x3d8   : > { %v2021_v51 = vmax.f32 %v1989_v13, 0.0  ;;  %v1740_v55 = vmul.f32 %v2873_v4, %v1739_v52 }
 0x3d9   : > { %v2006_v30 = vadd.f32 %v4302_v22, %v1971_v61  ;;  %v2290_v36 = vpop.f32.mrf.mxu3 }
 0x3da   : > { %v2085_v31 = vadd.f32 %v2053_v50, %v2021_v51  ;;  %v2291_v10 = vadd.f32 %v4287_v32, %v2290_v36  ;;  %v1744_v37 = vsel %vm1743_vm8, %v2873_v4, %v1740_v55 }
 0x3db   : > { %v2038_v27 = vmax.f32 %v2006_v30, 0.0  ;;  %v2242_v20 = vpop.f32.mrf.mxu1  ;;  %v1920_v54 = vmul.f32 %v1744_v37, %v4142_v25 }
 0x3dc   : > { %2651 = vmatmul.msk.f32.gmra.mxu1 %vm938_vm1, %v2085_v31  ;;  %2342 = vst [vmem:[%s3130_s13 + $0xb0] sm:$0xff] %v2291_v10  ;;  %v2243_v49 = vadd.f32 %v4287_v32, %v2242_v20 }
 0x3dd   : > { %v2102_v12 = vadd.f32 %v2070_v60, %v2038_v27  ;;  %v1955_v34 = vmul.f32 %v4295_v9, %v1920_v54 }
 0x3de   : > { %2326 = vst [vmem:[%s3130_s13 + $0x30] sm:$0xff] %v2243_v49 }
 0x3df   : > { %2668 = vmatmul.msk.f32.gmra.mxu3 %vm938_vm1, %v2102_v12  ;;  %v1990_v28 = vadd.f32 %v4302_v22, %v1955_v34 }
 0x3e1   : > { %v2293_v46 = vpop.f32.mrf.mxu3  ;;  %v2022_v0 = vmax.f32 %v1990_v28, 0.0 }
 0x3e2   : > { %v2294_v21 = vadd.f32 %v4287_v32, %v2293_v46 }
 0x3e3   : > { %v2245_v63 = vpop.f32.mrf.mxu1  ;;  %v2086_v2 = vadd.f32 %v2054_v29, %v2022_v0 }
 0x3e4   : > { %2343 = vst [vmem:[%s3130_s13 + $0xb8] sm:$0xff] %v2294_v21  ;;  %v2246_v11 = vadd.f32 %v4287_v32, %v2245_v63 }
 0x3e5   : > { %2652 = vmatmul.msk.f32.gmra.mxu1 %vm938_vm1, %v2086_v2 }
 0x3e6   : > { %2327 = vst [vmem:[%s3130_s13 + $0x38] sm:$0xff] %v2246_v11 }
 0x3e9   : > { %v2296_v25 = vpop.f32.mrf.mxu3 }
 0x3ea   : > { %v2297_v9 = vadd.f32 %v4287_v32, %v2296_v25 }
 0x3eb   : > { %v2248_v22 = vpop.f32.mrf.mxu1 }
 0x3ec   : > { %2344 = vst [vmem:[%s3130_s13 + $0xc0] sm:$0xff] %v2297_v9  ;;  %v2249_v40 = vadd.f32 %v4287_v32, %v2248_v22 }
 0x3ee   : > { %2328 = vst [vmem:[%s3130_s13 + $0x40] sm:$0xff] %v2249_v40 }
 0x3f1   : > { %v2299_v18 = vpop.f32.mrf.mxu3 }
 0x3f2   : > { %v2300_v16 = vadd.f32 %v4287_v32, %v2299_v18 }
 0x3f3   : > { %v2251_v6 = vpop.f32.mrf.mxu1 }
 0x3f4   : > { %2345 = vst [vmem:[%s3130_s13 + $0xc8] sm:$0xff] %v2300_v16  ;;  %v2252_v15 = vadd.f32 %v4287_v32, %v2251_v6 }
 0x3f6   : > { %2329 = vst [vmem:[%s3130_s13 + $0x48] sm:$0xff] %v2252_v15 }
 0x3f9   : > { %v2302_v17 = vpop.f32.mrf.mxu3 }
 0x3fa   : > { %v2303_v62 = vadd.f32 %v4287_v32, %v2302_v17 }
 0x3fb   : > { %v2254_v45 = vpop.f32.mrf.mxu1 }
 0x3fc   : > { %2346 = vst [vmem:[%s3130_s13 + $0xd0] sm:$0xff] %v2303_v62  ;;  %v2255_v1 = vadd.f32 %v4287_v32, %v2254_v45 }
 0x3fe   : > { %2330 = vst [vmem:[%s3130_s13 + $0x50] sm:$0xff] %v2255_v1 }
 0x428   : > { %v2305_v8 = vpop.f32.mrf.mxu3 }
 0x429   : > { %v2306_v42 = vadd.f32 %v4287_v32, %v2305_v8  ;;  %v2257_v38 = vpop.f32.mrf.mxu1 }
 0x42a   : > { %v2258_v48 = vadd.f32 %v4287_v32, %v2257_v38 }
 0x42b   : > { %2347 = vst [vmem:[%s3130_s13 + $0xd8] sm:$0xff] %v2306_v42 }
 0x42c   : > { %2331 = vst [vmem:[%s3130_s13 + $0x58] sm:$0xff] %v2258_v48 }
 0x430   : > { %v2308_v23 = vpop.f32.mrf.mxu3 }
 0x431   : > { %v2309_v39 = vadd.f32 %v4287_v32, %v2308_v23 }
 0x433   : > { %2348 = vst [vmem:[%s3130_s13 + $0xe0] sm:$0xff] %v2309_v39 }
 0x43a   : > { %v2260_v14 = vpop.f32.mrf.mxu1 }
 0x43b   : > { %v2261_v43 = vadd.f32 %v4287_v32, %v2260_v14 }
 0x43d   : > { %2332 = vst [vmem:[%s3130_s13 + $0x60] sm:$0xff] %v2261_v43 }
 0x442   : > { %v2263_v35 = vpop.f32.mrf.mxu1 }
 0x443   : > { %v2264_v58 = vadd.f32 %v4287_v32, %v2263_v35 }
 0x445   : > { %2333 = vst [vmem:[%s3130_s13 + $0x68] sm:$0xff] %v2264_v58 }
 0x447   : > { %v2311_v3 = vpop.f32.mrf.mxu3 }
 0x448   : > { %v2312_v24 = vadd.f32 %v4287_v32, %v2311_v3 }
 0x44a   : > { %2349 = vst [vmem:[%s3130_s13 + $0xe8] sm:$0xff] %v2312_v24 }
 0x458   : > { %v2314_v4 = vpop.f32.mrf.mxu3 }
 0x459   : > { %v2315_v56 = vadd.f32 %v4287_v32, %v2314_v4  ;;  %v2266_v44 = vpop.f32.mrf.mxu1 }
 0x45a   : > { %v2267_v19 = vadd.f32 %v4287_v32, %v2266_v44 }
 0x45b   : > { %2350 = vst [vmem:[%s3130_s13 + $0xf0] sm:$0xff] %v2315_v56 }
 0x45c   : > { %2334 = vst [vmem:[%s3130_s13 + $0x70] sm:$0xff] %v2267_v19 }
 0x462   : > { %v2317_v26 = vpop.f32.mrf.mxu3  ;;  %v2269_v59 = vpop.f32.mrf.mxu1 }
 0x463   : > { %v2318_v57 = vadd.f32 %v4287_v32, %v2317_v26  ;;  %v2270_v53 = vadd.f32 %v4287_v32, %v2269_v59 }
 0x465   : > { %2351 = vst [vmem:[%s3130_s13 + $0xf8] sm:$0xff] %v2318_v57 }
 0x466   : > { %2335 = vst [vmem:[%s3130_s13 + $0x78] sm:$0xff] %v2270_v53 }
 0x467 PF: > { %s22_s16 = sadd.s32 1, %s2972_s16   ;;  %s4507_s12 = sld [smem:[#allocation6_spill]] }
 0x468   : > { %p19_p4 = scmp.ge.s32.totalorder %s22_s16, 6   ;;  %s4508_s14 = sld [smem:[#allocation7_spill]] }
 0x469   : > { %s4509_s23 = sld [smem:[#allocation8_spill]]  ;;  %s4510_s30 = smov %s2948_s10 }
 0x46a   : > { %s4511_s10 = smov %s2952_s11  ;;  %s4512_s11 = smov %s3096_s29 }
 0x46b   : > { %s4513_s13 = smov %s2968_s15  ;;  %21 = sbr.rel (!%p19_p4) target bundleno = 10 (0xa), region = 110 }
 0x46f   : > { %s4514_s15 = smov %s4509_s23 }
 0x470   :  { %2374 = vsyncpa [#allocation4], 1 }
 0x471   :  { %2376 = vsyncpa [#allocation4 + $0x1], 1 }

</bundles_post_ra>
